<compile_context>
chip_gen: v5e
topology: v5e:2x2
jax: 0.10.0
libtpu: 0.0.40
codegen_flags: <defaults>
</compile_context>

<pallas_src>
import jax
import jax.numpy as jnp
from jax import lax
from jax.experimental import pallas as pl
from jax.experimental.pallas import tpu as pltpu


def _round_up(x, m):
    return (x + m - 1) // m * m


# ---------------------------------------------------------------------------
# Fused Bottleneck kernel (one batch image per grid step)
# ---------------------------------------------------------------------------

def _bottleneck_kernel(x_ref, w1_ref, b1_ref, w2_ref, b2_ref, w3_ref, b3_ref,
                       o_ref, y1_ref):
    """Shapes (batch dim squeezed by the BlockSpec):

      x_ref : (H, W, Cin)      producer dtype (f32 here); cast to bf16 in-kernel
      w1    : (Cin, Mp)  bf16    b1 : (1, Mp)   f32   (BN scale pre-folded)
      w2    : (3, 3*Mp, Mp) bf16 b2 : (1, Mp)   f32   (dy-major, K groups dx taps)
      w3    : (Mp, Cout) bf16    b3 : (1, Cout) f32
      o_ref : (H, W, Cout)       (Cout == Cin, identity residual)
      y1_ref: (H+2, W, Mp) bf16  stage-1 output, 1-row halo in H only
    """
    h, w, cin = x_ref.shape
    mp = w1_ref.shape[1]
    cout = w3_ref.shape[1]

    # Zero ONLY the two halo rows (2 * W * Mp bf16 -- negligible).  Done every
    # step so the kernel stays correct when the batch axis is split across
    # cores (each core owns a private scratch and may never see step 0).
    zero_row = jnp.zeros((1, w, mp), jnp.bfloat16)
    y1_ref[0:1] = zero_row
    y1_ref[h + 1:h + 2] = zero_row

    # Row-band size: keep flattened band rows <= 256 so the stage-2 f32
    # accumulator stays register/MRB-resident instead of spilling to VMEM.
    th = max(1, min(h, 256 // max(w, 1)))

    # ---- stage 1: 1x1 conv (+ folded-BN bias) + ReLU -> bf16 halo scratch ---
    for r0 in range(0, h, th):
        r1 = min(r0 + th, h)
        tb = r1 - r0
        xb = x_ref[r0:r1].astype(jnp.bfloat16).reshape(tb * w, cin)
        h1 = jnp.dot(xb, w1_ref[...], preferred_element_type=jnp.float32)
        h1 = jnp.maximum(h1 + b1_ref[...], 0.0)
        y1_ref[r0 + 1:r1 + 1] = h1.reshape(tb, w, mp).astype(jnp.bfloat16)

    # ---- stage 2 (3x3, stride 1, pad 1) + stage 3 + residual, per row band --
    for r0 in range(0, h, th):
        r1 = min(r0 + th, h)
        tb = r1 - r0
        zcol = jnp.zeros((tb, 1, mp), jnp.bfloat16)
        acc = None
        for dy in range(3):
            # Leading-dim (free) slice of the halo scratch for this dy.
            rows = y1_ref[r0 + dy:r0 + dy + tb]                  # (tb, W, Mp)
            # dx shifts realized at the value level along W with zero edges
            # (no W+2 strided buffer / masked interior stores).
            left = jnp.concatenate([zcol, rows[:, :w - 1, :]], axis=1)
            right = jnp.concatenate([rows[:, 1:, :], zcol], axis=1)
            lhs = jnp.concatenate([left, rows, right],
                                  axis=2).reshape(tb * w, 3 * mp)
            part = jnp.dot(lhs, w2_ref[dy], preferred_element_type=jnp.float32)
            acc = part if acc is None else acc + part            # register acc
        h2 = jnp.maximum(acc + b2_ref[...], 0.0)

        # stage 3: 1x1 conv + bias + residual (original f32 input) + ReLU
        h3 = jnp.dot(h2.astype(jnp.bfloat16), w3_ref[...],
                     preferred_element_type=jnp.float32)
        resid = x_ref[r0:r1].astype(jnp.float32).reshape(tb * w, cin)
        h3 = h3 + b3_ref[...] + resid
        o_ref[r0:r1] = jnp.maximum(h3, 0.0).reshape(tb, w, cout).astype(o_ref.dtype)


# ---------------------------------------------------------------------------
# pallas_call wrapper
# ---------------------------------------------------------------------------

def bottleneck_forward_nhwc(x_nhwc, prepared, *, out_dtype=None):
    """Fused Bottleneck forward on NHWC input. Returns NHWC output."""
    n, h, w, cin = x_nhwc.shape
    mp = prepared["w1"].shape[1]
    cout = prepared["w3"].shape[1]
    assert cin == cout, "identity residual requires Cin == Cout (= 4 * mid)"
    out_dtype = out_dtype or x_nhwc.dtype

    # VMEM budget derived from the actual blocks: >= 32 MiB (v7x-safe), raised
    # (up to 100 MiB) only when bigger tiles need it (v5e/v6e have 128 MiB).
    in_bytes = h * w * cin * x_nhwc.dtype.itemsize
    out_bytes = h * w * cout * jnp.dtype(out_dtype).itemsize
    wgt_bytes = sum(int(prepared[k].size) * prepared[k].dtype.itemsize
                    for k in ("w1", "w2", "w3", "b1", "b2", "b3"))
    scratch_bytes = (h + 2) * w * mp * 2
    est = 2 * (in_bytes + out_bytes) + 2 * wgt_bytes + scratch_bytes + (4 << 20)
    vmem_limit = int(min(100 << 20, max(32 << 20, 2 * est)))

    grid_spec = pltpu.PrefetchScalarGridSpec(
        num_scalar_prefetch=0,
        grid=(n,),
        in_specs=[
            # streamed activation tile (one image), double-buffered by Pallas
            pl.BlockSpec((None, h, w, cin), lambda i: (i, 0, 0, 0)),
            # resident weights / biases (constant block index)
            pl.BlockSpec((cin, mp), lambda i: (0, 0)),
            pl.BlockSpec((1, mp), lambda i: (0, 0)),
            pl.BlockSpec((3, 3 * mp, mp), lambda i: (0, 0, 0)),
            pl.BlockSpec((1, mp), lambda i: (0, 0)),
            pl.BlockSpec((mp, cout), lambda i: (0, 0)),
            pl.BlockSpec((1, cout), lambda i: (0, 0)),
        ],
        out_specs=pl.BlockSpec((None, h, w, cout), lambda i: (i, 0, 0, 0)),
        scratch_shapes=[
            pltpu.VMEM((h + 2, w, mp), jnp.bfloat16),   # stage-1 out + H halo
        ],
    )
    return pl.pallas_call(
        _bottleneck_kernel,
        out_shape=jax.ShapeDtypeStruct((n, h, w, cout), out_dtype),
        grid_spec=grid_spec,
        compiler_params=pltpu.CompilerParams(
            dimension_semantics=("parallel",),          # megacore / v7x 2 TCs
            vmem_limit_bytes=vmem_limit,
        ),
    )(x_nhwc, prepared["w1"], prepared["b1"], prepared["w2"], prepared["b2"],
      prepared["w3"], prepared["b3"])


def bottleneck_forward(x_nchw, prepared, stride=1, down_sampling=None):
    """NCHW wrapper matching the PyTorch module's layout (test compatibility
    only; real pipelines should call bottleneck_forward_nhwc and stay NHWC)."""
    if stride != 1 or down_sampling is not None:
        raise NotImplementedError(
            "only the identity Bottleneck configuration is implemented")
    x_nhwc = jnp.transpose(x_nchw, (0, 2, 3, 1))
    out_nhwc = bottleneck_forward_nhwc(x_nhwc, prepared, out_dtype=x_nchw.dtype)
    return jnp.transpose(out_nhwc, (0, 3, 1, 2))


# ---------------------------------------------------------------------------
# Parameter construction / preparation + pure-JAX reference
# ---------------------------------------------------------------------------

def _fold_bn(gamma, beta, mean, var, eps=1e-5):
    scale = gamma / jnp.sqrt(var + eps)
    bias = beta - mean * scale
    return scale.reshape(1, -1), bias.reshape(1, -1)


def make_params(key, input_size, output_size, expansion=4):
    """Deterministic parameters mirroring the PyTorch module (eval-mode BN)."""
    ks = jax.random.split(key, 15)
    cin, mid, cout = input_size, output_size, output_size * expansion

    def bn(k0, k1, k2, k3, c):
        gamma = jax.random.uniform(k0, (c,), jnp.float32, 0.5, 1.5)
        beta = jax.random.normal(k1, (c,), jnp.float32) * 0.1
        mean = jax.random.normal(k2, (c,), jnp.float32) * 0.1
        var = jnp.abs(jax.random.normal(k3, (c,), jnp.float32)) + 0.5
        return gamma, beta, mean, var

    w1 = jax.random.normal(ks[0], (cin, mid), jnp.float32) * 0.1          # (Cin, Mid)
    w2 = jax.random.normal(ks[1], (3, 3, mid, mid), jnp.float32) * 0.1    # HWIO
    w3 = jax.random.normal(ks[2], (mid, cout), jnp.float32) * 0.1         # (Mid, Cout)
    s1, b1 = _fold_bn(*bn(ks[3], ks[4], ks[5], ks[6], mid))
    s2, b2 = _fold_bn(*bn(ks[7], ks[8], ks[9], ks[10], mid))
    s3, b3 = _fold_bn(*bn(ks[11], ks[12], ks[13], ks[14], cout))
    return dict(w1=w1, w2=w2, w3=w3, s1=s1, b1=b1, s2=s2, b2=b2, s3=s3, b3=b3)


def prepare_params(params, compute_dtype=jnp.bfloat16):
    """Fold the BN scale into the conv weights (f32, before the bf16 cast),
    pad the internal `mid` channels to a multiple of 128 (lane-dense, full MXU
    tiles), and pre-concatenate the three dx taps of the 3x3 kernel along K.
    Padded channels have zero weights and zero bias, so they stay exactly 0
    after ReLU and do not affect later stages."""
    mid = params["w1"].shape[1]
    mp = max(128, _round_up(mid, 128))
    pad = mp - mid

    # stage 1: (Cin, Mid) * s1  ->  pad out-channels
    w1f = params["w1"] * params["s1"]                       # (Cin, Mid)
    w1 = jnp.pad(w1f, ((0, 0), (0, pad))).astype(compute_dtype)
    b1 = jnp.pad(params["b1"], ((0, 0), (0, pad)))

    # stage 2: HWIO (3,3,Mid,Mid) * s2 (out) -> pad in/out -> (3, 3*Mp, Mp)
    w2f = params["w2"] * params["s2"].reshape(1, 1, 1, -1)
    w2p = jnp.pad(w2f, ((0, 0), (0, 0), (0, pad), (0, pad)))
    w2 = w2p.reshape(3, 3 * mp, mp).astype(compute_dtype)   # K = [dx0|dx1|dx2]
    b2 = jnp.pad(params["b2"], ((0, 0), (0, pad)))

    # stage 3: (Mid, Cout) * s3 -> pad in-channels
    w3f = params["w3"] * params["s3"]
    w3 = jnp.pad(w3f, ((0, pad), (0, 0))).astype(compute_dtype)
    b3 = params["b3"]

    return dict(w1=w1, b1=b1, w2=w2, b2=b2, w3=w3, b3=b3)


def reference_forward(x_nchw, params, stride=1):
    """Pure-JAX NCHW reference (mirrors the PyTorch forward, eval-mode BN)."""
    def bn_apply(y, s, b):
        return y * s.reshape(1, -1, 1, 1) + b.reshape(1, -1, 1, 1)

    w1 = jnp.transpose(params["w1"], (1, 0))[:, :, None, None]   # OIHW
    w2 = jnp.transpose(params["w2"], (3, 2, 0, 1))               # HWIO -> OIHW
    w3 = jnp.transpose(params["w3"], (1, 0))[:, :, None, None]

    dn = ("NCHW", "OIHW", "NCHW")
    out = lax.conv_general_dilated(x_nchw, w1, (1, 1), "VALID", dimension_numbers=dn)
    out = jnp.maximum(bn_apply(out, params["s1"], params["b1"]), 0.0)
    out = lax.conv_general_dilated(out, w2, (stride, stride), ((1, 1), (1, 1)),
                                   dimension_numbers=dn)
    out = jnp.maximum(bn_apply(out, params["s2"], params["b2"]), 0.0)
    out = lax.conv_general_dilated(out, w3, (1, 1), "VALID", dimension_numbers=dn)
    out = bn_apply(out, params["s3"], params["b3"]) + x_nchw
    return jnp.maximum(out, 0.0)


if __name__ == "__main__":
    # Identity bottleneck: input_size = output_size * expansion, stride = 1.
    # NOTE: this toy config (Cin = Cout = 16) exercises masked lane stores and
    # a K=16 MXU contraction; real ResNet stages have Cin/Cout multiples of 128.
    N, MID, H, W = 2, 4, 16, 16
    CIN = MID * 4                                   # 16

    key = jax.random.PRNGKey(0)
    kx, kp = jax.random.split(key)
    x = jax.random.normal(kx, (N, CIN, H, W), jnp.float32)
    params = make_params(kp, CIN, MID)
    prepared = prepare_params(params)

    out = jax.block_until_ready(bottleneck_forward(x, prepared))
    ref = jax.block_until_ready(reference_forward(x, params))

    assert out.shape == (N, CIN, H, W)
    max_err = float(jnp.max(jnp.abs(out - ref)))
    # bf16 matmul operands (f32 accumulation, f32 residual) -> ~1e-2 budget.
    assert jnp.allclose(out, ref, atol=5e-2, rtol=5e-2), \
        f"mismatch vs reference (max |err| = {max_err})"

    print("KERNEL_OK")
</pallas_src>

<mosaic_0001>
module attributes {stable_mosaic.version = 11 : i64} {
  func.func @_bottleneck_kernel(%arg0: i32, %arg1: memref<1x16x16x16xf32, #tpu.memory_space<vmem>>, %arg2: memref<16x128xbf16, #tpu.memory_space<vmem>>, %arg3: memref<1x128xf32, #tpu.memory_space<vmem>>, %arg4: memref<3x384x128xbf16, #tpu.memory_space<vmem>>, %arg5: memref<1x128xf32, #tpu.memory_space<vmem>>, %arg6: memref<128x16xbf16, #tpu.memory_space<vmem>>, %arg7: memref<1x16xf32, #tpu.memory_space<vmem>>, %arg8: memref<1x16x16x16xf32, #tpu.memory_space<vmem>>, %arg9: memref<18x16x128xbf16, #tpu.memory_space<vmem>>) attributes {dimension_semantics = [#tpu.dimension_semantics<parallel>], iteration_bounds = array<i64: 2>, scalar_prefetch = 0 : i64, scratch_operands = 1 : i64, tpu.core_type = #tpu.core_type<tc>, window_params = [{transform_indices = @transform_0, window_bounds = array<i64: 1, 16, 16, 16>}, {pipeline_mode = #tpu.pipeline_mode<synchronous>, transform_indices = @transform_1, window_bounds = array<i64: 16, 128>}, {pipeline_mode = #tpu.pipeline_mode<synchronous>, transform_indices = @transform_2, window_bounds = array<i64: 1, 128>}, {pipeline_mode = #tpu.pipeline_mode<synchronous>, transform_indices = @transform_3, window_bounds = array<i64: 3, 384, 128>}, {pipeline_mode = #tpu.pipeline_mode<synchronous>, transform_indices = @transform_4, window_bounds = array<i64: 1, 128>}, {pipeline_mode = #tpu.pipeline_mode<synchronous>, transform_indices = @transform_5, window_bounds = array<i64: 128, 16>}, {pipeline_mode = #tpu.pipeline_mode<synchronous>, transform_indices = @transform_6, window_bounds = array<i64: 1, 16>}, {transform_indices = @transform_7, window_bounds = array<i64: 1, 16, 16, 16>}]} {
    %cst = arith.constant 0.000000e+00 : bf16
    %0 = vector.broadcast %cst : bf16 to vector<1x16x128xbf16>
    %c0 = arith.constant 0 : index
    %c0_0 = arith.constant 0 : index
    %c0_1 = arith.constant 0 : index
    %1 = vector.load %arg9[%c0, %c0_0, %c0_1] : memref<18x16x128xbf16, #tpu.memory_space<vmem>>, vector<1x16x128xbf16>
    tpu.vector_store %arg9[%c0, %c0_0, %c0_1], %0 {strides = array<i32>} : memref<18x16x128xbf16, #tpu.memory_space<vmem>>, vector<1x16x128xbf16>,
    %c17 = arith.constant 17 : index
    %c0_2 = arith.constant 0 : index
    %c0_3 = arith.constant 0 : index
    %2 = vector.load %arg9[%c17, %c0_2, %c0_3] : memref<18x16x128xbf16, #tpu.memory_space<vmem>>, vector<1x16x128xbf16>
    tpu.vector_store %arg9[%c17, %c0_2, %c0_3], %0 {strides = array<i32>} : memref<18x16x128xbf16, #tpu.memory_space<vmem>>, vector<1x16x128xbf16>,
    %c0_4 = arith.constant 0 : index
    %c0_5 = arith.constant 0 : index
    %c0_6 = arith.constant 0 : index
    %c0_7 = arith.constant 0 : index
    %3 = vector.load %arg1[%c0_4, %c0_5, %c0_6, %c0_7] : memref<1x16x16x16xf32, #tpu.memory_space<vmem>>, vector<1x16x16x16xf32>
    %4 = vector.shape_cast %3 : vector<1x16x16x16xf32> to vector<16x16x16xf32>
    %5 = arith.truncf %4 : vector<16x16x16xf32> to vector<16x16x16xbf16>
    %6 = vector.shape_cast %5 : vector<16x16x16xbf16> to vector<256x16xbf16>
    %c0_8 = arith.constant 0 : index
    %c0_9 = arith.constant 0 : index
    %7 = vector.load %arg2[%c0_8, %c0_9] : memref<16x128xbf16, #tpu.memory_space<vmem>>, vector<16x128xbf16>
    %cst_10 = arith.constant dense<0.000000e+00> : vector<256x128xf32>
    %8 = tpu.matmul %6, %7, %cst_10 {dimension_numbers = #tpu.dot_dimension_numbers<[1], [0], [0], [1], [0, 0, 1, 1], [], []>} : vector<256x16xbf16>, vector<16x128xbf16>, vector<256x128xf32> -> vector<256x128xf32>
    %c0_11 = arith.constant 0 : index
    %c0_12 = arith.constant 0 : index
    %9 = vector.load %arg3[%c0_11, %c0_12] : memref<1x128xf32, #tpu.memory_space<vmem>>, vector<1x128xf32>
    %10 = vector.broadcast %9 : vector<1x128xf32> to vector<256x128xf32>
    %11 = arith.addf %8, %10 : vector<256x128xf32>
    %cst_13 = arith.constant 0.000000e+00 : f32
    %12 = vector.broadcast %cst_13 : f32 to vector<256x128xf32>
    %13 = arith.maximumf %11, %12 : vector<256x128xf32>
    %14 = vector.shape_cast %13 : vector<256x128xf32> to vector<16x16x128xf32>
    %15 = arith.truncf %14 : vector<16x16x128xf32> to vector<16x16x128xbf16>
    %c1 = arith.constant 1 : index
    %c0_14 = arith.constant 0 : index
    %c0_15 = arith.constant 0 : index
    %16 = vector.load %arg9[%c1, %c0_14, %c0_15] : memref<18x16x128xbf16, #tpu.memory_space<vmem>>, vector<16x16x128xbf16>
    tpu.vector_store %arg9[%c1, %c0_14, %c0_15], %15 {strides = array<i32>} : memref<18x16x128xbf16, #tpu.memory_space<vmem>>, vector<16x16x128xbf16>,
    %cst_16 = arith.constant 0.000000e+00 : bf16
    %17 = vector.broadcast %cst_16 : bf16 to vector<16x1x128xbf16>
    %c0_17 = arith.constant 0 : index
    %c0_18 = arith.constant 0 : index
    %c0_19 = arith.constant 0 : index
    %18 = vector.load %arg9[%c0_17, %c0_18, %c0_19] : memref<18x16x128xbf16, #tpu.memory_space<vmem>>, vector<16x16x128xbf16>
    %19 = vector.extract_strided_slice %18 {offsets = [0, 0, 0], sizes = [16, 15, 128], strides = [1, 1, 1]} : vector<16x16x128xbf16> to vector<16x15x128xbf16>
    %20 = tpu.concatenate %17, %19 in 1 : vector<16x1x128xbf16>, vector<16x15x128xbf16> -> vector<16x16x128xbf16>
    %21 = vector.extract_strided_slice %18 {offsets = [0, 1, 0], sizes = [16, 15, 128], strides = [1, 1, 1]} : vector<16x16x128xbf16> to vector<16x15x128xbf16>
    %22 = tpu.concatenate %21, %17 in 1 : vector<16x15x128xbf16>, vector<16x1x128xbf16> -> vector<16x16x128xbf16>
    %23 = tpu.concatenate %20, %18, %22 in 2 : vector<16x16x128xbf16>, vector<16x16x128xbf16>, vector<16x16x128xbf16> -> vector<16x16x384xbf16>
    %24 = vector.shape_cast %23 : vector<16x16x384xbf16> to vector<256x384xbf16>
    %c0_20 = arith.constant 0 : index
    %c0_21 = arith.constant 0 : index
    %c0_22 = arith.constant 0 : index
    %25 = vector.load %arg4[%c0_20, %c0_21, %c0_22] : memref<3x384x128xbf16, #tpu.memory_space<vmem>>, vector<1x384x128xbf16>
    %26 = vector.shape_cast %25 : vector<1x384x128xbf16> to vector<384x128xbf16>
    %cst_23 = arith.constant dense<0.000000e+00> : vector<256x128xf32>
    %27 = tpu.matmul %24, %26, %cst_23 {dimension_numbers = #tpu.dot_dimension_numbers<[1], [0], [0], [1], [0, 0, 1, 1], [], []>} : vector<256x384xbf16>, vector<384x128xbf16>, vector<256x128xf32> -> vector<256x128xf32>
    %c1_24 = arith.constant 1 : index
    %c0_25 = arith.constant 0 : index
    %c0_26 = arith.constant 0 : index
    %28 = vector.load %arg9[%c1_24, %c0_25, %c0_26] : memref<18x16x128xbf16, #tpu.memory_space<vmem>>, vector<16x16x128xbf16>
    %29 = vector.extract_strided_slice %28 {offsets = [0, 0, 0], sizes = [16, 15, 128], strides = [1, 1, 1]} : vector<16x16x128xbf16> to vector<16x15x128xbf16>
    %30 = tpu.concatenate %17, %29 in 1 : vector<16x1x128xbf16>, vector<16x15x128xbf16> -> vector<16x16x128xbf16>
    %31 = vector.extract_strided_slice %28 {offsets = [0, 1, 0], sizes = [16, 15, 128], strides = [1, 1, 1]} : vector<16x16x128xbf16> to vector<16x15x128xbf16>
    %32 = tpu.concatenate %31, %17 in 1 : vector<16x15x128xbf16>, vector<16x1x128xbf16> -> vector<16x16x128xbf16>
    %33 = tpu.concatenate %30, %28, %32 in 2 : vector<16x16x128xbf16>, vector<16x16x128xbf16>, vector<16x16x128xbf16> -> vector<16x16x384xbf16>
    %34 = vector.shape_cast %33 : vector<16x16x384xbf16> to vector<256x384xbf16>
    %c1_27 = arith.constant 1 : index
    %c0_28 = arith.constant 0 : index
    %c0_29 = arith.constant 0 : index
    %35 = vector.load %arg4[%c1_27, %c0_28, %c0_29] : memref<3x384x128xbf16, #tpu.memory_space<vmem>>, vector<1x384x128xbf16>
    %36 = vector.shape_cast %35 : vector<1x384x128xbf16> to vector<384x128xbf16>
    %cst_30 = arith.constant dense<0.000000e+00> : vector<256x128xf32>
    %37 = tpu.matmul %34, %36, %cst_30 {dimension_numbers = #tpu.dot_dimension_numbers<[1], [0], [0], [1], [0, 0, 1, 1], [], []>} : vector<256x384xbf16>, vector<384x128xbf16>, vector<256x128xf32> -> vector<256x128xf32>
    %38 = arith.addf %27, %37 : vector<256x128xf32>
    %c2 = arith.constant 2 : index
    %c0_31 = arith.constant 0 : index
    %c0_32 = arith.constant 0 : index
    %39 = vector.load %arg9[%c2, %c0_31, %c0_32] : memref<18x16x128xbf16, #tpu.memory_space<vmem>>, vector<16x16x128xbf16>
    %40 = vector.extract_strided_slice %39 {offsets = [0, 0, 0], sizes = [16, 15, 128], strides = [1, 1, 1]} : vector<16x16x128xbf16> to vector<16x15x128xbf16>
    %41 = tpu.concatenate %17, %40 in 1 : vector<16x1x128xbf16>, vector<16x15x128xbf16> -> vector<16x16x128xbf16>
    %42 = vector.extract_strided_slice %39 {offsets = [0, 1, 0], sizes = [16, 15, 128], strides = [1, 1, 1]} : vector<16x16x128xbf16> to vector<16x15x128xbf16>
    %43 = tpu.concatenate %42, %17 in 1 : vector<16x15x128xbf16>, vector<16x1x128xbf16> -> vector<16x16x128xbf16>
    %44 = tpu.concatenate %41, %39, %43 in 2 : vector<16x16x128xbf16>, vector<16x16x128xbf16>, vector<16x16x128xbf16> -> vector<16x16x384xbf16>
    %45 = vector.shape_cast %44 : vector<16x16x384xbf16> to vector<256x384xbf16>
    %c2_33 = arith.constant 2 : index
    %c0_34 = arith.constant 0 : index
    %c0_35 = arith.constant 0 : index
    %46 = vector.load %arg4[%c2_33, %c0_34, %c0_35] : memref<3x384x128xbf16, #tpu.memory_space<vmem>>, vector<1x384x128xbf16>
    %47 = vector.shape_cast %46 : vector<1x384x128xbf16> to vector<384x128xbf16>
    %cst_36 = arith.constant dense<0.000000e+00> : vector<256x128xf32>
    %48 = tpu.matmul %45, %47, %cst_36 {dimension_numbers = #tpu.dot_dimension_numbers<[1], [0], [0], [1], [0, 0, 1, 1], [], []>} : vector<256x384xbf16>, vector<384x128xbf16>, vector<256x128xf32> -> vector<256x128xf32>
    %49 = arith.addf %38, %48 : vector<256x128xf32>
    %c0_37 = arith.constant 0 : index
    %c0_38 = arith.constant 0 : index
    %50 = vector.load %arg5[%c0_37, %c0_38] : memref<1x128xf32, #tpu.memory_space<vmem>>, vector<1x128xf32>
    %51 = vector.broadcast %50 : vector<1x128xf32> to vector<256x128xf32>
    %52 = arith.addf %49, %51 : vector<256x128xf32>
    %cst_39 = arith.constant 0.000000e+00 : f32
    %53 = vector.broadcast %cst_39 : f32 to vector<256x128xf32>
    %54 = arith.maximumf %52, %53 : vector<256x128xf32>
    %55 = arith.truncf %54 : vector<256x128xf32> to vector<256x128xbf16>
    %c0_40 = arith.constant 0 : index
    %c0_41 = arith.constant 0 : index
    %56 = vector.load %arg6[%c0_40, %c0_41] : memref<128x16xbf16, #tpu.memory_space<vmem>>, vector<128x16xbf16>
    %cst_42 = arith.constant dense<0.000000e+00> : vector<256x16xf32>
    %57 = tpu.matmul %55, %56, %cst_42 {dimension_numbers = #tpu.dot_dimension_numbers<[1], [0], [0], [1], [0, 0, 1, 1], [], []>} : vector<256x128xbf16>, vector<128x16xbf16>, vector<256x16xf32> -> vector<256x16xf32>
    %c0_43 = arith.constant 0 : index
    %c0_44 = arith.constant 0 : index
    %c0_45 = arith.constant 0 : index
    %c0_46 = arith.constant 0 : index
    %58 = vector.load %arg1[%c0_43, %c0_44, %c0_45, %c0_46] : memref<1x16x16x16xf32, #tpu.memory_space<vmem>>, vector<1x16x16x16xf32>
    %59 = vector.shape_cast %58 : vector<1x16x16x16xf32> to vector<16x16x16xf32>
    %60 = vector.shape_cast %59 : vector<16x16x16xf32> to vector<256x16xf32>
    %c0_47 = arith.constant 0 : index
    %c0_48 = arith.constant 0 : index
    %61 = vector.load %arg7[%c0_47, %c0_48] : memref<1x16xf32, #tpu.memory_space<vmem>>, vector<1x16xf32>
    %62 = vector.broadcast %61 : vector<1x16xf32> to vector<256x16xf32>
    %63 = arith.addf %57, %62 : vector<256x16xf32>
    %64 = arith.addf %63, %60 : vector<256x16xf32>
    %cst_49 = arith.constant 0.000000e+00 : f32
    %65 = vector.broadcast %cst_49 : f32 to vector<256x16xf32>
    %66 = arith.maximumf %64, %65 : vector<256x16xf32>
    %67 = vector.shape_cast %66 : vector<256x16xf32> to vector<16x16x16xf32>
    %c0_50 = arith.constant 0 : index
    %c0_51 = arith.constant 0 : index
    %c0_52 = arith.constant 0 : index
    %c0_53 = arith.constant 0 : index
    %68 = vector.load %arg8[%c0_50, %c0_51, %c0_52, %c0_53] : memref<1x16x16x16xf32, #tpu.memory_space<vmem>>, vector<1x16x16x16xf32>
    %69 = vector.shape_cast %68 : vector<1x16x16x16xf32> to vector<16x16x16xf32>
    %70 = vector.shape_cast %67 : vector<16x16x16xf32> to vector<1x16x16x16xf32>
    tpu.vector_store %arg8[%c0_50, %c0_51, %c0_52, %c0_53], %70 {strides = array<i32>} : memref<1x16x16x16xf32, #tpu.memory_space<vmem>>, vector<1x16x16x16xf32>,
    return
  }
  func.func @transform_0(%arg0: i32) -> (i32, i32, i32, i32) {
    %c0_i32 = arith.constant 0 : i32
    %c0_i32_0 = arith.constant 0 : i32
    %c0_i32_1 = arith.constant 0 : i32
    %c0_i32_2 = arith.constant 0 : i32
    return %arg0, %c0_i32, %c0_i32_0, %c0_i32_1 : i32, i32, i32, i32
  }
  func.func @transform_1(%arg0: i32) -> (i32, i32) {
    %c0_i32 = arith.constant 0 : i32
    %c0_i32_0 = arith.constant 0 : i32
    %c0_i32_1 = arith.constant 0 : i32
    return %c0_i32, %c0_i32_0 : i32, i32
  }
  func.func @transform_2(%arg0: i32) -> (i32, i32) {
    %c0_i32 = arith.constant 0 : i32
    %c0_i32_0 = arith.constant 0 : i32
    %c0_i32_1 = arith.constant 0 : i32
    return %c0_i32, %c0_i32_0 : i32, i32
  }
  func.func @transform_3(%arg0: i32) -> (i32, i32, i32) {
    %c0_i32 = arith.constant 0 : i32
    %c0_i32_0 = arith.constant 0 : i32
    %c0_i32_1 = arith.constant 0 : i32
    %c0_i32_2 = arith.constant 0 : i32
    return %c0_i32, %c0_i32_0, %c0_i32_1 : i32, i32, i32
  }
  func.func @transform_4(%arg0: i32) -> (i32, i32) {
    %c0_i32 = arith.constant 0 : i32
    %c0_i32_0 = arith.constant 0 : i32
    %c0_i32_1 = arith.constant 0 : i32
    return %c0_i32, %c0_i32_0 : i32, i32
  }
  func.func @transform_5(%arg0: i32) -> (i32, i32) {
    %c0_i32 = arith.constant 0 : i32
    %c0_i32_0 = arith.constant 0 : i32
    %c0_i32_1 = arith.constant 0 : i32
    return %c0_i32, %c0_i32_0 : i32, i32
  }
  func.func @transform_6(%arg0: i32) -> (i32, i32) {
    %c0_i32 = arith.constant 0 : i32
    %c0_i32_0 = arith.constant 0 : i32
    %c0_i32_1 = arith.constant 0 : i32
    return %c0_i32, %c0_i32_0 : i32, i32
  }
  func.func @transform_7(%arg0: i32) -> (i32, i32, i32, i32) {
    %c0_i32 = arith.constant 0 : i32
    %c0_i32_0 = arith.constant 0 : i32
    %c0_i32_1 = arith.constant 0 : i32
    %c0_i32_2 = arith.constant 0 : i32
    return %arg0, %c0_i32, %c0_i32_0, %c0_i32_1 : i32, i32, i32, i32
  }
}

</mosaic_0001>

<bundles_post_ra>
// kernel: tpu_custom_call.1
= control target key start
LH: loop header
LB: loop body
LE: loop exit
PB: predicated region body
PF: predicated region fallthrough
CT: control target
= control target key end

     0   :  { %s6477_s0 = inlined_call_operand.hbm [shape: f32[2,16,16,16], index: 0, kind: input, shape index: {}]   ;;  %s6478_s1 = inlined_call_operand.vmem [shape: bf16[16,128], index: 1, kind: input, shape index: {}]   ;;  %s6479_s2 = inlined_call_operand.vmem [shape: f32[1,128], index: 2, kind: input, shape index: {}]   ;;  %s6480_s3 = inlined_call_operand.hbm [shape: bf16[3,384,128], index: 3, kind: input, shape index: {}]   ;;  %s6481_s4 = inlined_call_operand.vmem [shape: f32[1,128], index: 4, kind: input, shape index: {}]   ;;  %s6482_s5 = inlined_call_operand.vmem [shape: bf16[128,16], index: 5, kind: input, shape index: {}]   ;;  %s6483_s6 = inlined_call_operand.vmem [shape: f32[1,16], index: 6, kind: input, shape index: {}]   ;;  %s6484_s7 = inlined_call_operand.hbm [shape: f32[2,16,16,16], index: 7, kind: output, shape index: {}]  }
   0x1   :  { %6552 = sst [smem:[#allocation96_spill]] %s6480_s3 }
   0x2   :  { %12 = vsyncpa [#allocation4], 0 }
   0x3   :  { %14 = vsyncpa [#allocation4 + $0x1], 0 }
   0x4   :  { %15 = vsyncpa [#allocation7], 0 }
   0x5   :  { %16 = vsyncpa [#allocation5], 0 }
   0x6   :  { %18 = vsyncpa [#allocation5 + $0x1], 0  ;;  %s4659_s24 = smov 0   ;;  %s4661_s25 = smov 0  }
   0x7   :  { %s4663_s26 = smov 0   ;;  %s4665_s27 = smov 0  }
   0x8 LB: > { %s4680_s28 = sadd.s32 4294967295, %s4609_s27   ;;  %s3607_s29 = sadd.s32 4294967294, %s4609_s27   ;;  %s4609_s27 = sphi %s4665_s27, %s6860_s27   ;;  %s4605_s26 = sphi %s4663_s26, %s6859_s26   ;;  %s4601_s25 = sphi %s4661_s25, %s6858_s25   ;;  %s4597_s24 = sphi %s4659_s24, %s6857_s24  }
   0x9   : > { %p44_p0 = scmp.ne.s32.totalorder %s4601_s25, %s4597_s24  ;;  %p45_p1 = scmp.eq.s32.totalorder %s4680_s28, 0 }
   0xa   : > { %p194_p2 = scmp.eq.s32.totalorder %s4680_s28, 1  ;;  %p200_p3 = scmp.eq.s32.totalorder %s3607_s29, 1 }
   0xb   : > { %p4689_p4 = por %p45_p1, %p44_p0  ;;  %p3608_p5 = scmp.ge.s32.totalorder %s4609_s27, 1 }
   0xc   : > { %p4694_p6 = por %p200_p3, %p44_p0  ;;  %p207_p7 = scmp.lt.s32.totalorder %s4609_s27, 3 }
   0xd   : > { %s6555_s3 = sld [smem:[#allocation96_spill]]  ;;  %s4611_s13 = smov [#allocation6]  }
   0xe   : > { %p4702_p8 = pnand %p3608_p5, %p207_p7  ;;  %s226_s14 = sshll.u32 %s4611_s13, 4  ;;  %s227_s14 = int_to_ptr.vmem [resolvable:$true] %s226_s14 }
   0xf   : > { %s4712_s15 = sadd.s32 1, %s4609_s27   ;;  %s4612_s16 = smov 64  }
  0x10   : > { %p4406_p9 = pneg %p4702_p8  ;;  %s4613_s17 = smov 4  }
  0x11   : > { %s28_s18 = ssub.s32 %s4609_s27, %s4712_s15  ;;  %s31_s19 = sadd.s32 1, %s4605_s26 }
  0x12   : > { %p4407_p10 = pnand %p4406_p9, %p45_p1  ;;  %p29_p12 = scmp.eq.s32.totalorder %s28_s18, 0 }
  0x13   : > { %s224_s11 = sshll.u32 %s6555_s3, 4  ;;  %p38_p13 = scmp.ne.s32.totalorder %s4605_s26, %s4601_s25  ;;  %s225_s11 = int_to_ptr.hbm [resolvable:$true] %s224_s11 }
  0x14   : > { %4409 = dma.hbm_to_vmem [thread:$0]  (!%p4407_p10), %s225_s11, 9216, %s227_s14, [#allocation7], %s4612_s16, %s4612_s16, %s4613_s17  }
  0x15   : > { %p39_p0 = scmp.eq.s32.totalorder %s4609_s27, 0  ;;  %p4419_p3 = scmp.lt.s32.totalorder %s4609_s27, 2 }
  0x16   : > { %s4722_s20 = scalar_select %p29_p12, %s4605_s26, %s31_s19  }
  0x17   : > { %p40_p5 = por %p39_p0, %p38_p13  ;;  %p4726_p7 = por %p194_p2, %p38_p13 }
  0x18   : > { %s249_s22 = sand.u32 1, %s4605_s26   ;;  %s4155_s23 = sshll.u32 %s4609_s27, 8 }
  0x19   : > { %s3611_s29 = sshll.u32 %s249_s22, 8  ;;  %s258_s11 = scalar_lea.hbm %s6477_s0, %s4155_s23 }
  0x1a   : > { %s259_s13 = sshll.u32 %s258_s11, 4  ;;  %s253_s14 = scalar_lea.vmem [#allocation3], %s3611_s29  ;;  %s260_s13 = int_to_ptr.hbm [resolvable:$true] %s259_s13 }
  0x1b   : > { %s261_s16 = sshll.u32 %s253_s14, 4  ;;  %p4737_p9 = pnand %p4419_p3, %p40_p5  ;;  %s262_s16 = int_to_ptr.vmem [resolvable:$true] %s261_s16 }
  0x1c   : > { %s250_s18 = scalar_lea.sflag [#allocation4], %s249_s22  ;;  %s4509_s19 = sshra.s32 %s260_s13, 4  ;;  %s4510_s19 = int_to_ptr.hbm [resolvable:$true] %s4509_s19 }
  0x1d   : > { %s4511_s3 = scalar_lea.hbm %s4510_s19, 256  ;;  %p4513_p10 = pneg %p4737_p9 }
  0x1e   : > { %p4512_p2 = scmp.ne.s32.totalorder %s4510_s19, %s4511_s3  ;;  %s4516_s9 = scalar_lea.hbm %s6477_s0, 512 }
  0x1f   : > { %p4517_p0 = scmp.lt.s32.totalorder %s4510_s19, %s6477_s0  ;;  %p4518_p3 = scmp.lt.s32.totalorder %s4516_s9, %s4511_s3 }
  0x20   : > { %p4514_p12 = pnand %p4513_p10, %p4512_p2 }
  0x21   : > { %p4519_p5 = por %p4518_p3, %p4517_p0 }
  0x22   : > { %p4515_p13 = pneg %p4514_p12 }
  0x24   : > { %p4520_p11 = pnand %p4519_p5, %p4515_p13 }
  0x26   : > { %4523 = shalt.err (!%p4520_p11)
}
  0x27   : > { %s4614_s22 = smov 128   ;;  %s4615_s14 = smov 8  }
  0x28   : > { %4413 = dma.hbm_to_vmem [thread:$0]  (!%p4737_p9), %s260_s13, 4096, %s262_s16, %s250_s18, %s4614_s22, %s4614_s22, %s4615_s14  }
  0x29   : > { %273 = sbr.rel (%p4702_p8) target bundleno = 1334 (0x536), region = 48 }
  0x2e   : > { %s4754_s23 = sand.u32 1, %s4601_s25  }
  0x2f   : > { %s3615_s19 = sshll.u32 %s4754_s23, 8  ;;  %s276_s3 = scalar_lea.sflag [#allocation4], %s4754_s23 }
  0x30   : > { %s4760_s29 = scalar_lea.vmem [#allocation3], %s3615_s19 }
  0x31   : > { %4584 = dma.done.wait (%p4689_p4), %s276_s3, 4096  }
  0x32   : > { %4586 = vsyncadd (%p4689_p4), %s276_s3, 4294963200 }
  0x33   : > { %4588 = dma.done.wait (%p45_p1), [#allocation7], 9216  }
  0x34   : > { %4590 = vsyncadd (%p45_p1), [#allocation7], 4294958080  ;;  %v4156_v0 = vld [vmem:[%s6478_s1] sm:$0xff]  ;;  %v322_v1 = vld [vmem:[%s4760_s29] sm:$0xff]  ;;  %vm478_vm0 = vcmask 130048   ;;  %vm953_vm1 = vcmask 1040384  }
  0x35   : > { %v323_v2 = vld [vmem:[%s4760_s29 + $0x8] sm:$0xff]  ;;  %v354_v3 = vpack.c.bf16 %v322_v1, %v322_v1  ;;  %534 = vmatpush.bf16.msra.mxu0 %v4156_v0  ;;  %4381 = vmatpush.bf16.msra.mxu3 %v4156_v0  ;;  %v324_v8 = vld [vmem:[%s4760_s29 + $0x10] sm:$0xff]  ;;  %v325_v9 = vld [vmem:[%s4760_s29 + $0x18] sm:$0xff]  ;;  %vm954_vm2 = vsmask.f32 256  ;;  %vm1020_vm4 = vcmask 1047552  }
  0x36   : > { %v355_v4 = vpack.c.bf16 %v323_v2, %v323_v2  ;;  %v356_v10 = vpack.c.bf16 %v324_v8, %v324_v8  ;;  %v357_v11 = vpack.c.bf16 %v325_v9, %v325_v9  ;;  %v326_v15 = vld [vmem:[%s4760_s29 + $0x20] sm:$0xff]  ;;  %v327_v16 = vld [vmem:[%s4760_s29 + $0x28] sm:$0xff]  ;;  %v328_v22 = vld [vmem:[%s4760_s29 + $0x30] sm:$0xff]  ;;  %vm1021_vm5 = vsmask.f32 7424  ;;  %s6256_s30 = scalar_lea.vmem [#allocation8], %s3615_s19 }
  0x37   : > { %v424_v5 = vunpack.c.l.b16 %v354_v3  ;;  %v358_v17 = vpack.c.bf16 %v326_v15, %v326_v15  ;;  %v359_v18 = vpack.c.bf16 %v327_v16, %v327_v16  ;;  %v329_v23 = vld [vmem:[%s4760_s29 + $0x38] sm:$0xff]  ;;  %v360_v24 = vpack.c.bf16 %v328_v22, %v328_v22  ;;  %v330_v29 = vld [vmem:[%s4760_s29 + $0x40] sm:$0xff]  ;;  %v331_v30 = vld [vmem:[%s4760_s29 + $0x48] sm:$0xff]  ;;  %s4285_s19 = sshll.u32 %s4680_s28, 8  ;;  %s3521_s9 = sshll.u32 %s6256_s30, 4  ;;  %s3522_s9 = int_to_ptr.vmem [resolvable:$true] %s3521_s9 }
  0x38   : > { %v425_v6 = vunpack.c.l.b16 %v355_v4  ;;  %v426_v12 = vunpack.c.l.b16 %v356_v10  ;;  %v427_v13 = vunpack.c.l.b16 %v357_v11  ;;  %v361_v25 = vpack.c.bf16 %v329_v23, %v329_v23  ;;  %v332_v36 = vld [vmem:[%s4760_s29 + $0x50] sm:$0xff]  ;;  %v333_v37 = vld [vmem:[%s4760_s29 + $0x58] sm:$0xff]  ;;  %v334_v44 = vld [vmem:[%s4760_s29 + $0x60] sm:$0xff]  ;;  %s3520_s18 = scalar_lea.hbm %s6484_s7, %s4285_s19  ;;  %s3509_s28 = scalar_lea.sflag [#allocation5], %s4754_s23 }
  0x39   : > { %v428_v19 = vunpack.c.l.b16 %v358_v17  ;;  %v429_v20 = vunpack.c.l.b16 %v359_v18  ;;  %v430_v26 = vunpack.c.l.b16 %v360_v24  ;;  %v362_v31 = vpack.c.bf16 %v330_v29, %v330_v29  ;;  %v4791_v43 = vld [vmem:[#allocation6 + $0x138] sm:$0xff]  ;;  %v335_v45 = vld [vmem:[%s4760_s29 + $0x68] sm:$0xff]  ;;  %v4796_v46 = vld [vmem:[#allocation6 + $0x130] sm:$0xff]  ;;  %s3523_s10 = sshll.u32 %s3520_s18, 4  ;;  %s4559_s3 = scalar_lea.hbm %s6484_s7, 512  ;;  %s3524_s10 = int_to_ptr.hbm [resolvable:$true] %s3523_s10 }
  0x3a   : > { %v456_v7 = vpack.c.b16 %v425_v6, %v424_v5  ;;  %v457_v14 = vpack.c.b16 %v427_v13, %v426_v12  ;;  %v431_v27 = vunpack.c.l.b16 %v361_v25  ;;  %v363_v32 = vpack.c.bf16 %v331_v30, %v331_v30  ;;  %1721 = vmatpush.bf16.msra.mxu2 %v4791_v43  ;;  %v4220_v51 = vld [vmem:[#allocation6 + $0xf8] sm:$0xff]  ;;  %v4799_v53 = vld [vmem:[#allocation6 + $0x128] sm:$0xff]  ;;  %v4219_v54 = vld [vmem:[#allocation6 + $0xf0] sm:$0xff]  ;;  %s4553_s11 = sshra.s32 %s3524_s10, 4  ;;  %s4554_s11 = int_to_ptr.hbm [resolvable:$true] %s4553_s11 }
  0x3b   : > { %v458_v21 = vpack.c.b16 %v429_v20, %v428_v19  ;;  %v432_v33 = vunpack.c.l.b16 %v362_v31  ;;  %v364_v38 = vpack.c.bf16 %v332_v36, %v332_v36  ;;  %v365_v39 = vpack.c.bf16 %v333_v37, %v333_v37  ;;  %1632 = vmatpush.bf16.msra.mxu1 %v4220_v51  ;;  %4382 = vmatpush.bf16.msrb.mxu3 %v4220_v51  ;;  %v4803_v55 = vld [vmem:[#allocation6 + $0x120] sm:$0xff]  ;;  %v336_v56 = vld [vmem:[%s4760_s29 + $0x70] sm:$0xff]  ;;  %v337_v57 = vld [vmem:[%s4760_s29 + $0x78] sm:$0xff]  ;;  %s4555_s22 = scalar_lea.hbm %s4554_s11, 256  ;;  %p4560_p11 = scmp.lt.s32.totalorder %s4554_s11, %s6484_s7 }
  0x3c   : > { %3622 = vmatmul.msk.bf16.vlgmr.msra.gmra.mxu0 %vm478_vm0, %v456_v7  ;;  %v459_v28 = vpack.c.b16 %v431_v27, %v430_v26  ;;  %v433_v34 = vunpack.c.l.b16 %v363_v32  ;;  %v366_v47 = vpack.c.bf16 %v334_v44, %v334_v44  ;;  %v367_v48 = vpack.c.bf16 %v335_v45, %v335_v45  ;;  %v4218_v58 = vld [vmem:[#allocation6 + $0xe8] sm:$0xff]  ;;  %v4808_v61 = vld [vmem:[#allocation6 + $0x118] sm:$0xff]  ;;  %v4217_v62 = vld [vmem:[#allocation6 + $0xe0] sm:$0xff]  ;;  %p4556_p1 = scmp.ne.s32.totalorder %s4554_s11, %s4555_s22  ;;  %p4561_p9 = scmp.lt.s32.totalorder %s4559_s3, %s4555_s22 }
  0x3d   : > { %v434_v40 = vunpack.c.l.b16 %v364_v38  ;;  %v435_v41 = vunpack.c.l.b16 %v365_v39  ;;  %v368_v59 = vpack.c.bf16 %v336_v56, %v336_v56  ;;  %v369_v60 = vpack.c.bf16 %v337_v57, %v337_v57  ;;  %v4811_v1 = vld [vmem:[#allocation6 + $0x110] sm:$0xff]  ;;  %v4216_v2 = vld [vmem:[#allocation6 + $0xd8] sm:$0xff]  ;;  %v4814_v4 = vld [vmem:[#allocation6 + $0x108] sm:$0xff] }
  0x3e   : > { %v460_v35 = vpack.c.b16 %v433_v34, %v432_v33  ;;  %1722 = vmatpush.bf16.msra.mxu2 %v4796_v46  ;;  %v436_v49 = vunpack.c.l.b16 %v366_v47  ;;  %v437_v50 = vunpack.c.l.b16 %v367_v48  ;;  %v4215_v5 = vld [vmem:[#allocation6 + $0xd0] sm:$0xff]  ;;  %v4818_v6 = vld [vmem:[#allocation6 + $0x100] sm:$0xff]  ;;  %v339_v8 = vld [vmem:[%s4760_s29 + $0x88] sm:$0xff]  ;;  %p4557_p4 = pnand %p4556_p1, %p4726_p7  ;;  %p4562_p2 = por %p4561_p9, %p4560_p11 }
  0x3f   : > { %v461_v42 = vpack.c.b16 %v435_v41, %v434_v40  ;;  %1633 = vmatpush.bf16.msra.mxu1 %v4219_v54  ;;  %4383 = vmatpush.bf16.msrb.mxu3 %v4219_v54  ;;  %v438_v63 = vunpack.c.l.b16 %v368_v59  ;;  %v439_v0 = vunpack.c.l.b16 %v369_v60  ;;  %v338_v7 = vld [vmem:[%s4760_s29 + $0x80] sm:$0xff]  ;;  %v4214_v9 = vld [vmem:[#allocation6 + $0xc8] sm:$0xff]  ;;  %v371_v11 = vpack.c.bf16 %v339_v8, %v339_v8  ;;  %v4826_v17 = vld [vmem:[%s6479_s2] ss:$0 sm:$0xff] }
  0x40   : > { %v462_v52 = vpack.c.b16 %v437_v50, %v436_v49  ;;  %v370_v10 = vpack.c.bf16 %v338_v7, %v338_v7  ;;  %v4213_v12 = vld [vmem:[#allocation6 + $0xc0] sm:$0xff]  ;;  %v340_v18 = vld [vmem:[%s4760_s29 + $0x90] sm:$0xff]  ;;  %v341_v19 = vld [vmem:[%s4760_s29 + $0x98] sm:$0xff]  ;;  %p4558_p8 = pneg %p4557_p4 }
  0x41   : > { %v463_v3 = vpack.c.b16 %v439_v0, %v438_v63  ;;  %v373_v22 = vpack.c.bf16 %v341_v19, %v341_v19  ;;  %v4180_v32 = vld [vmem:[#allocation6 + $0x38] sm:$0xff]  ;;  %v342_v33 = vld [vmem:[%s4760_s29 + $0xa0] sm:$0xff]  ;;  %v343_v34 = vld [vmem:[%s4760_s29 + $0xa8] sm:$0xff] }
  0x42   : > { %1723 = vmatpush.bf16.msra.mxu2 %v4799_v53  ;;  %v440_v13 = vunpack.c.l.b16 %v370_v10  ;;  %2043 = vmatpush.bf16.msrb.mxu0 %v4180_v32  ;;  %v4179_v36 = vld [vmem:[#allocation6 + $0x30] sm:$0xff]  ;;  %v374_v39 = vpack.c.bf16 %v342_v33, %v342_v33  ;;  %v375_v40 = vpack.c.bf16 %v343_v34, %v343_v34  ;;  %v4178_v50 = vld [vmem:[#allocation6 + $0x28] sm:$0xff]  ;;  %vm4845_vm3 = vmand %vm953_vm1, %vm954_vm2  ;;  %p4563_p10 = pnand %p4562_p2, %p4558_p8 }
  0x43   : > { %1634 = vmatpush.bf16.msra.mxu1 %v4218_v58  ;;  %4384 = vmatpush.bf16.msrb.mxu3 %v4218_v58  ;;  %v4177_v8 = vld [vmem:[#allocation6 + $0x20] sm:$0xff]  ;;  %v345_v19 = vld [vmem:[%s4760_s29 + $0xb8] sm:$0xff]  ;;  %v4174_v33 = vld [vmem:[#allocation6 + $0x8] sm:$0xff] }
  0x44   : > { %v444_v58 = vunpack.c.l.b16 %v374_v39  ;;  %v445_v59 = vunpack.c.l.b16 %v375_v40  ;;  %vm5294_vm6 = vmand %vm1020_vm4, %vm1021_vm5 }
  0x46   : > { %1724 = vmatpush.bf16.msra.mxu2 %v4803_v55  ;;  %2044 = vmatpush.bf16.msrb.mxu0 %v4179_v36  ;;  %v466_v10 = vpack.c.b16 %v445_v59, %v444_v58  ;;  %v4173_v58 = vld [vmem:[#allocation6] sm:$0xff] }
  0x47   : > { %1635 = vmatpush.bf16.msra.mxu1 %v4217_v62  ;;  %4385 = vmatpush.bf16.msrb.mxu3 %v4217_v62  ;;  %v348_v62 = vld [vmem:[%s4760_s29 + $0xd0] sm:$0xff] }
  0x4a   : > { %1725 = vmatpush.bf16.msra.mxu2 %v4808_v61  ;;  %2045 = vmatpush.bf16.msrb.mxu0 %v4178_v50 }
  0x4b   : > { %1636 = vmatpush.bf16.msra.mxu1 %v4216_v2  ;;  %4386 = vmatpush.bf16.msrb.mxu3 %v4216_v2 }
  0x4c   : > { %3623 = vmatmul.msk.bf16.gmra.mxu0 %vm478_vm0, %v457_v14  ;;  %v441_v14 = vunpack.c.l.b16 %v371_v11 }
  0x4e   : > { %1726 = vmatpush.bf16.msra.mxu2 %v4811_v1  ;;  %v464_v15 = vpack.c.b16 %v441_v14, %v440_v13  ;;  %2046 = vmatpush.bf16.msrb.mxu0 %v4177_v8  ;;  %v347_v8 = vld [vmem:[%s4760_s29 + $0xc8] sm:$0xff] }
  0x4f   : > { %1637 = vmatpush.bf16.msra.mxu1 %v4215_v5  ;;  %4387 = vmatpush.bf16.msrb.mxu3 %v4215_v5  ;;  %v380_v5 = vpack.c.bf16 %v348_v62, %v348_v62 }
  0x51   : > { %v450_v11 = vunpack.c.l.b16 %v380_v5 }
  0x52   : > { %1727 = vmatpush.bf16.msra.mxu2 %v4814_v4 }
  0x53   : > { %1638 = vmatpush.bf16.msra.mxu1 %v4214_v9  ;;  %4388 = vmatpush.bf16.msrb.mxu3 %v4214_v9 }
  0x56   : > { %1728 = vmatpush.bf16.msra.mxu2 %v4818_v6 }
  0x57   : > { %1639 = vmatpush.bf16.msra.mxu1 %v4213_v12  ;;  %4389 = vmatpush.bf16.msrb.mxu3 %v4213_v12 }
  0x5c   : > { %3624 = vmatmul.msk.bf16.gmra.mxu0 %vm478_vm0, %v458_v21  ;;  %v372_v21 = vpack.c.bf16 %v340_v18, %v340_v18  ;;  %v344_v18 = vld [vmem:[%s4760_s29 + $0xb0] sm:$0xff] }
  0x5e   : > { %v442_v27 = vunpack.c.l.b16 %v372_v21  ;;  %v4175_v21 = vld [vmem:[#allocation6 + $0x10] sm:$0xff] }
  0x6c   : > { %3625 = vmatmul.msk.bf16.gmra.mxu0 %vm478_vm0, %v459_v28  ;;  %v443_v28 = vunpack.c.l.b16 %v373_v22 }
  0x6e   : > { %v465_v30 = vpack.c.b16 %v443_v28, %v442_v27 }
  0x7c   : > { %3626 = vmatmul.msk.bf16.gmra.mxu0 %vm478_vm0, %v460_v35 }
  0x8c   : > { %3627 = vmatmul.msk.bf16.gmra.mxu0 %vm478_vm0, %v461_v42 }
  0x9c   : > { %3628 = vmatmul.msk.bf16.gmra.mxu0 %vm478_vm0, %v462_v52 }
  0xac   : > { %3629 = vmatmul.msk.bf16.gmra.mxu0 %vm478_vm0, %v463_v3  ;;  %v349_v3 = vld [vmem:[%s4760_s29 + $0xd8] sm:$0xff] }
  0xad   : > { %v381_v9 = vpack.c.bf16 %v349_v3, %v349_v3 }
  0xaf   : > { %v451_v13 = vunpack.c.l.b16 %v381_v9 }
  0xb1   : > { %v469_v14 = vpack.c.b16 %v451_v13, %v450_v11 }
  0xb3   : > { %3635 = vmatmul.msk.bf16.vlgmr.msra.gmra.mxu3 %vm478_vm0, %v469_v14  ;;  %v379_v14 = vpack.c.bf16 %v347_v8, %v347_v8 }
  0xb4   : > { %4390 = vmatpush.bf16.msra.mxu3 %v4791_v43 }
  0xb8   : > { %4391 = vmatpush.bf16.msra.mxu3 %v4796_v46 }
  0xb9   : > { %v536_v16 = vpop.f32.mrf.mxu0 }
  0xba   : > { %v537_v20 = vadd.f32 %v4826_v17, %v536_v16  ;;  %v4616_v16 = vmov 0  }
  0xbb   : > { %317 = vst [vmem:[#allocation2] sm:$0xf] %v4616_v16 }
  0xbc   : > { %3630 = vmatmul.msk.bf16.gmra.mxu0 %vm478_vm0, %v464_v15  ;;  %v616_v25 = vmax.f32 %v537_v20, 0.0  ;;  %v4176_v15 = vld [vmem:[#allocation6 + $0x18] sm:$0xff]  ;;  %318 = vst [vmem:[#allocation2 + $0x4] sm:$0xf] %v4616_v16  ;;  %4392 = vmatpush.bf16.msra.mxu3 %v4799_v53  ;;  %v346_v53 = vld [vmem:[%s4760_s29 + $0xc0] sm:$0xff] }
  0xbd   : > { %2047 = vmatpush.bf16.msrb.mxu0 %v4176_v15  ;;  %320 = vst [vmem:[#allocation2 + $0x88] sm:$0xf] %v4616_v16  ;;  %v378_v9 = vpack.c.bf16 %v346_v53, %v346_v53 }
  0xbe   : > { %321 = vst [vmem:[#allocation2 + $0x8c] sm:$0xf] %v4616_v16 }
  0xc0   : > { %4393 = vmatpush.bf16.msra.mxu3 %v4803_v55 }
  0xc1   : > { %v538_v23 = vpop.f32.mrf.mxu0  ;;  %2048 = vmatpush.bf16.msrb.mxu0 %v4175_v21 }
  0xc2   : > { %v539_v24 = vadd.f32 %v4826_v17, %v538_v23 }
  0xc4   : > { %v617_v26 = vmax.f32 %v539_v24, 0.0  ;;  %v376_v24 = vpack.c.bf16 %v344_v18, %v344_v18  ;;  %4394 = vmatpush.bf16.msra.mxu3 %v4808_v61 }
  0xc5   : > { %2049 = vmatpush.bf16.msrb.mxu0 %v4174_v33  ;;  %v352_v33 = vld [vmem:[%s4760_s29 + $0xf0] sm:$0xff] }
  0xc6   : > { %v4289_v29 = vpack.c.bf16 %v617_v26, %v616_v25  ;;  %v377_v25 = vpack.c.bf16 %v345_v19, %v345_v19  ;;  %v446_v40 = vunpack.c.l.b16 %v376_v24 }
  0xc8   : > { %4290 = vst [vmem:[#allocation2 + $0x8] sm:$0xff] %v4289_v29   ;;  %4395 = vmatpush.bf16.msra.mxu3 %v4811_v1 }
  0xc9   : > { %v541_v31 = vpop.f32.mrf.mxu0  ;;  %2050 = vmatpush.bf16.msrb.mxu0 %v4173_v58 }
  0xca   : > { %v542_v38 = vadd.f32 %v4826_v17, %v541_v31 }
  0xcc   : > { %3631 = vmatmul.msk.bf16.gmra.mxu0 %vm478_vm0, %v465_v30  ;;  %v618_v54 = vmax.f32 %v542_v38, 0.0  ;;  %4396 = vmatpush.bf16.msra.mxu3 %v4814_v4 }
  0xcf   : > { %v4197_v35 = vld [vmem:[#allocation2 + $0x8] sm:$0xff] }
  0xd0   : > { %v4836_v37 = vld [vmem:[#allocation2 + $0x8] sm:$0xff]  ;;  %1729 = vmatmul.bf16.vlgmr.msra.gmra.mxu2 %v4197_v35  ;;  %v1216_v42 = vshrl.u32 %v4197_v35, 16  ;;  %v1219_v44 = vshll.u32 %v4197_v35, 16  ;;  %4397 = vmatpush.bf16.msra.mxu3 %v4818_v6 }
  0xd1   : > { %v543_v41 = vpop.f32.mrf.mxu0  ;;  %v836_v45 = vshll.u32 %v4836_v37, 16  ;;  %v833_v51 = vshrl.u32 %v4836_v37, 16 }
  0xd2   : > { %v544_v47 = vadd.f32 %v4826_v17, %v543_v41  ;;  %v1218_v48 = vrot.slane %v1216_v42, 7  ;;  %v1359_v49 = vrot.slane %v1219_v44, 1  ;;  %v447_v41 = vunpack.c.l.b16 %v377_v25 }
  0xd3   : > { %v974_v52 = vrot.slane %v836_v45, 1 }
  0xd4   : > { %v619_v56 = vmax.f32 %v544_v47, 0.0  ;;  %v1221_v60 = vor.u32 %v1219_v44, %v1218_v48  ;;  %v4854_v0 = vor.u32 %v1359_v49, %v1216_v42  ;;  %v350_v44 = vld [vmem:[%s4760_s29 + $0xe0] sm:$0xff]  ;;  %v351_v47 = vld [vmem:[%s4760_s29 + $0xe8] sm:$0xff] }
  0xd5   : > { %v4852_v63 = vor.u32 %v974_v52, %v833_v51  ;;  %v382_v52 = vpack.c.bf16 %v350_v44, %v350_v44 }
  0xd6   : > { %v4294_v2 = vpack.c.bf16 %v619_v56, %v618_v54  ;;  %v1343_v7 = vsel %vm4845_vm3, 0, %v1221_v60  ;;  %v383_v54 = vpack.c.bf16 %v351_v47, %v351_v47  ;;  %v467_v60 = vpack.c.b16 %v447_v41, %v446_v40 }
  0xd7   : > { %1640 = vmatmul.bf16.vlgmr.msra.gmra.mxu1 %v1343_v7  ;;  %v452_v62 = vunpack.c.l.b16 %v382_v52 }
  0xd8   : > { %4366 = vst [vmem:[#allocation2 + $0x10] sm:$0xff] %v4294_v2   ;;  %v453_v2 = vunpack.c.l.b16 %v383_v54  ;;  %v4930_v54 = vld [vmem:[#allocation2] sm:$0xff] }
  0xd9   : > { %v546_v12 = vpop.f32.mrf.mxu0  ;;  %v6499_v4 = vshrl.u32 %v4930_v54, 16 }
  0xda   : > { %v547_v23 = vadd.f32 %v4826_v17, %v546_v12  ;;  %v470_v7 = vpack.c.b16 %v453_v2, %v452_v62 }
  0xdb   : > { %v828_v6 = vrot.slane %v6499_v4, 7 }
  0xdc   : > { %3632 = vmatmul.msk.bf16.gmra.mxu0 %vm478_vm0, %v466_v10  ;;  %v620_v38 = vmax.f32 %v547_v23, 0.0  ;;  %3636 = vmatmul.msk.bf16.gmra.mxu3 %vm478_vm0, %v470_v7 }
  0xdf   : > { %v4198_v20 = vld [vmem:[#allocation2 + $0x10] sm:$0xff] }
  0xe0   : > { %v4864_v22 = vld [vmem:[#allocation2 + $0x10] sm:$0xff]  ;;  %1734 = vmatmul.bf16.gmra.mxu2 %v4198_v20  ;;  %v1223_v28 = vshrl.u32 %v4198_v20, 16  ;;  %v1226_v29 = vshll.u32 %v4198_v20, 16  ;;  %v448_v20 = vunpack.c.l.b16 %v378_v9 }
  0xe1   : > { %v4867_v26 = vld [vmem:[#allocation2 + $0x10] sm:$0xff]  ;;  %v548_v27 = vpop.f32.mrf.mxu0  ;;  %v843_v30 = vshll.u32 %v4864_v22, 16  ;;  %v840_v34 = vshrl.u32 %v4864_v22, 16 }
  0xe2   : > { %v549_v43 = vadd.f32 %v4826_v17, %v548_v27  ;;  %v6495_v31 = vshrl.u32 %v4867_v26, 16  ;;  %v1225_v32 = vrot.slane %v1223_v28, 7  ;;  %v1361_v36 = vrot.slane %v1226_v29, 1 }
  0xe3   : > { %v976_v35 = vrot.slane %v843_v30, 1  ;;  %v6496_v59 = vshll.u32 %v4867_v26, 16 }
  0xe4   : > { %v621_v39 = vmax.f32 %v549_v43, 0.0  ;;  %v1228_v42 = vor.u32 %v1226_v29, %v1225_v32  ;;  %v4882_v48 = vor.u32 %v1361_v36, %v1223_v28  ;;  %v2426_v49 = vrot.slane %v6495_v31, 7 }
  0xe5   : > { %v4880_v46 = vor.u32 %v976_v35, %v840_v34  ;;  %v449_v29 = vunpack.c.l.b16 %v379_v14  ;;  %v353_v35 = vld [vmem:[%s4760_s29 + $0xf8] sm:$0xff] }
  0xe6   : > { %v4299_v50 = vpack.c.bf16 %v621_v39, %v620_v38  ;;  %v1344_v56 = vsel %vm4845_vm3, 0, %v1228_v42  ;;  %v4892_v5 = vor.u32 %v6496_v59, %v2426_v49  ;;  %v384_v39 = vpack.c.bf16 %v352_v33, %v352_v33 }
  0xe7   : > { %1645 = vmatmul.bf16.gmra.mxu1 %v1344_v56  ;;  %v385_v40 = vpack.c.bf16 %v353_v35, %v353_v35  ;;  %v468_v44 = vpack.c.b16 %v449_v29, %v448_v20 }
  0xe8   : > { %4367 = vst [vmem:[#allocation2 + $0x18] sm:$0xff] %v4299_v50   ;;  %v454_v47 = vunpack.c.l.b16 %v384_v39 }
  0xe9   : > { %v551_v3 = vpop.f32.mrf.mxu0  ;;  %6561 = vst [vmem:[#allocation12_spill] sm:$0xff] %v4892_v5  ;;  %v455_v49 = vunpack.c.l.b16 %v385_v40 }
  0xea   : > { %v552_v13 = vadd.f32 %v4826_v17, %v551_v3  ;;  %v6500_v3 = vshll.u32 %v4930_v54, 16 }
  0xeb   : > { %v471_v56 = vpack.c.b16 %v455_v49, %v454_v47 }
  0xec   : > { %3633 = vmatmul.msk.bf16.gmra.mxu0 %vm478_vm0, %v467_v60  ;;  %v622_v27 = vmax.f32 %v552_v13, 0.0 }
  0xed   : > { %3637 = vmatmul.msk.bf16.gmra.mxu3 %vm478_vm0, %v471_v56 }
  0xef   : > { %v4199_v10 = vld [vmem:[#allocation2 + $0x18] sm:$0xff] }
  0xf0   : > { %v4900_v11 = vld [vmem:[#allocation2 + $0x18] sm:$0xff]  ;;  %1739 = vmatmul.bf16.gmra.mxu2 %v4199_v10  ;;  %v1230_v55 = vshrl.u32 %v4199_v10, 16  ;;  %v1233_v16 = vshll.u32 %v4199_v10, 16 }
  0xf1   : > { %v4902_v12 = vld [vmem:[#allocation2 + $0x18] sm:$0xff]  ;;  %v553_v15 = vpop.f32.mrf.mxu0  ;;  %v850_v18 = vshll.u32 %v4900_v11, 16  ;;  %v847_v23 = vshrl.u32 %v4900_v11, 16 }
  0xf2   : > { %v554_v19 = vadd.f32 %v4826_v17, %v553_v15  ;;  %v6493_v61 = vshrl.u32 %v4902_v12, 16  ;;  %v1232_v21 = vrot.slane %v1230_v55, 7  ;;  %v1363_v25 = vrot.slane %v1233_v16, 1 }
  0xf3   : > { %v978_v24 = vrot.slane %v850_v18, 1  ;;  %v6494_v41 = vshll.u32 %v4902_v12, 16 }
  0xf4   : > { %v623_v28 = vmax.f32 %v554_v19, 0.0  ;;  %v2433_v43 = vrot.slane %v6493_v61, 7  ;;  %v1235_v32 = vor.u32 %v1233_v16, %v1232_v21  ;;  %v4920_v36 = vor.u32 %v1363_v25, %v1230_v55 }
  0xf5   : > { %v4918_v1 = vor.u32 %v978_v24, %v847_v23 }
  0xf6   : > { %v4304_v38 = vpack.c.bf16 %v623_v28, %v622_v27  ;;  %v1345_v42 = vsel %vm4845_vm3, 0, %v1235_v32  ;;  %v4928_v50 = vor.u32 %v6494_v41, %v2433_v43  ;;  %v831_v27 = vor.u32 %v6500_v3, %v828_v6  ;;  %v4195_v3 = vld [vmem:[#allocation6 + $0xb0] sm:$0xff] }
  0xf7   : > { %1650 = vmatmul.bf16.gmra.mxu1 %v1345_v42 }
  0xf8   : > { %4368 = vst [vmem:[#allocation2 + $0x20] sm:$0xff] %v4304_v38   ;;  %v956_v38 = vsel %vm4845_vm3, 0, %v831_v27 }
  0xf9   : > { %6562 = vst [vmem:[#allocation13_spill] sm:$0xff] %v4928_v50  ;;  %v556_v52 = vpop.f32.mrf.mxu0 }
  0xfa   : > { %v557_v2 = vadd.f32 %v4826_v17, %v556_v52 }
  0xfc   : > { %3634 = vmatmul.msk.bf16.gmra.mxu0 %vm478_vm0, %v468_v44  ;;  %v624_v19 = vmax.f32 %v557_v2, 0.0  ;;  %v835_v2 = vrot.slane %v833_v51, 7 }
  0xff   : > { %v4200_v58 = vld [vmem:[#allocation2 + $0x20] sm:$0xff] }
 0x100   : > { %v4936_v60 = vld [vmem:[#allocation2 + $0x20] sm:$0xff]  ;;  %1744 = vmatmul.bf16.gmra.mxu2 %v4200_v58  ;;  %v1237_v53 = vshrl.u32 %v4200_v58, 16  ;;  %v1240_v8 = vshll.u32 %v4200_v58, 16 }
 0x101   : > { %v4938_v62 = vld [vmem:[#allocation2 + $0x20] sm:$0xff]  ;;  %v558_v7 = vpop.f32.mrf.mxu0  ;;  %v857_v9 = vshll.u32 %v4936_v60, 16  ;;  %v854_v15 = vshrl.u32 %v4936_v60, 16 }
 0x102   : > { %6563 = vst [vmem:[#allocation14_spill] sm:$0xff] %v4938_v62  ;;  %v559_v10 = vadd.f32 %v4826_v17, %v558_v7  ;;  %v6489_v13 = vshrl.u32 %v4938_v62, 16  ;;  %v1239_v14 = vrot.slane %v1237_v53, 7  ;;  %v1365_v16 = vrot.slane %v1240_v8, 1 }
 0x103   : > { %v980_v55 = vrot.slane %v857_v9, 1  ;;  %v6490_v21 = vshll.u32 %v4938_v62, 16 }
 0x104   : > { %v625_v20 = vmax.f32 %v559_v10, 0.0  ;;  %v2440_v24 = vrot.slane %v6489_v13, 7  ;;  %v1242_v25 = vor.u32 %v1240_v8, %v1239_v14  ;;  %v4959_v29 = vor.u32 %v1365_v16, %v1237_v53 }
 0x105   : > { %v4957_v28 = vor.u32 %v980_v55, %v854_v15 }
 0x106   : > { %v4309_v43 = vpack.c.bf16 %v625_v20, %v624_v19  ;;  %v4963_v32 = vor.u32 %v6490_v21, %v2440_v24  ;;  %v1346_v33 = vsel %vm4845_vm3, 0, %v1242_v25 }
 0x107   : > { %1655 = vmatmul.bf16.gmra.mxu1 %v1346_v33  ;;  %v838_v33 = vor.u32 %v836_v45, %v835_v2  ;;  %v842_v2 = vrot.slane %v840_v34, 7 }
 0x108   : > { %6564 = vst [vmem:[#allocation15_spill] sm:$0xff] %v4963_v32 }
 0x109   : > { %4369 = vst [vmem:[#allocation2 + $0x28] sm:$0xff] %v4309_v43   ;;  %v561_v35 = vpop.f32.mrf.mxu0 }
 0x10a   : > { %v562_v44 = vadd.f32 %v4826_v17, %v561_v35 }
 0x10c   : > { %2051 = vmatmul.bf16.vlgmr.msrb.gmra.mxu0 %v956_v38  ;;  %v626_v14 = vmax.f32 %v562_v44, 0.0  ;;  %v957_v38 = vsel %vm4845_vm3, 0, %v838_v33 }
 0x110   : > { %v4201_v39 = vld [vmem:[#allocation2 + $0x28] sm:$0xff] }
 0x111   : > { %v4969_v40 = vld [vmem:[#allocation2 + $0x28] sm:$0xff]  ;;  %v563_v47 = vpop.f32.mrf.mxu0  ;;  %1749 = vmatmul.bf16.gmra.mxu2 %v4201_v39  ;;  %v1244_v49 = vshrl.u32 %v4201_v39, 16  ;;  %v1247_v52 = vshll.u32 %v4201_v39, 16 }
 0x112   : > { %v4971_v42 = vld [vmem:[#allocation2 + $0x28] sm:$0xff]  ;;  %v864_v56 = vshll.u32 %v4969_v40, 16  ;;  %v564_v58 = vadd.f32 %v4826_v17, %v563_v47  ;;  %v861_v8 = vshrl.u32 %v4969_v40, 16 }
 0x113   : > { %6565 = vst [vmem:[#allocation16_spill] sm:$0xff] %v4971_v42  ;;  %v6487_v7 = vshrl.u32 %v4971_v42, 16  ;;  %v1246_v53 = vrot.slane %v1244_v49, 7  ;;  %v1367_v10 = vrot.slane %v1247_v52, 1  ;;  %v6488_v16 = vshll.u32 %v4971_v42, 16 }
 0x114   : > { %v982_v6 = vrot.slane %v864_v56, 1  ;;  %v627_v55 = vmax.f32 %v564_v58, 0.0 }
 0x115   : > { %v2447_v19 = vrot.slane %v6487_v7, 7  ;;  %v1249_v20 = vor.u32 %v1247_v52, %v1246_v53  ;;  %v4989_v24 = vor.u32 %v1367_v10, %v1244_v49 }
 0x116   : > { %v4987_v51 = vor.u32 %v982_v6, %v861_v8  ;;  %v4314_v25 = vpack.c.bf16 %v627_v55, %v626_v14 }
 0x117   : > { %v4993_v27 = vor.u32 %v6488_v16, %v2447_v19  ;;  %v1347_v43 = vsel %vm4845_vm3, 0, %v1249_v20 }
 0x118   : > { %4370 = vst [vmem:[#allocation2 + $0x30] sm:$0xff] %v4314_v25   ;;  %1660 = vmatmul.bf16.gmra.mxu1 %v1347_v43 }
 0x119   : > { %6566 = vst [vmem:[#allocation17_spill] sm:$0xff] %v4993_v27  ;;  %v566_v35 = vpop.f32.mrf.mxu0 }
 0x11a   : > { %v567_v49 = vadd.f32 %v4826_v17, %v566_v35 }
 0x11c   : > { %2056 = vmatmul.bf16.gmra.mxu0 %v957_v38  ;;  %v628_v20 = vmax.f32 %v567_v49, 0.0 }
 0x11f   : > { %v4202_v39 = vld [vmem:[#allocation2 + $0x30] sm:$0xff] }
 0x120   : > { %v5001_v44 = vld [vmem:[#allocation2 + $0x30] sm:$0xff]  ;;  %v1251_v58 = vshrl.u32 %v4202_v39, 16  ;;  %v1254_v53 = vshll.u32 %v4202_v39, 16 }
 0x121   : > { %v5003_v47 = vld [vmem:[#allocation2 + $0x30] sm:$0xff]  ;;  %v568_v52 = vpop.f32.mrf.mxu0  ;;  %1754 = vmatmul.bf16.gmra.mxu2 %v4202_v39  ;;  %v6509_v37 = vshll.u32 %v5001_v44, 16  ;;  %v868_v14 = vshrl.u32 %v5001_v44, 16 }
 0x122   : > { %6567 = vst [vmem:[#allocation18_spill] sm:$0xff] %v5003_v47  ;;  %v569_v45 = vadd.f32 %v4826_v17, %v568_v52  ;;  %v6485_v6 = vshrl.u32 %v5003_v47, 16  ;;  %v1253_v10 = vrot.slane %v1251_v58, 7  ;;  %v1369_v19 = vrot.slane %v1254_v53, 1 }
 0x123   : > { %v984_v55 = vrot.slane %v6509_v37, 1  ;;  %v6486_v43 = vshll.u32 %v5003_v47, 16 }
 0x124   : > { %v629_v25 = vmax.f32 %v569_v45, 0.0  ;;  %v2454_v33 = vrot.slane %v6485_v6, 7  ;;  %v1256_v35 = vor.u32 %v1254_v53, %v1253_v10  ;;  %v5021_v38 = vor.u32 %v1369_v19, %v1251_v58 }
 0x125   : > { %v5019_v34 = vor.u32 %v984_v55, %v868_v14  ;;  %v845_v45 = vor.u32 %v843_v30, %v842_v2  ;;  %v849_v2 = vrot.slane %v847_v23, 7 }
 0x126   : > { %v4319_v39 = vpack.c.bf16 %v629_v25, %v628_v20  ;;  %v5025_v52 = vor.u32 %v6486_v43, %v2454_v33  ;;  %v1348_v49 = vsel %vm4845_vm3, 0, %v1256_v35 }
 0x127   : > { %v958_v10 = vsel %vm4845_vm3, 0, %v845_v45 }
 0x128   : > { %6568 = vst [vmem:[#allocation19_spill] sm:$0xff] %v5025_v52  ;;  %1665 = vmatmul.bf16.gmra.mxu1 %v1348_v49 }
 0x129   : > { %4371 = vst [vmem:[#allocation2 + $0x38] sm:$0xff] %v4319_v39   ;;  %v571_v53 = vpop.f32.mrf.mxu0 }
 0x12a   : > { %v572_v20 = vadd.f32 %v4826_v17, %v571_v53 }
 0x12c   : > { %2061 = vmatmul.bf16.gmra.mxu0 %v958_v10  ;;  %v630_v6 = vmax.f32 %v572_v20, 0.0 }
 0x130   : > { %v4203_v58 = vld [vmem:[#allocation2 + $0x38] sm:$0xff] }
 0x131   : > { %v5033_v55 = vld [vmem:[#allocation2 + $0x38] sm:$0xff]  ;;  %v573_v25 = vpop.f32.mrf.mxu0  ;;  %1759 = vmatmul.bf16.gmra.mxu2 %v4203_v58  ;;  %v1258_v33 = vshrl.u32 %v4203_v58, 16  ;;  %v1261_v35 = vshll.u32 %v4203_v58, 16 }
 0x132   : > { %v5035_v19 = vld [vmem:[#allocation2 + $0x38] sm:$0xff]  ;;  %v6503_v22 = vshll.u32 %v5033_v55, 16  ;;  %v574_v30 = vadd.f32 %v4826_v17, %v573_v25  ;;  %v6504_v45 = vshrl.u32 %v5033_v55, 16  ;;  %v6584_v32 = vshll.u32 %v5033_v55, 16 }
 0x133   : > { %6569 = vst [vmem:[#allocation20_spill] sm:$0xff] %v5035_v19  ;;  %v6491_v39 = vshrl.u32 %v5035_v19, 16  ;;  %v1260_v49 = vrot.slane %v1258_v33, 7  ;;  %v1371_v53 = vrot.slane %v1261_v35, 1  ;;  %v6492_v58 = vshll.u32 %v5035_v19, 16 }
 0x134   : > { %v986_v10 = vrot.slane %v6503_v22, 1  ;;  %v631_v43 = vmax.f32 %v574_v30, 0.0  ;;  %v852_v30 = vor.u32 %v850_v18, %v849_v2 }
 0x135   : > { %v2461_v7 = vrot.slane %v6491_v39, 7  ;;  %v1263_v25 = vor.u32 %v1261_v35, %v1260_v49  ;;  %v5053_v16 = vor.u32 %v1371_v53, %v1258_v33 }
 0x136   : > { %v5051_v23 = vor.u32 %v986_v10, %v6504_v45  ;;  %v4324_v13 = vpack.c.bf16 %v631_v43, %v630_v6  ;;  %v959_v49 = vsel %vm4845_vm3, 0, %v852_v30 }
 0x137   : > { %v5057_v21 = vor.u32 %v6492_v58, %v2461_v7  ;;  %v1349_v20 = vsel %vm4845_vm3, 0, %v1263_v25 }
 0x138   : > { %4372 = vst [vmem:[#allocation2 + $0x40] sm:$0xff] %v4324_v13   ;;  %1670 = vmatmul.bf16.gmra.mxu1 %v1349_v20  ;;  %v856_v13 = vrot.slane %v854_v15, 7 }
 0x139   : > { %6570 = vst [vmem:[#allocation21_spill] sm:$0xff] %v5057_v21  ;;  %v576_v35 = vpop.f32.mrf.mxu0 }
 0x13a   : > { %v577_v7 = vadd.f32 %v4826_v17, %v576_v35 }
 0x13c   : > { %2066 = vmatmul.bf16.gmra.mxu0 %v959_v49  ;;  %v632_v39 = vmax.f32 %v577_v7, 0.0 }
 0x13f   : > { %v4204_v33 = vld [vmem:[#allocation2 + $0x40] sm:$0xff] }
 0x140   : > { %v5065_v10 = vld [vmem:[#allocation2 + $0x40] sm:$0xff]  ;;  %v1265_v53 = vshrl.u32 %v4204_v33, 16  ;;  %v1268_v25 = vshll.u32 %v4204_v33, 16 }
 0x141   : > { %v5067_v6 = vld [vmem:[#allocation2 + $0x40] sm:$0xff]  ;;  %v578_v43 = vpop.f32.mrf.mxu0  ;;  %1764 = vmatmul.bf16.gmra.mxu2 %v4204_v33  ;;  %v6501_v11 = vshll.u32 %v5065_v10, 16  ;;  %v6502_v30 = vshrl.u32 %v5065_v10, 16 }
 0x142   : > { %6571 = vst [vmem:[#allocation22_spill] sm:$0xff] %v5067_v6  ;;  %v579_v18 = vadd.f32 %v4826_v17, %v578_v43  ;;  %v6497_v2 = vshrl.u32 %v5067_v6, 16  ;;  %v1267_v20 = vrot.slane %v1265_v53, 7  ;;  %v1373_v35 = vrot.slane %v1268_v25, 1 }
 0x143   : > { %v988_v49 = vrot.slane %v6501_v11, 1  ;;  %v6498_v33 = vshll.u32 %v5067_v6, 16 }
 0x144   : > { %v633_v58 = vmax.f32 %v579_v18, 0.0  ;;  %v2468_v61 = vrot.slane %v6497_v2, 7  ;;  %v1270_v43 = vor.u32 %v1268_v25, %v1267_v20  ;;  %v5085_v41 = vor.u32 %v1373_v35, %v1265_v53  ;;  %v4188_v25 = vld [vmem:[#allocation6 + $0x78] sm:$0xff] }
 0x145   : > { %v5083_v15 = vor.u32 %v988_v49, %v6502_v30  ;;  %v859_v18 = vor.u32 %v857_v9, %v856_v13  ;;  %2132 = vmatpush.bf16.msrb.mxu1 %v4188_v25  ;;  %v4196_v35 = vld [vmem:[#allocation6 + $0xb8] sm:$0xff] }
 0x146   : > { %v4329_v31 = vpack.c.bf16 %v633_v58, %v632_v39  ;;  %v5089_v59 = vor.u32 %v6498_v33, %v2468_v61  ;;  %v1350_v7 = vsel %vm4845_vm3, 0, %v1270_v43  ;;  %2221 = vmatpush.bf16.msrb.mxu2 %v4196_v35 }
 0x147   : > { %v960_v53 = vsel %vm4845_vm3, 0, %v859_v18 }
 0x148   : > { %6572 = vst [vmem:[#allocation23_spill] sm:$0xff] %v5089_v59  ;;  %1675 = vmatmul.bf16.gmra.mxu1 %v1350_v7  ;;  %v863_v7 = vrot.slane %v861_v8, 7 }
 0x149   : > { %4373 = vst [vmem:[#allocation2 + $0x48] sm:$0xff] %v4329_v31   ;;  %v581_v20 = vpop.f32.mrf.mxu0 }
 0x14a   : > { %v582_v49 = vadd.f32 %v4826_v17, %v581_v20  ;;  %2222 = vmatpush.bf16.msrb.mxu2 %v4195_v3 }
 0x14c   : > { %2071 = vmatmul.bf16.gmra.mxu0 %v960_v53  ;;  %v634_v33 = vmax.f32 %v582_v49, 0.0 }
 0x150   : > { %v4205_v39 = vld [vmem:[#allocation2 + $0x48] sm:$0xff] }
 0x151   : > { %v5097_v58 = vld [vmem:[#allocation2 + $0x48] sm:$0xff]  ;;  %v583_v43 = vpop.f32.mrf.mxu0  ;;  %1769 = vmatmul.bf16.gmra.mxu2 %v4205_v39  ;;  %v1272_v60 = vshrl.u32 %v4205_v39, 16  ;;  %v1275_v31 = vshll.u32 %v4205_v39, 16 }
 0x152   : > { %v5099_v61 = vld [vmem:[#allocation2 + $0x48] sm:$0xff]  ;;  %v6505_v9 = vshll.u32 %v5097_v58, 16  ;;  %v584_v13 = vadd.f32 %v4826_v17, %v583_v43  ;;  %v6508_v53 = vshrl.u32 %v5097_v58, 16 }
 0x153   : > { %6573 = vst [vmem:[#allocation24_spill] sm:$0xff] %v5099_v61  ;;  %v6506_v18 = vshrl.u32 %v5099_v61, 16  ;;  %v1274_v25 = vrot.slane %v1272_v60, 7  ;;  %v1375_v2 = vrot.slane %v1275_v31, 1  ;;  %v1730_v39 = vpop.f32.mrf.mxu2  ;;  %v6507_v11 = vshll.u32 %v5099_v61, 16 }
 0x154   : > { %v990_v20 = vrot.slane %v6505_v9, 1  ;;  %v635_v4 = vmax.f32 %v584_v13, 0.0  ;;  %v1641_v8 = vpop.f32.mrf.mxu1 }
 0x155   : > { %v2475_v43 = vrot.slane %v6506_v18, 7  ;;  %v1277_v35 = vor.u32 %v1275_v31, %v1274_v25  ;;  %v5117_v22 = vor.u32 %v1375_v2, %v1272_v60  ;;  %v5119_v9 = vadd.f32 %v1730_v39, %v1641_v8  ;;  %v4194_v25 = vld [vmem:[#allocation6 + $0xa8] sm:$0xff]  ;;  %v4187_v2 = vld [vmem:[#allocation6 + $0x70] sm:$0xff]  ;;  %v4192_v8 = vld [vmem:[#allocation6 + $0x98] sm:$0xff] }
 0x156   : > { %v5115_v30 = vor.u32 %v990_v20, %v6508_v53  ;;  %v4334_v45 = vpack.c.bf16 %v635_v4, %v634_v33  ;;  %v866_v31 = vor.u32 %v864_v56, %v863_v7  ;;  %2223 = vmatpush.bf16.msrb.mxu2 %v4194_v25  ;;  %v4193_v33 = vld [vmem:[#allocation6 + $0xa0] sm:$0xff]  ;;  %2133 = vmatpush.bf16.msrb.mxu1 %v4187_v2 }
 0x157   : > { %v5123_v49 = vor.u32 %v6507_v11, %v2475_v43  ;;  %v1351_v13 = vsel %vm4845_vm3, 0, %v1277_v35  ;;  %v601_v43 = vpop.f32.mrf.mxu3  ;;  %v4185_v18 = vld [vmem:[#allocation6 + $0x60] sm:$0xff] }
 0x158   : > { %4374 = vst [vmem:[#allocation2 + $0x50] sm:$0xff] %v4334_v45   ;;  %1680 = vmatmul.bf16.gmra.mxu1 %v1351_v13  ;;  %v961_v4 = vsel %vm4845_vm3, 0, %v866_v31  ;;  %v4186_v45 = vld [vmem:[#allocation6 + $0x68] sm:$0xff] }
 0x159   : > { %6574 = vst [vmem:[#allocation25_spill] sm:$0xff] %v5123_v49  ;;  %v586_v20 = vpop.f32.mrf.mxu0  ;;  %v4191_v49 = vld [vmem:[#allocation6 + $0x90] sm:$0xff] }
 0x15a   : > { %2224 = vmatpush.bf16.msrb.mxu2 %v4193_v33  ;;  %v587_v40 = vadd.f32 %v4826_v17, %v586_v20  ;;  %2134 = vmatpush.bf16.msrb.mxu1 %v4186_v45 }
 0x15b   : > { %v1732_v3 = vpop.f32.mrf.mxu2 }
 0x15c   : > { %2076 = vmatmul.bf16.gmra.mxu0 %v961_v4  ;;  %v1643_v60 = vpop.f32.mrf.mxu1 }
 0x15d   : > { %v5131_v39 = vadd.f32 %v1732_v3, %v1643_v60  ;;  %v636_v3 = vmax.f32 %v587_v40, 0.0  ;;  %v870_v60 = vrot.slane %v868_v14, 7  ;;  %v602_v40 = vadd.f32 %v4826_v17, %v601_v43  ;;  %v4184_v43 = vld [vmem:[#allocation6 + $0x58] sm:$0xff] }
 0x15e   : > { %2225 = vmatpush.bf16.msrb.mxu2 %v4192_v8  ;;  %2135 = vmatpush.bf16.msrb.mxu1 %v4185_v18  ;;  %v4190_v18 = vld [vmem:[#allocation6 + $0x88] sm:$0xff] }
 0x15f   : > { %6575 = vst [vmem:[#allocation26_spill] sm:$0xff] %v5131_v39  ;;  %v4206_v56 = vld [vmem:[#allocation2 + $0x50] sm:$0xff] }
 0x160   : > { %v5134_v7 = vld [vmem:[#allocation2 + $0x50] sm:$0xff]  ;;  %v1279_v31 = vshrl.u32 %v4206_v56, 16  ;;  %v1282_v25 = vshll.u32 %v4206_v56, 16 }
 0x161   : > { %v5136_v35 = vld [vmem:[#allocation2 + $0x50] sm:$0xff]  ;;  %v588_v13 = vpop.f32.mrf.mxu0  ;;  %1774 = vmatmul.bf16.gmra.mxu2 %v4206_v56  ;;  %v6512_v2 = vshll.u32 %v5134_v7, 16  ;;  %v6513_v56 = vshrl.u32 %v5134_v7, 16 }
 0x162   : > { %v589_v4 = vadd.f32 %v4826_v17, %v588_v13  ;;  %v6510_v20 = vshrl.u32 %v5136_v35, 16  ;;  %v1281_v33 = vrot.slane %v1279_v31, 7  ;;  %v1377_v11 = vrot.slane %v1282_v25, 1  ;;  %2226 = vmatpush.bf16.msrb.mxu2 %v4191_v49  ;;  %2136 = vmatpush.bf16.msrb.mxu1 %v4184_v43  ;;  %v4182_v43 = vld [vmem:[#allocation6 + $0x48] sm:$0xff] }
 0x163   : > { %v1735_v37 = vpop.f32.mrf.mxu2  ;;  %v992_v45 = vrot.slane %v6512_v2, 1  ;;  %v6511_v14 = vshll.u32 %v5136_v35, 16  ;;  %v642_v49 = vmax.f32 %v602_v40, 0.0 }
 0x164   : > { %v637_v53 = vmax.f32 %v589_v4, 0.0  ;;  %v2482_v8 = vrot.slane %v6510_v20, 7  ;;  %v1646_v13 = vpop.f32.mrf.mxu1  ;;  %v1284_v59 = vor.u32 %v1282_v25, %v1281_v33  ;;  %v5149_v21 = vor.u32 %v1377_v11, %v1279_v31 }
 0x165   : > { %v5152_v52 = vadd.f32 %v1735_v37, %v1646_v13  ;;  %v5156_v27 = vor.u32 %v992_v45, %v6513_v56  ;;  %v6578_v25 = vshll.u32 %v5001_v44, 16  ;;  %v603_v37 = vpop.f32.mrf.mxu3  ;;  %v4189_v13 = vld [vmem:[#allocation6 + $0x80] sm:$0xff] }
 0x166   : > { %6576 = vst [vmem:[#allocation27_spill] sm:$0xff] %v5149_v21  ;;  %v4339_v4 = vpack.c.bf16 %v637_v53, %v636_v3  ;;  %v1352_v20 = vsel %vm4845_vm3, 0, %v1284_v59  ;;  %v5164_v11 = vor.u32 %v6511_v14, %v2482_v8  ;;  %v604_v31 = vadd.f32 %v4826_v17, %v603_v37  ;;  %2227 = vmatpush.bf16.msrb.mxu2 %v4190_v18 }
 0x167   : > { %6577 = vst [vmem:[#allocation28_spill] sm:$0xff] %v5152_v52  ;;  %v873_v33 = vor.u32 %v6578_v25, %v870_v60  ;;  %v4183_v60 = vld [vmem:[#allocation6 + $0x50] sm:$0xff] }
 0x168   : > { %6579 = vst [vmem:[#allocation29_spill] sm:$0xff] %v5164_v11  ;;  %1685 = vmatmul.bf16.gmra.mxu1 %v1352_v20  ;;  %v643_v3 = vmax.f32 %v604_v31, 0.0 }
 0x169   : > { %4375 = vst [vmem:[#allocation2 + $0x58] sm:$0xff] %v4339_v4   ;;  %v591_v53 = vpop.f32.mrf.mxu0  ;;  %v962_v59 = vsel %vm4845_vm3, 0, %v873_v33  ;;  %2137 = vmatpush.bf16.msrb.mxu1 %v4183_v60 }
 0x16a   : > { %v4354_v25 = vpack.c.bf16 %v643_v3, %v642_v49  ;;  %2228 = vmatpush.bf16.msrb.mxu2 %v4189_v13  ;;  %v592_v40 = vadd.f32 %v4826_v17, %v591_v53  ;;  %v6581_v3 = vshrl.u32 %v5033_v55, 16 }
 0x16b   : > { %v1737_v45 = vpop.f32.mrf.mxu2 }
 0x16c   : > { %2081 = vmatmul.bf16.gmra.mxu0 %v962_v59  ;;  %v1648_v8 = vpop.f32.mrf.mxu1  ;;  %4378 = vst [vmem:[#allocation2 + $0x70] sm:$0xff] %v4354_v25   ;;  %v877_v60 = vrot.slane %v6581_v3, 7  ;;  %v638_v13 = vmax.f32 %v592_v40, 0.0  ;;  %v4181_v25 = vld [vmem:[#allocation6 + $0x40] sm:$0xff] }
 0x16d   : > { %v5169_v20 = vadd.f32 %v1737_v45, %v1648_v8  ;;  %v606_v18 = vpop.f32.mrf.mxu3  ;;  %2138 = vmatpush.bf16.msrb.mxu1 %v4182_v43 }
 0x16e   : > { %v607_v50 = vadd.f32 %v4826_v17, %v606_v18  ;;  %v880_v6 = vor.u32 %v6584_v32, %v877_v60 }
 0x16f   : > { %6580 = vst [vmem:[#allocation30_spill] sm:$0xff] %v5169_v20 }
 0x170   : > { %v4207_v4 = vld [vmem:[#allocation2 + $0x58] sm:$0xff] }
 0x171   : > { %v5172_v37 = vld [vmem:[#allocation2 + $0x58] sm:$0xff]  ;;  %v593_v31 = vpop.f32.mrf.mxu0  ;;  %1779 = vmatmul.bf16.gmra.mxu2 %v4207_v4  ;;  %v1286_v59 = vshrl.u32 %v4207_v4, 16  ;;  %v1289_v14 = vshll.u32 %v4207_v4, 16  ;;  %2139 = vmatpush.bf16.msrb.mxu1 %v4181_v25 }
 0x172   : > { %v5174_v33 = vld [vmem:[#allocation2 + $0x58] sm:$0xff]  ;;  %v594_v49 = vadd.f32 %v4826_v17, %v593_v31  ;;  %v6520_v53 = vshll.u32 %v5172_v37, 16 }
 0x173   : > { %v6521_v45 = vshrl.u32 %v5174_v33, 16  ;;  %v1288_v8 = vrot.slane %v1286_v59, 7  ;;  %v1379_v2 = vrot.slane %v1289_v14, 1  ;;  %v1740_v11 = vpop.f32.mrf.mxu2  ;;  %v6522_v40 = vshll.u32 %v5174_v33, 16  ;;  %v5194_v19 = vld [vmem:[#allocation2 + $0x70] sm:$0xff] }
 0x174   : > { %v639_v56 = vmax.f32 %v594_v49, 0.0  ;;  %v994_v4 = vrot.slane %v6520_v53, 1  ;;  %v1651_v31 = vpop.f32.mrf.mxu1  ;;  %v5196_v53 = vld [vmem:[#allocation2 + $0x70] sm:$0xff] }
 0x175   : > { %v2489_v43 = vrot.slane %v6521_v45, 7  ;;  %v1291_v3 = vor.u32 %v1289_v14, %v1288_v8  ;;  %v5187_v5 = vor.u32 %v1379_v2, %v1286_v59  ;;  %v5190_v49 = vadd.f32 %v1740_v11, %v1651_v31 }
 0x176   : > { %v4344_v61 = vpack.c.bf16 %v639_v56, %v638_v13  ;;  %v6585_v45 = vshrl.u32 %v5172_v37, 16  ;;  %v608_v56 = vpop.f32.mrf.mxu3  ;;  %v6523_v32 = vshll.u32 %v5196_v53, 16  ;;  %v644_v59 = vmax.f32 %v607_v50, 0.0 }
 0x177   : > { %6582 = vst [vmem:[#allocation31_spill] sm:$0xff] %v5187_v5  ;;  %v1353_v2 = vsel %vm4845_vm3, 0, %v1291_v3  ;;  %v5206_v18 = vor.u32 %v6522_v40, %v2489_v43  ;;  %v609_v60 = vadd.f32 %v4826_v17, %v608_v56  ;;  %v6525_v13 = vshll.u32 %v5194_v19, 16 }
 0x178   : > { %6583 = vst [vmem:[#allocation32_spill] sm:$0xff] %v5190_v49  ;;  %v5200_v14 = vor.u32 %v994_v4, %v6585_v45  ;;  %1690 = vmatmul.bf16.gmra.mxu1 %v1353_v2  ;;  %v5211_v45 = vld [vmem:[#allocation2 + $0x70] sm:$0xff]  ;;  %v963_v8 = vsel %vm4845_vm3, 0, %v880_v6  ;;  %v6524_v4 = vshrl.u32 %v5196_v53, 16  ;;  %v6531_v17 = vshrl.u32 %v5194_v19, 16 }
 0x179   : > { %6586 = vst [vmem:[#allocation33_spill] sm:$0xff] %v5206_v18  ;;  %v596_v11 = vpop.f32.mrf.mxu0  ;;  %v645_v25 = vmax.f32 %v609_v60, 0.0  ;;  %v6526_v43 = vshrl.u32 %v5211_v45, 16  ;;  %v1385_v6 = vrot.slane %v6525_v13, 1  ;;  %v6534_v60 = vshll.u32 %v5211_v45, 16 }
 0x17a   : > { %4376 = vst [vmem:[#allocation2 + $0x60] sm:$0xff] %v4344_v61   ;;  %v1000_v61 = vrot.slane %v6523_v32, 1  ;;  %v6589_v32 = vshrl.u32 %v5065_v10, 16  ;;  %v6593_v5 = vshll.u32 %v5065_v10, 16 }
 0x17b   : > { %6587 = vst [vmem:[#allocation34_spill] sm:$0xff] %v5211_v45  ;;  %v1742_v31 = vpop.f32.mrf.mxu2  ;;  %v4359_v3 = vpack.c.bf16 %v645_v25, %v644_v59  ;;  %v2510_v40 = vrot.slane %v6526_v43, 7  ;;  %v4465_v59 = vld [vmem:[%s6479_s2] ss:$0 sm:$0xff] }
 0x17c   : > { %2086 = vmatmul.bf16.gmra.mxu0 %v963_v8  ;;  %v1653_v50 = vpop.f32.mrf.mxu1  ;;  %v5222_v2 = vor.u32 %v1000_v61, %v6524_v4  ;;  %v597_v8 = vadd.f32 %v4465_v59, %v596_v11  ;;  %v884_v61 = vrot.slane %v6589_v32, 7 }
 0x17d   : > { %v5226_v56 = vadd.f32 %v1742_v31, %v1653_v50  ;;  %4379 = vst [vmem:[#allocation2 + $0x78] sm:$0xff] %v4359_v3   ;;  %v5242_v31 = vor.u32 %v1385_v6, %v6531_v17  ;;  %v5246_v43 = vor.u32 %v6534_v60, %v2510_v40 }
 0x17e   : > { %v611_v50 = vpop.f32.mrf.mxu3  ;;  %v640_v42 = vmax.f32 %v597_v8, 0.0  ;;  %v887_v6 = vor.u32 %v6593_v5, %v884_v61 }
 0x17f   : > { %6588 = vst [vmem:[#allocation35_spill] sm:$0xff] %v5226_v56  ;;  %v612_v45 = vadd.f32 %v4465_v59, %v611_v50 }
 0x180   : > { %6591 = vst [vmem:[#allocation37_spill] sm:$0xff] %v5242_v31 }
 0x181   : > { %v4208_v25 = vld [vmem:[#allocation2 + $0x60] sm:$0xff]  ;;  %6592 = vst [vmem:[#allocation38_spill] sm:$0xff] %v5246_v43  ;;  %v598_v18 = vpop.f32.mrf.mxu0 }
 0x182   : > { %v5236_v4 = vld [vmem:[#allocation2 + $0x60] sm:$0xff]  ;;  %1784 = vmatmul.bf16.gmra.mxu2 %v4208_v25  ;;  %v1293_v11 = vshrl.u32 %v4208_v25, 16  ;;  %v1296_v47 = vshll.u32 %v4208_v25, 16  ;;  %v599_v56 = vadd.f32 %v4465_v59, %v598_v18 }
 0x183   : > { %v5238_v13 = vld [vmem:[#allocation2 + $0x60] sm:$0xff]  ;;  %v6537_v32 = vshll.u32 %v5236_v4, 16  ;;  %v1745_v20 = vpop.f32.mrf.mxu2 }
 0x184   : > { %6590 = vst [vmem:[#allocation36_spill] sm:$0xff] %v5238_v13  ;;  %v1295_v49 = vrot.slane %v1293_v11, 7  ;;  %v1381_v17 = vrot.slane %v1296_v47, 1  ;;  %v641_v31 = vmax.f32 %v599_v56, 0.0  ;;  %v1656_v25 = vpop.f32.mrf.mxu1  ;;  %v6538_v3 = vshll.u32 %v5238_v13, 16  ;;  %v5264_v50 = vld [vmem:[#allocation2 + $0x78] sm:$0xff] }
 0x185   : > { %v996_v60 = vrot.slane %v6537_v32, 1  ;;  %v6595_v8 = vshrl.u32 %v5238_v13, 16  ;;  %v5260_v5 = vadd.f32 %v1745_v20, %v1656_v25  ;;  %v6597_v56 = vshll.u32 %v4930_v54, 16  ;;  %v5266_v40 = vld [vmem:[#allocation2 + $0x78] sm:$0xff] }
 0x186   : > { %v1298_v18 = vor.u32 %v1296_v47, %v1295_v49  ;;  %v5255_v43 = vor.u32 %v1381_v17, %v1293_v11  ;;  %v4349_v52 = vpack.c.bf16 %v641_v31, %v640_v42  ;;  %v6598_v32 = vshrl.u32 %v5236_v4, 16  ;;  %v613_v42 = vpop.f32.mrf.mxu3 }
 0x187   : > { %v2496_v62 = vrot.slane %v6595_v8, 7  ;;  %6596 = vst [vmem:[#allocation40_spill] sm:$0xff] %v5260_v5  ;;  %v972_v61 = vrot.slane %v6597_v56, 1  ;;  %v6539_v20 = vshll.u32 %v5266_v40, 16  ;;  %v646_v11 = vmax.f32 %v612_v45, 0.0 }
 0x188   : > { %6594 = vst [vmem:[#allocation39_spill] sm:$0xff] %v5255_v43  ;;  %v5270_v47 = vor.u32 %v996_v60, %v6598_v32  ;;  %v1354_v49 = vsel %vm4845_vm3, 0, %v1298_v18  ;;  %v614_v25 = vadd.f32 %v4465_v59, %v613_v42  ;;  %v5282_v60 = vld [vmem:[#allocation2 + $0x78] sm:$0xff]  ;;  %v964_v32 = vsel %vm4845_vm3, 0, %v887_v6 }
 0x189   : > { %v5276_v17 = vor.u32 %v6538_v3, %v2496_v62  ;;  %4377 = vst [vmem:[#allocation2 + $0x68] sm:$0xff] %v4349_v52   ;;  %1695 = vmatmul.bf16.gmra.mxu1 %v1354_v49  ;;  %v5279_v31 = vpop.f32.mrf.mxu0  ;;  %v6602_v18 = vshrl.u32 %v4930_v54, 16  ;;  %v6540_v56 = vshrl.u32 %v5266_v40, 16  ;;  %v1002_v49 = vrot.slane %v6539_v20, 1 }
 0x18a   : > { %6600 = vst [vmem:[#allocation42_spill] sm:$0xff] %v5279_v31  ;;  %v647_v52 = vmax.f32 %v614_v25, 0.0  ;;  %v6541_v45 = vshrl.u32 %v5282_v60, 16 }
 0x18b   : > { %6599 = vst [vmem:[#allocation41_spill] sm:$0xff] %v5276_v17  ;;  %v973_v62 = vor.u32 %v972_v61, %v6602_v18  ;;  %v1747_v59 = vpop.f32.mrf.mxu2  ;;  %v5300_v25 = vor.u32 %v1002_v49, %v6540_v56  ;;  %v6605_v18 = vshll.u32 %v5264_v50, 16 }
 0x18c   : > { %6601 = vst [vmem:[#allocation43_spill] sm:$0xff] %v5282_v60  ;;  %2091 = vmatmul.bf16.gmra.mxu0 %v964_v32  ;;  %v1658_v6 = vpop.f32.mrf.mxu1  ;;  %v4364_v61 = vpack.c.bf16 %v647_v52, %v646_v11  ;;  %v2517_v32 = vrot.slane %v6541_v45, 7  ;;  %v6607_v52 = vshrl.u32 %v5264_v50, 16  ;;  %v6612_v45 = vshrl.u32 %v5097_v58, 16 }
 0x18d   : > { %v1387_v20 = vrot.slane %v6605_v18, 1  ;;  %v5306_v17 = vadd.f32 %v1747_v59, %v1658_v6  ;;  %v1023_v3 = vsel %vm5294_vm6, %v973_v62, 0  ;;  %v6609_v18 = vshll.u32 %v5282_v60, 16 }
 0x18e   : > { %4380 = vst [vmem:[#allocation2 + $0x80] sm:$0xff] %v4364_v61  }
 0x18f   : > { %6606 = vst [vmem:[#allocation44_spill] sm:$0xff] %v5306_v17  ;;  %v5318_v49 = vor.u32 %v1387_v20, %v6607_v52  ;;  %v5322_v56 = vor.u32 %v6609_v18, %v2517_v32  ;;  %v891_v17 = vrot.slane %v6612_v45, 7 }
 0x190   : > { %v5310_v42 = vld [vmem:[#allocation2 + $0x68] sm:$0xff] }
 0x191   : > { %v5312_v31 = vld [vmem:[#allocation2 + $0x68] sm:$0xff]  ;;  %6608 = vst [vmem:[#allocation45_spill] sm:$0xff] %v5318_v49  ;;  %v5324_v59 = vpop.f32.mrf.mxu0  ;;  %v1300_v62 = vshrl.u32 %v5310_v42, 16  ;;  %v1303_v6 = vshll.u32 %v5310_v42, 16 }
 0x192   : > { %v5314_v11 = vld [vmem:[#allocation2 + $0x68] sm:$0xff]  ;;  %6610 = vst [vmem:[#allocation46_spill] sm:$0xff] %v5322_v56  ;;  %2229 = vmatmul.bf16.vlgmr.msrb.gmra.mxu2 %v1023_v3  ;;  %v6546_v61 = vshll.u32 %v5312_v31, 16  ;;  %v6549_v52 = vshrl.u32 %v5312_v31, 16 }
 0x193   : > { %6611 = vst [vmem:[#allocation47_spill] sm:$0xff] %v5324_v59  ;;  %v6547_v5 = vshrl.u32 %v5314_v11, 16  ;;  %v1302_v20 = vrot.slane %v1300_v62, 7  ;;  %v1383_v18 = vrot.slane %v1303_v6, 1  ;;  %v6548_v3 = vshll.u32 %v5314_v11, 16 }
 0x194   : > { %v998_v32 = vrot.slane %v6546_v61, 1  ;;  %v1750_v56 = vpop.f32.mrf.mxu2 }
 0x195   : > { %v2503_v59 = vrot.slane %v6547_v5, 7  ;;  %v1661_v49 = vpop.f32.mrf.mxu1  ;;  %v1305_v60 = vor.u32 %v1303_v6, %v1302_v20  ;;  %v5342_v43 = vor.u32 %v1383_v18, %v1300_v62  ;;  %v5346_v21 = vld [vmem:[#allocation2 + $0x80] sm:$0xff]  ;;  %v6614_v5 = vshll.u32 %v5097_v58, 16 }
 0x196   : > { %v5340_v45 = vor.u32 %v998_v32, %v6549_v52  ;;  %v5344_v13 = vadd.f32 %v1750_v56, %v1661_v49  ;;  %v1324_v56 = vshll.u32 %v5346_v21, 16  ;;  %v5360_v49 = vld [vmem:[#allocation2 + $0x80] sm:$0xff]  ;;  %v1321_v18 = vshrl.u32 %v5346_v21, 16 }
 0x197   : > { %v5350_v61 = vor.u32 %v6548_v3, %v2503_v59  ;;  %v1355_v39 = vsel %vm4845_vm3, 0, %v1305_v60  ;;  %v894_v6 = vor.u32 %v6614_v5, %v891_v17  ;;  %v6550_v59 = vshrl.u32 %v5360_v49, 16 }
 0x198   : > { %1700 = vmatmul.bf16.vlgmr.msrb.gmra.mxu3 %v1355_v39  ;;  %v1389_v5 = vrot.slane %v1324_v56, 1  ;;  %v6551_v39 = vshll.u32 %v5360_v49, 16  ;;  %v6617_v3 = vshrl.u32 %v5194_v19, 16 }
 0x199   : > { %6613 = vst [vmem:[#allocation48_spill] sm:$0xff] %v5350_v61  ;;  %2140 = vmatmul.bf16.vlgmr.msrb.gmra.mxu1 %v4930_v54  ;;  %v5357_v20 = vpop.f32.mrf.mxu0  ;;  %v965_v62 = vsel %vm4845_vm3, 0, %v894_v6  ;;  %v2524_v54 = vrot.slane %v6550_v59, 7  ;;  %v6621_v59 = vshll.u32 %v5194_v19, 16 }
 0x19a   : > { %6615 = vst [vmem:[#allocation49_spill] sm:$0xff] %v5357_v20  ;;  %v1309_v52 = vrot.slane %v6617_v3, 7  ;;  %v5373_v61 = vor.u32 %v1389_v5, %v1321_v18 }
 0x19b   : > { %v5377_v6 = vor.u32 %v6551_v39, %v2524_v54  ;;  %v6623_v39 = vshll.u32 %v5134_v7, 16 }
 0x19c   : > { %2096 = vmatmul.bf16.gmra.mxu0 %v965_v62  ;;  %v1752_v32 = vpop.f32.mrf.mxu2  ;;  %6618 = vst [vmem:[#allocation51_spill] sm:$0xff] %v5373_v61  ;;  %v1024_v62 = vsel %vm5294_vm6, %v4852_v63, 0  ;;  %v4466_v63 = vld [vmem:[#allocation2 + $0x8] sm:$0xff] }
 0x19d   : > { %v1663_v60 = vpop.f32.mrf.mxu1  ;;  %6619 = vst [vmem:[#allocation52_spill] sm:$0xff] %v5377_v6 }
 0x19e   : > { %v5369_v17 = vadd.f32 %v1752_v32, %v1663_v60  ;;  %v1312_v32 = vor.u32 %v6621_v59, %v1309_v52  ;;  %v6622_v60 = vshrl.u32 %v5134_v7, 16 }
 0x1a0   : > { %6616 = vst [vmem:[#allocation50_spill] sm:$0xff] %v5369_v17  ;;  %v898_v17 = vrot.slane %v6622_v60, 7  ;;  %v1356_v54 = vsel %vm4845_vm3, 0, %v1312_v32  ;;  %v6628_v32 = vshll.u32 %v5264_v50, 16 }
 0x1a1   : > { %v5382_v20 = vpop.f32.mrf.mxu0 }
 0x1a2   : > { %6620 = vst [vmem:[#allocation53_spill] sm:$0xff] %v5382_v20  ;;  %2234 = vmatmul.bf16.gmra.mxu2 %v1024_v62  ;;  %v901_v6 = vor.u32 %v6623_v39, %v898_v17  ;;  %v1025_v39 = vsel %vm5294_vm6, %v4880_v46, 0  ;;  %v4467_v46 = vld [vmem:[#allocation2 + $0x10] sm:$0xff] }
 0x1a4   : > { %v1755_v3 = vpop.f32.mrf.mxu2  ;;  %v966_v52 = vsel %vm4845_vm3, 0, %v901_v6  ;;  %v6629_v6 = vshrl.u32 %v5172_v37, 16 }
 0x1a5   : > { %v1666_v5 = vpop.f32.mrf.mxu1 }
 0x1a6   : > { %v5388_v61 = vadd.f32 %v1755_v3, %v1666_v5  ;;  %v6626_v3 = vshrl.u32 %v5264_v50, 16 }
 0x1a8   : > { %1705 = vmatmul.bf16.gmra.mxu3 %v1356_v54  ;;  %v1316_v5 = vrot.slane %v6626_v3, 7  ;;  %v6630_v3 = vshll.u32 %v5172_v37, 16 }
 0x1a9   : > { %2145 = vmatmul.bf16.gmra.mxu1 %v4466_v63  ;;  %v5394_v62 = vpop.f32.mrf.mxu0  ;;  %v905_v63 = vrot.slane %v6629_v6, 7 }
 0x1aa   : > { %6624 = vst [vmem:[#allocation54_spill] sm:$0xff] %v5394_v62  ;;  %v1319_v54 = vor.u32 %v6628_v32, %v1316_v5 }
 0x1ac   : > { %2101 = vmatmul.bf16.gmra.mxu0 %v966_v52  ;;  %v1757_v59 = vpop.f32.mrf.mxu2 }
 0x1ad   : > { %v1668_v60 = vpop.f32.mrf.mxu1 }
 0x1ae   : > { %v5398_v20 = vadd.f32 %v1757_v59, %v1668_v60  ;;  %v1357_v60 = vsel %vm4845_vm3, 0, %v1319_v54  ;;  %v1323_v54 = vrot.slane %v1321_v18, 7  ;;  %v6634_v18 = vshll.u32 %v5236_v4, 16 }
 0x1b0   : > { %6625 = vst [vmem:[#allocation55_spill] sm:$0xff] %v5398_v20  ;;  %v908_v20 = vor.u32 %v6630_v3, %v905_v63  ;;  %v1026_v63 = vsel %vm5294_vm6, %v4918_v1, 0  ;;  %v1326_v3 = vor.u32 %v1324_v56, %v1323_v54  ;;  %v4468_v1 = vld [vmem:[#allocation2 + $0x18] sm:$0xff] }
 0x1b1   : > { %v5405_v17 = vpop.f32.mrf.mxu0 }
 0x1b2   : > { %6627 = vst [vmem:[#allocation56_spill] sm:$0xff] %v5405_v17  ;;  %2239 = vmatmul.bf16.gmra.mxu2 %v1025_v39  ;;  %v4236_v39 = vld [vmem:[#allocation6 + $0x178] sm:$0xff]  ;;  %v967_v5 = vsel %vm4845_vm3, 0, %v908_v20 }
 0x1b3   : > { %1810 = vmatpush.bf16.msrb.mxu3 %v4236_v39 }
 0x1b4   : > { %v1760_v52 = vpop.f32.mrf.mxu2 }
 0x1b5   : > { %v1671_v62 = vpop.f32.mrf.mxu1 }
 0x1b6   : > { %v5411_v59 = vadd.f32 %v1760_v52, %v1671_v62  ;;  %v4235_v52 = vld [vmem:[#allocation6 + $0x170] sm:$0xff] }
 0x1b7   : > { %1811 = vmatpush.bf16.msrb.mxu3 %v4235_v52  ;;  %v4234_v52 = vld [vmem:[#allocation6 + $0x168] sm:$0xff] }
 0x1b8   : > { %1710 = vmatmul.bf16.gmra.mxu3 %v1357_v60 }
 0x1b9   : > { %2150 = vmatmul.bf16.gmra.mxu1 %v4467_v46  ;;  %v5417_v17 = vpop.f32.mrf.mxu0  ;;  %v6633_v46 = vshrl.u32 %v5236_v4, 16 }
 0x1ba   : > { %6631 = vst [vmem:[#allocation57_spill] sm:$0xff] %v5417_v17 }
 0x1bb   : > { %v912_v39 = vrot.slane %v6633_v46, 7  ;;  %1812 = vmatpush.bf16.msrb.mxu3 %v4234_v52  ;;  %v4266_v52 = vld [vmem:[#allocation6 + $0x1e8] sm:$0xff] }
 0x1bc   : > { %2106 = vmatmul.bf16.gmra.mxu0 %v967_v5  ;;  %v1762_v32 = vpop.f32.mrf.mxu2 }
 0x1bd   : > { %v1673_v62 = vpop.f32.mrf.mxu1 }
 0x1be   : > { %v5421_v6 = vadd.f32 %v1762_v32, %v1673_v62  ;;  %v1358_v32 = vsel %vm4845_vm3, 0, %v1326_v3  ;;  %v915_v62 = vor.u32 %v6634_v18, %v912_v39  ;;  %v4233_v3 = vld [vmem:[#allocation6 + $0x160] sm:$0xff]  ;;  %v1027_v39 = vsel %vm5294_vm6, %v4957_v28, 0  ;;  %v4469_v28 = vld [vmem:[#allocation2 + $0x20] sm:$0xff] }
 0x1bf   : > { %1813 = vmatpush.bf16.msrb.mxu3 %v4233_v3  ;;  %v4232_v3 = vld [vmem:[#allocation6 + $0x158] sm:$0xff] }
 0x1c0   : > { %v968_v56 = vsel %vm4845_vm3, 0, %v915_v62 }
 0x1c1   : > { %v5426_v60 = vpop.f32.mrf.mxu0 }
 0x1c2   : > { %6632 = vst [vmem:[#allocation58_spill] sm:$0xff] %v5426_v60  ;;  %2244 = vmatmul.bf16.gmra.mxu2 %v1026_v63  ;;  %v4268_v63 = vld [vmem:[#allocation6 + $0x1f8] sm:$0xff] }
 0x1c3   : > { %2929 = vmatpush.bf16.msra.mxu0 %v4268_v63  ;;  %v6638_v63 = vshll.u32 %v5312_v31, 16  ;;  %1814 = vmatpush.bf16.msrb.mxu3 %v4232_v3 }
 0x1c4   : > { %v1765_v20 = vpop.f32.mrf.mxu2 }
 0x1c5   : > { %v1676_v5 = vpop.f32.mrf.mxu1 }
 0x1c6   : > { %v5430_v17 = vadd.f32 %v1765_v20, %v1676_v5  ;;  %v4267_v5 = vld [vmem:[#allocation6 + $0x1f0] sm:$0xff] }
 0x1c7   : > { %2930 = vmatpush.bf16.msra.mxu0 %v4267_v5 }
 0x1c8   : > { %1715 = vmatmul.bf16.gmra.mxu3 %v1358_v32  ;;  %v6636_v32 = vshrl.u32 %v5312_v31, 16 }
 0x1c9   : > { %2155 = vmatmul.bf16.gmra.mxu1 %v4468_v1  ;;  %v5436_v60 = vpop.f32.mrf.mxu0 }
 0x1ca   : > { %6635 = vst [vmem:[#allocation59_spill] sm:$0xff] %v5436_v60  ;;  %v919_v18 = vrot.slane %v6636_v32, 7 }
 0x1cb   : > { %2931 = vmatpush.bf16.msra.mxu0 %v4266_v52 }
 0x1cc   : > { %2111 = vmatmul.bf16.gmra.mxu0 %v968_v56  ;;  %v1767_v54 = vpop.f32.mrf.mxu2 }
 0x1cd   : > { %v1678_v46 = vpop.f32.mrf.mxu1 }
 0x1ce   : > { %v5440_v20 = vadd.f32 %v1767_v54, %v1678_v46  ;;  %v922_v46 = vor.u32 %v6638_v63, %v919_v18  ;;  %v4231_v18 = vld [vmem:[#allocation6 + $0x150] sm:$0xff] }
 0x1cf   : > { %1815 = vmatpush.bf16.msrb.mxu3 %v4231_v18  ;;  %v4263_v63 = vld [vmem:[#allocation6 + $0x1d0] sm:$0xff]  ;;  %v4230_v18 = vld [vmem:[#allocation6 + $0x148] sm:$0xff] }
 0x1d0   : > { %v969_v5 = vsel %vm4845_vm3, 0, %v922_v46  ;;  %v6640_v46 = vshrl.u32 %v5196_v53, 16 }
 0x1d1   : > { %v5447_v62 = vpop.f32.mrf.mxu0 }
 0x1d2   : > { %2249 = vmatmul.bf16.gmra.mxu2 %v1027_v39  ;;  %6637 = vst [vmem:[#allocation60_spill] sm:$0xff] %v5447_v62  ;;  %v4265_v39 = vld [vmem:[#allocation6 + $0x1e0] sm:$0xff]  ;;  %v4264_v62 = vld [vmem:[#allocation6 + $0x1d8] sm:$0xff] }
 0x1d3   : > { %2932 = vmatpush.bf16.msra.mxu0 %v4265_v39  ;;  %v4262_v39 = vld [vmem:[#allocation6 + $0x1c8] sm:$0xff]  ;;  %1816 = vmatpush.bf16.msrb.mxu3 %v4230_v18 }
 0x1d4   : > { %v1770_v1 = vpop.f32.mrf.mxu2 }
 0x1d5   : > { %v1681_v56 = vpop.f32.mrf.mxu1 }
 0x1d6   : > { %v5449_v54 = vadd.f32 %v1770_v1, %v1681_v56 }
 0x1d7   : > { %2933 = vmatpush.bf16.msra.mxu0 %v4264_v62  ;;  %v6641_v62 = vshll.u32 %v5196_v53, 16 }
 0x1d8   : > { %1789 = vmatmul.bf16.vlgmr.msra.gmra.mxu3 %v5310_v42  ;;  %v1028_v42 = vsel %vm5294_vm6, %v4987_v51, 0  ;;  %v4470_v51 = vld [vmem:[#allocation2 + $0x28] sm:$0xff] }
 0x1d9   : > { %2160 = vmatmul.bf16.gmra.mxu1 %v4469_v28  ;;  %v5456_v56 = vpop.f32.mrf.mxu0  ;;  %v926_v28 = vrot.slane %v6640_v46, 7 }
 0x1da   : > { %6639 = vst [vmem:[#allocation61_spill] sm:$0xff] %v5456_v56 }
 0x1db   : > { %2934 = vmatpush.bf16.msra.mxu0 %v4263_v63 }
 0x1dc   : > { %2116 = vmatmul.bf16.gmra.mxu0 %v969_v5  ;;  %v1772_v32 = vpop.f32.mrf.mxu2 }
 0x1dd   : > { %v1683_v1 = vpop.f32.mrf.mxu1 }
 0x1de   : > { %v5458_v52 = vadd.f32 %v1772_v32, %v1683_v1  ;;  %v929_v32 = vor.u32 %v6641_v62, %v926_v28  ;;  %v1029_v28 = vsel %vm5294_vm6, %v5019_v34, 0  ;;  %v6644_v62 = vshrl.u32 %v5266_v40, 16 }
 0x1df   : > { %2935 = vmatpush.bf16.msra.mxu0 %v4262_v39 }
 0x1e0   : > { %v970_v63 = vsel %vm4845_vm3, 0, %v929_v32 }
 0x1e1   : > { %v5469_v1 = vpop.f32.mrf.mxu0 }
 0x1e2   : > { %2254 = vmatmul.bf16.gmra.mxu2 %v1028_v42  ;;  %6642 = vst [vmem:[#allocation62_spill] sm:$0xff] %v5469_v1  ;;  %v4261_v42 = vld [vmem:[#allocation6 + $0x1c0] sm:$0xff] }
 0x1e3   : > { %2936 = vmatpush.bf16.msra.mxu0 %v4261_v42 }
 0x1e4   : > { %v1775_v3 = vpop.f32.mrf.mxu2 }
 0x1e5   : > { %v1686_v5 = vpop.f32.mrf.mxu1 }
 0x1e6   : > { %v5465_v60 = vadd.f32 %v1775_v3, %v1686_v5  ;;  %v4229_v5 = vld [vmem:[#allocation6 + $0x140] sm:$0xff] }
 0x1e7   : > { %1817 = vmatpush.bf16.msrb.mxu3 %v4229_v5 }
 0x1e8   : > { %1794 = vmatmul.bf16.gmra.mxu3 %v5194_v19 }
 0x1e9   : > { %2165 = vmatmul.bf16.gmra.mxu1 %v4470_v51  ;;  %v5479_v19 = vpop.f32.mrf.mxu0  ;;  %v933_v51 = vrot.slane %v6644_v62, 7 }
 0x1ea   : > { %6643 = vst [vmem:[#allocation63_spill] sm:$0xff] %v5479_v19 }
 0x1ec   : > { %2121 = vmatmul.bf16.gmra.mxu0 %v970_v63  ;;  %v1777_v46 = vpop.f32.mrf.mxu2  ;;  %v6645_v63 = vshll.u32 %v5266_v40, 16 }
 0x1ed   : > { %v1688_v3 = vpop.f32.mrf.mxu1 }
 0x1ee   : > { %v5474_v39 = vadd.f32 %v1777_v46, %v1688_v3  ;;  %v936_v46 = vor.u32 %v6645_v63, %v933_v51  ;;  %v4260_v3 = vld [vmem:[#allocation6 + $0x1b8] sm:$0xff]  ;;  %v1030_v51 = vsel %vm5294_vm6, %v5051_v23, 0 }
 0x1ef   : > { %2840 = vmatpush.bf16.msra.mxu3 %v4260_v3 }
 0x1f0   : > { %v971_v34 = vsel %vm4845_vm3, 0, %v936_v46  ;;  %v4471_v46 = vld [vmem:[#allocation2 + $0x10] sm:$0xff] }
 0x1f1   : > { %v5491_v5 = vpop.f32.mrf.mxu0 }
 0x1f2   : > { %2259 = vmatmul.bf16.gmra.mxu2 %v1029_v28  ;;  %6646 = vst [vmem:[#allocation64_spill] sm:$0xff] %v5491_v5 }
 0x1f4   : > { %v1780_v18 = vpop.f32.mrf.mxu2 }
 0x1f5   : > { %v1691_v42 = vpop.f32.mrf.mxu1 }
 0x1f6   : > { %v5483_v32 = vadd.f32 %v1780_v18, %v1691_v42 }
 0x1f8   : > { %1799 = vmatmul.bf16.gmra.mxu3 %v5264_v50  ;;  %v4276_v50 = vld [vmem:[#allocation6 + $0x238] sm:$0xff] }
 0x1f9   : > { %2170 = vmatmul.bf16.gmra.mxu1 %v5001_v44  ;;  %v5498_v42 = vpop.f32.mrf.mxu0 }
 0x1fa   : > { %3018 = vmatpush.bf16.msra.mxu1 %v4276_v50  ;;  %6647 = vst [vmem:[#allocation65_spill] sm:$0xff] %v5498_v42  ;;  %v1035_v42 = vsel %vm5294_vm6, %v5270_v47, 0 }
 0x1fc   : > { %2126 = vmatmul.bf16.gmra.mxu0 %v971_v34  ;;  %v1782_v28 = vpop.f32.mrf.mxu2 }
 0x1fd   : > { %v1693_v62 = vpop.f32.mrf.mxu1 }
 0x1fe   : > { %v5493_v19 = vadd.f32 %v1782_v28, %v1693_v62  ;;  %v1031_v62 = vsel %vm5294_vm6, %v5083_v15, 0  ;;  %v1032_v15 = vsel %vm5294_vm6, %v5115_v30, 0 }
 0x201   : > { %v5506_v23 = vpop.f32.mrf.mxu0 }
 0x202   : > { %2264 = vmatmul.bf16.gmra.mxu2 %v1030_v51  ;;  %6648 = vst [vmem:[#allocation66_spill] sm:$0xff] %v5506_v23 }
 0x205   : > { %v1785_v44 = vpop.f32.mrf.mxu2 }
 0x206   : > { %v1696_v18 = vpop.f32.mrf.mxu1 }
 0x207   : > { %v5500_v63 = vadd.f32 %v1785_v44, %v1696_v18  ;;  %v4472_v18 = vld [vmem:[#allocation2 + $0x18] sm:$0xff] }
 0x208   : > { %1804 = vmatmul.bf16.gmra.mxu3 %v5346_v21  ;;  %v1407_v21 = vsel %vm5294_vm6, %v4854_v0, 0 }
 0x209   : > { %2175 = vmatmul.bf16.gmra.mxu1 %v5033_v55  ;;  %v4259_v55 = vld [vmem:[#allocation6 + $0x1b0] sm:$0xff]  ;;  %v5517_v50 = vpop.f32.mrf.mxu0 }
 0x20a   : > { %6649 = vst [vmem:[#allocation67_spill] sm:$0xff] %v5517_v50  ;;  %2841 = vmatpush.bf16.msra.mxu3 %v4259_v55  ;;  %v4473_v55 = vld [vmem:[#allocation2 + $0x20] sm:$0xff]  ;;  %v1034_v50 = vsel %vm5294_vm6, %v5200_v14, 0 }
 0x20c   : > { %2937 = vmatmul.bf16.vlgmr.msra.gmra.mxu0 %v4471_v46 }
 0x20d   : > { %v1787_v3 = vpop.f32.mrf.mxu2 }
 0x20e   : > { %v1698_v34 = vpop.f32.mrf.mxu1 }
 0x20f   : > { %v5504_v28 = vadd.f32 %v1787_v3, %v1698_v34  ;;  %v4275_v3 = vld [vmem:[#allocation6 + $0x230] sm:$0xff] }
 0x210   : > { %3019 = vmatpush.bf16.msra.mxu1 %v4275_v3 }
 0x212   : > { %2269 = vmatmul.bf16.gmra.mxu2 %v1031_v62  ;;  %v1408_v62 = vsel %vm5294_vm6, %v4882_v48, 0  ;;  %v1409_v48 = vsel %vm5294_vm6, %v4920_v36, 0  ;;  %v4274_v36 = vld [vmem:[#allocation6 + $0x228] sm:$0xff] }
 0x214   : > { %3020 = vmatpush.bf16.msra.mxu1 %v4274_v36 }
 0x216   : > { %v5511_v51 = vpop.f32.mrf.mxu1 }
 0x218   : > { %1818 = vmatmul.bf16.vlgmr.msrb.gmra.mxu3 %v1407_v21 }
 0x219   : > { %2180 = vmatmul.bf16.gmra.mxu1 %v5065_v10  ;;  %v5528_v10 = vpop.f32.mrf.mxu0 }
 0x21a   : > { %6650 = vst [vmem:[#allocation68_spill] sm:$0xff] %v5528_v10 }
 0x21b   : > { %v5519_v44 = vpop.f32.mrf.mxu3 }
 0x21c   : > { %2942 = vmatmul.bf16.gmra.mxu0 %v4472_v18 }
 0x21e   : > { %v5521_v46 = vpop.f32.mrf.mxu1 }
 0x221   : > { %v5540_v18 = vpop.f32.mrf.mxu0 }
 0x222   : > { %2274 = vmatmul.bf16.gmra.mxu2 %v1032_v15  ;;  %6651 = vst [vmem:[#allocation69_spill] sm:$0xff] %v5540_v18  ;;  %v1033_v15 = vsel %vm5294_vm6, %v5156_v27, 0  ;;  %v4474_v27 = vld [vmem:[#allocation2 + $0x28] sm:$0xff] }
 0x223   : > { %v5526_v0 = vpop.f32.mrf.mxu3 }
 0x226   : > { %v5530_v34 = vpop.f32.mrf.mxu1 }
 0x228   : > { %1823 = vmatmul.bf16.gmra.mxu3 %v1408_v62  ;;  %v4258_v62 = vld [vmem:[#allocation6 + $0x1a8] sm:$0xff] }
 0x229   : > { %2185 = vmatmul.bf16.gmra.mxu1 %v5097_v58  ;;  %v5552_v58 = vpop.f32.mrf.mxu0  ;;  %2842 = vmatpush.bf16.msra.mxu3 %v4258_v62  ;;  %v1410_v62 = vsel %vm5294_vm6, %v4959_v29, 0 }
 0x22a   : > { %6652 = vst [vmem:[#allocation70_spill] sm:$0xff] %v5552_v58 }
 0x22b   : > { %v5536_v21 = vpop.f32.mrf.mxu3 }
 0x22c   : > { %2947 = vmatmul.bf16.gmra.mxu0 %v4473_v55  ;;  %v5555_v55 = vpop.f32.mrf.mxu2 }
 0x22e   : > { %v5538_v30 = vpop.f32.mrf.mxu1 }
 0x231   : > { %v5564_v58 = vpop.f32.mrf.mxu0 }
 0x232   : > { %2279 = vmatmul.bf16.gmra.mxu2 %v1033_v15  ;;  %6653 = vst [vmem:[#allocation71_spill] sm:$0xff] %v5564_v58 }
 0x233   : > { %v5545_v3 = vpop.f32.mrf.mxu3 }
 0x236   : > { %v5547_v10 = vpop.f32.mrf.mxu1 }
 0x238   : > { %1828 = vmatmul.bf16.gmra.mxu3 %v1409_v48 }
 0x239   : > { %2190 = vmatmul.bf16.gmra.mxu1 %v5134_v7  ;;  %v5568_v7 = vpop.f32.mrf.mxu2  ;;  %v5578_v14 = vpop.f32.mrf.mxu0 }
 0x23a   : > { %6655 = vst [vmem:[#allocation73_spill] sm:$0xff] %v5578_v14  ;;  %v4257_v14 = vld [vmem:[#allocation6 + $0x1a0] sm:$0xff] }
 0x23b   : > { %v5557_v18 = vpop.f32.mrf.mxu3  ;;  %2843 = vmatpush.bf16.msra.mxu3 %v4257_v14 }
 0x23c   : > { %2952 = vmatmul.bf16.gmra.mxu0 %v4474_v27 }
 0x23e   : > { %v5559_v15 = vpop.f32.mrf.mxu1 }
 0x241   : > { %v5582_v36 = vpop.f32.mrf.mxu2  ;;  %v5589_v29 = vpop.f32.mrf.mxu0 }
 0x242   : > { %2284 = vmatmul.bf16.gmra.mxu2 %v1034_v50  ;;  %v4475_v50 = vld [vmem:[#allocation2 + $0x30] sm:$0xff]  ;;  %6657 = vst [vmem:[#allocation75_spill] sm:$0xff] %v5589_v29 }
 0x243   : > { %v5566_v48 = vpop.f32.mrf.mxu3 }
 0x246   : > { %v5570_v23 = vpop.f32.mrf.mxu1 }
 0x247   : > { %6654 = vst [vmem:[#allocation72_spill] sm:$0xff] %v5570_v23  ;;  %v1419_v23 = vsel %vm5294_vm6, %v5342_v43, 0 }
 0x248   : > { %1833 = vmatmul.bf16.gmra.mxu3 %v1410_v62  ;;  %v1411_v62 = vsel %vm5294_vm6, %v4989_v24, 0  ;;  %v1036_v24 = vsel %vm5294_vm6, %v5340_v45, 0 }
 0x249   : > { %2195 = vmatmul.bf16.gmra.mxu1 %v5172_v37  ;;  %v5602_v29 = vpop.f32.mrf.mxu0 }
 0x24a   : > { %6659 = vst [vmem:[#allocation77_spill] sm:$0xff] %v5602_v29 }
 0x24b   : > { %v5576_v27 = vpop.f32.mrf.mxu3 }
 0x24c   : > { %2957 = vmatmul.bf16.gmra.mxu0 %v4475_v50  ;;  %v5597_v50 = vpop.f32.mrf.mxu2 }
 0x24e   : > { %v5580_v58 = vpop.f32.mrf.mxu1 }
 0x24f   : > { %6656 = vst [vmem:[#allocation74_spill] sm:$0xff] %v5580_v58 }
 0x252   : > { %2289 = vmatmul.bf16.gmra.mxu2 %v1035_v42  ;;  %v4476_v42 = vld [vmem:[#allocation2 + $0x38] sm:$0xff] }
 0x253   : > { %v5587_v5 = vpop.f32.mrf.mxu3 }
 0x256   : > { %v5591_v37 = vpop.f32.mrf.mxu1 }
 0x257   : > { %6658 = vst [vmem:[#allocation76_spill] sm:$0xff] %v5591_v37 }
 0x258   : > { %1838 = vmatmul.bf16.gmra.mxu3 %v1411_v62  ;;  %v5609_v62 = vpop.f32.mrf.mxu2 }
 0x259   : > { %2200 = vmatmul.bf16.gmra.mxu1 %v5236_v4  ;;  %v4273_v4 = vld [vmem:[#allocation6 + $0x220] sm:$0xff]  ;;  %6661 = vst [vmem:[#allocation79_spill] sm:$0xff] %v5609_v62 }
 0x25a   : > { %3021 = vmatpush.bf16.msra.mxu1 %v4273_v4  ;;  %v4477_v4 = vld [vmem:[#allocation2 + $0x40] sm:$0xff] }
 0x25b   : > { %v1790_v1 = vpop.f32.mrf.mxu3 }
 0x25c   : > { %v5600_v47 = vadd.f32 %v1790_v1, %v5519_v44  ;;  %2962 = vmatmul.bf16.gmra.mxu0 %v4476_v42  ;;  %v1412_v1 = vsel %vm5294_vm6, %v5021_v38, 0  ;;  %v4272_v44 = vld [vmem:[#allocation6 + $0x218] sm:$0xff]  ;;  %v5618_v42 = vpop.f32.mrf.mxu0  ;;  %v1037_v38 = vsel %vm5294_vm6, %v5222_v2, 0 }
 0x25d   : > { %6662 = vst [vmem:[#allocation80_spill] sm:$0xff] %v5618_v42  ;;  %v4256_v2 = vld [vmem:[#allocation6 + $0x198] sm:$0xff] }
 0x25e   : > { %v5604_v56 = vpop.f32.mrf.mxu1  ;;  %3022 = vmatpush.bf16.msra.mxu1 %v4272_v44  ;;  %2844 = vmatpush.bf16.msra.mxu3 %v4256_v2 }
 0x25f   : > { %6660 = vst [vmem:[#allocation78_spill] sm:$0xff] %v5604_v56 }
 0x262   : > { %2294 = vmatmul.bf16.gmra.mxu2 %v1036_v24 }
 0x263   : > { %v1792_v37 = vpop.f32.mrf.mxu3 }
 0x264   : > { %v5612_v14 = vadd.f32 %v1792_v37, %v5526_v0  ;;  %v5625_v0 = vpop.f32.mrf.mxu2  ;;  %v4271_v37 = vld [vmem:[#allocation6 + $0x210] sm:$0xff]  ;;  %v5630_v42 = vpop.f32.mrf.mxu0 }
 0x265   : > { %6664 = vst [vmem:[#allocation82_spill] sm:$0xff] %v5625_v0  ;;  %3023 = vmatpush.bf16.msra.mxu1 %v4271_v37  ;;  %v1413_v37 = vsel %vm5294_vm6, %v5053_v16, 0  ;;  %v1038_v16 = vsel %vm5294_vm6, %v5300_v25, 0  ;;  %v4253_v0 = vld [vmem:[#allocation6 + $0x180] sm:$0xff] }
 0x266   : > { %v5620_v45 = vpop.f32.mrf.mxu1  ;;  %6665 = vst [vmem:[#allocation83_spill] sm:$0xff] %v5630_v42  ;;  %v4478_v42 = vld [vmem:[#allocation2 + $0x48] sm:$0xff] }
 0x267   : > { %6663 = vst [vmem:[#allocation81_spill] sm:$0xff] %v5620_v45 }
 0x268   : > { %1843 = vmatmul.bf16.gmra.mxu3 %v1412_v1 }
 0x269   : > { %2205 = vmatmul.bf16.gmra.mxu1 %v5312_v31  ;;  %v4270_v31 = vld [vmem:[#allocation6 + $0x208] sm:$0xff] }
 0x26a   : > { %3024 = vmatpush.bf16.msra.mxu1 %v4270_v31 }
 0x26b   : > { %v1795_v24 = vpop.f32.mrf.mxu3 }
 0x26c   : > { %v5623_v29 = vadd.f32 %v1795_v24, %v5536_v21  ;;  %2967 = vmatmul.bf16.gmra.mxu0 %v4477_v4  ;;  %v4269_v24 = vld [vmem:[#allocation6 + $0x200] sm:$0xff]  ;;  %v5637_v4 = vpop.f32.mrf.mxu2 }
 0x26d   : > { %6667 = vst [vmem:[#allocation85_spill] sm:$0xff] %v5637_v4  ;;  %v6702_v4 = vld [vmem:[#allocation40_spill] sm:$0xff] }
 0x26e   : > { %v5632_v44 = vpop.f32.mrf.mxu1  ;;  %3025 = vmatpush.bf16.msra.mxu1 %v4269_v24 }
 0x26f   : > { %6666 = vst [vmem:[#allocation84_spill] sm:$0xff] %v5632_v44 }
 0x272   : > { %2299 = vmatmul.bf16.gmra.mxu2 %v1037_v38 }
 0x273   : > { %v1797_v1 = vpop.f32.mrf.mxu3 }
 0x274   : > { %v5635_v21 = vadd.f32 %v1797_v1, %v5545_v3  ;;  %v5646_v3 = vpop.f32.mrf.mxu0  ;;  %v5653_v24 = vpop.f32.mrf.mxu2 }
 0x275   : > { %6668 = vst [vmem:[#allocation86_spill] sm:$0xff] %v5646_v3 }
 0x276   : > { %v5648_v1 = vpop.f32.mrf.mxu1  ;;  %6670 = vst [vmem:[#allocation88_spill] sm:$0xff] %v5653_v24  ;;  %v6700_v24 = vld [vmem:[#allocation35_spill] sm:$0xff]  ;;  %v6806_v8 = vld [vmem:[#allocation84_spill] sm:$0xff] }
 0x277   : > { %6669 = vst [vmem:[#allocation87_spill] sm:$0xff] %v5648_v1  ;;  %v6693_v1 = vld [vmem:[#allocation31_spill] sm:$0xff] }
 0x278   : > { %1848 = vmatmul.bf16.gmra.mxu3 %v1413_v37 }
 0x279   : > { %2210 = vmatmul.bf16.gmra.mxu1 %v5196_v53 }
 0x27b   : > { %v1800_v38 = vpop.f32.mrf.mxu3 }
 0x27c   : > { %v5644_v31 = vadd.f32 %v1800_v38, %v5557_v18  ;;  %2972 = vmatmul.bf16.gmra.mxu0 %v4478_v42  ;;  %v1414_v18 = vsel %vm5294_vm6, %v5085_v41, 0  ;;  %v5661_v42 = vpop.f32.mrf.mxu0  ;;  %v4284_v41 = vld [vmem:[%s6482_s5 + $0x38] sm:$0xff] }
 0x27d   : > { %6671 = vst [vmem:[#allocation89_spill] sm:$0xff] %v5661_v42  ;;  %3323 = vmatpush.bf16.msra.mxu2 %v4284_v41 }
 0x27e   : > { %v5663_v2 = vpop.f32.mrf.mxu1 }
 0x27f   : > { %6672 = vst [vmem:[#allocation90_spill] sm:$0xff] %v5663_v2 }
 0x282   : > { %2304 = vmatmul.bf16.gmra.mxu2 %v1038_v16 }
 0x283   : > { %v1802_v53 = vpop.f32.mrf.mxu3 }
 0x284   : > { %v5656_v37 = vadd.f32 %v1802_v53, %v5566_v48  ;;  %v6673_v48 = vshll.u32 %v4867_v26, 16  ;;  %v5675_v53 = vpop.f32.mrf.mxu0 }
 0x285   : > { %6674 = vst [vmem:[#allocation91_spill] sm:$0xff] %v5675_v53  ;;  %v4255_v53 = vld [vmem:[#allocation6 + $0x190] sm:$0xff] }
 0x286   : > { %v2567_v16 = vrot.slane %v6673_v48, 1  ;;  %v5677_v42 = vpop.f32.mrf.mxu1  ;;  %2845 = vmatpush.bf16.msra.mxu3 %v4255_v53 }
 0x287   : > { %6675 = vst [vmem:[#allocation92_spill] sm:$0xff] %v5677_v42 }
 0x288   : > { %1853 = vmatmul.bf16.gmra.mxu3 %v1414_v18 }
 0x289   : > { %2215 = vmatmul.bf16.gmra.mxu1 %v5266_v40  ;;  %v6676_v40 = vshrl.u32 %v4867_v26, 16 }
 0x28b   : > { %v1805_v38 = vpop.f32.mrf.mxu3  ;;  %v2568_v3 = vor.u32 %v2567_v16, %v6676_v40  ;;  %v6681_v40 = vld [vmem:[#allocation26_spill] sm:$0xff] }
 0x28c   : > { %v5667_v25 = vadd.f32 %v1805_v38, %v5576_v27  ;;  %2977 = vmatmul.bf16.gmra.mxu0 %v5136_v35  ;;  %v1415_v38 = vsel %vm5294_vm6, %v5117_v22, 0  ;;  %v5689_v2 = vpop.f32.mrf.mxu0 }
 0x28d   : > { %v2615_v48 = vsel %vm5294_vm6, %v2568_v3, 0  ;;  %6677 = vst [vmem:[#allocation93_spill] sm:$0xff] %v5689_v2  ;;  %v6680_v3 = vshrl.u32 %v4902_v12, 16  ;;  %v6684_v2 = vld [vmem:[#allocation27_spill] sm:$0xff] }
 0x28e   : > { %v5691_v26 = vpop.f32.mrf.mxu1 }
 0x28f   : > { %6678 = vst [vmem:[#allocation94_spill] sm:$0xff] %v5691_v26  ;;  %v6685_v26 = vld [vmem:[#allocation28_spill] sm:$0xff] }
 0x293   : > { %v1807_v18 = vpop.f32.mrf.mxu3 }
 0x294   : > { %v5682_v27 = vadd.f32 %v1807_v18, %v5587_v5  ;;  %v6679_v5 = vshll.u32 %v4902_v12, 16  ;;  %v5704_v53 = vpop.f32.mrf.mxu0 }
 0x295   : > { %6682 = vst [vmem:[#allocation26_spill] sm:$0xff] %v5704_v53 }
 0x296   : > { %v2569_v22 = vrot.slane %v6679_v5, 1 }
 0x298   : > { %1858 = vmatmul.bf16.gmra.mxu3 %v1415_v38  ;;  %v2570_v18 = vor.u32 %v2569_v22, %v6680_v3  ;;  %v6686_v22 = vld [vmem:[#allocation36_spill] sm:$0xff] }
 0x299   : > { %3026 = vmatmul.bf16.vlgmr.msra.gmra.mxu1 %v2615_v48  ;;  %v5706_v48 = vpop.f32.mrf.mxu1 }
 0x29a   : > { %6683 = vst [vmem:[#allocation95_spill] sm:$0xff] %v5706_v48 }
 0x29b   : > { %v1819_v42 = vpop.f32.mrf.mxu3 }
 0x29c   : > { %v5694_v16 = vadd.f32 %v1819_v42, %v5119_v9  ;;  %2982 = vmatmul.bf16.gmra.mxu0 %v5174_v33  ;;  %v1416_v9 = vsel %vm5294_vm6, %v6684_v2, 0  ;;  %v2616_v42 = vsel %vm5294_vm6, %v2570_v18, 0  ;;  %v5719_v53 = vpop.f32.mrf.mxu0  ;;  %v4283_v2 = vld [vmem:[%s6482_s5 + $0x30] sm:$0xff] }
 0x29d   : > { %6689 = vst [vmem:[#allocation27_spill] sm:$0xff] %v5719_v53  ;;  %3324 = vmatpush.bf16.msra.mxu2 %v4283_v2 }
 0x2a1   : > { %v5721_v48 = vpop.f32.mrf.mxu1 }
 0x2a2   : > { %6690 = vst [vmem:[#allocation28_spill] sm:$0xff] %v5721_v48  ;;  %v4254_v48 = vld [vmem:[#allocation6 + $0x188] sm:$0xff] }
 0x2a3   : > { %v1821_v41 = vpop.f32.mrf.mxu3  ;;  %2846 = vmatpush.bf16.msra.mxu3 %v4254_v48  ;;  %v6701_v48 = vld [vmem:[#allocation39_spill] sm:$0xff] }
 0x2a4   : > { %v5702_v38 = vadd.f32 %v1821_v41, %v6681_v40  ;;  %v6687_v41 = vld [vmem:[#allocation14_spill] sm:$0xff]  ;;  %v5736_v44 = vpop.f32.mrf.mxu0 }
 0x2a5   : > { %v6688_v3 = vshll.u32 %v6687_v41, 16 }
 0x2a7   : > { %v2571_v40 = vrot.slane %v6688_v3, 1  ;;  %v1417_v3 = vsel %vm5294_vm6, %v6693_v1, 0  ;;  %2847 = vmatpush.bf16.msra.mxu3 %v4253_v0  ;;  %v6720_v0 = vld [vmem:[#allocation37_spill] sm:$0xff] }
 0x2a8   : > { %1863 = vmatmul.bf16.gmra.mxu3 %v1416_v9  ;;  %v6691_v9 = vshrl.u32 %v6687_v41, 16 }
 0x2a9   : > { %3031 = vmatmul.bf16.gmra.mxu1 %v2616_v42  ;;  %v5738_v45 = vpop.f32.mrf.mxu1 }
 0x2aa   : > { %v2572_v42 = vor.u32 %v2571_v40, %v6691_v9  ;;  %6694 = vst [vmem:[#allocation36_spill] sm:$0xff] %v5738_v45  ;;  %v6695_v40 = vld [vmem:[#allocation32_spill] sm:$0xff] }
 0x2ab   : > { %v1824_v5 = vpop.f32.mrf.mxu3 }
 0x2ac   : > { %v5714_v12 = vadd.f32 %v1824_v5, %v6685_v26  ;;  %2987 = vmatmul.bf16.gmra.mxu0 %v6686_v22  ;;  %v6692_v26 = vld [vmem:[#allocation30_spill] sm:$0xff]  ;;  %v2617_v53 = vsel %vm5294_vm6, %v2572_v42, 0 }
 0x2b1   : > { %v5750_v56 = vpop.f32.mrf.mxu1 }
 0x2b2   : > { %6699 = vst [vmem:[#allocation14_spill] sm:$0xff] %v5750_v56 }
 0x2b3   : > { %v1826_v18 = vpop.f32.mrf.mxu3 }
 0x2b4   : > { %v5729_v5 = vadd.f32 %v1826_v18, %v6692_v26  ;;  %v6696_v18 = vld [vmem:[#allocation16_spill] sm:$0xff] }
 0x2b5   : > { %v6697_v9 = vshll.u32 %v6696_v18, 16  ;;  %v6698_v42 = vshrl.u32 %v6696_v18, 16 }
 0x2b7   : > { %v2573_v1 = vrot.slane %v6697_v9, 1 }
 0x2b8   : > { %1868 = vmatmul.bf16.gmra.mxu3 %v1417_v3 }
 0x2b9   : > { %3036 = vmatmul.bf16.gmra.mxu1 %v2617_v53  ;;  %v2574_v3 = vor.u32 %v2573_v1, %v6698_v42  ;;  %v5748_v53 = vpop.f32.mrf.mxu0  ;;  %v6704_v1 = vld [vmem:[#allocation34_spill] sm:$0xff]  ;;  %v5766_v56 = vpop.f32.mrf.mxu1 }
 0x2ba   : > { %6705 = vst [vmem:[#allocation31_spill] sm:$0xff] %v5766_v56 }
 0x2bb   : > { %v1829_v41 = vpop.f32.mrf.mxu3 }
 0x2bc   : > { %v5741_v2 = vadd.f32 %v1829_v41, %v6695_v40  ;;  %2992 = vmatmul.bf16.gmra.mxu0 %v5314_v11  ;;  %v1418_v41 = vsel %vm5294_vm6, %v6701_v48, 0  ;;  %v2618_v40 = vsel %vm5294_vm6, %v2574_v3, 0  ;;  %v4282_v48 = vld [vmem:[%s6482_s5 + $0x28] sm:$0xff] }
 0x2bd   : > { %3325 = vmatpush.bf16.msra.mxu2 %v4282_v48  ;;  %v6713_v48 = vld [vmem:[#allocation43_spill] sm:$0xff] }
 0x2c1   : > { %v5764_v42 = vpop.f32.mrf.mxu0 }
 0x2c3   : > { %v1831_v26 = vpop.f32.mrf.mxu3 }
 0x2c4   : > { %v5753_v45 = vadd.f32 %v1831_v26, %v6700_v24  ;;  %v6706_v24 = vld [vmem:[#allocation18_spill] sm:$0xff] }
 0x2c5   : > { %v6707_v26 = vshll.u32 %v6706_v24, 16 }
 0x2c7   : > { %v2575_v58 = vrot.slane %v6707_v26, 1 }
 0x2c8   : > { %1873 = vmatmul.bf16.gmra.mxu3 %v1418_v41  ;;  %v6708_v41 = vshrl.u32 %v6706_v24, 16 }
 0x2c9   : > { %3041 = vmatmul.bf16.gmra.mxu1 %v2618_v40  ;;  %v5783_v26 = vpop.f32.mrf.mxu0 }
 0x2ca   : > { %v2576_v40 = vor.u32 %v2575_v58, %v6708_v41 }
 0x2cb   : > { %v1834_v9 = vpop.f32.mrf.mxu3 }
 0x2cc   : > { %v5761_v18 = vadd.f32 %v1834_v9, %v6702_v4  ;;  %2997 = vmatmul.bf16.gmra.mxu0 %v6704_v1  ;;  %v6709_v4 = vld [vmem:[#allocation44_spill] sm:$0xff]  ;;  %v2619_v56 = vsel %vm5294_vm6, %v2576_v40, 0 }
 0x2ce   : > { %6703 = vst [vmem:[#allocation30_spill] sm:$0xff] %v5761_v18  ;;  %v5785_v18 = vpop.f32.mrf.mxu1 }
 0x2cf   : > { %6711 = vst [vmem:[#allocation16_spill] sm:$0xff] %v5785_v18 }
 0x2d3   : > { %v1836_v3 = vpop.f32.mrf.mxu3 }
 0x2d4   : > { %v5776_v9 = vadd.f32 %v1836_v3, %v6709_v4  ;;  %v6714_v3 = vld [vmem:[#allocation20_spill] sm:$0xff]  ;;  %v5793_v4 = vpop.f32.mrf.mxu0 }
 0x2d5   : > { %v6715_v41 = vshll.u32 %v6714_v3, 16  ;;  %v6717_v18 = vshrl.u32 %v6714_v3, 16 }
 0x2d6   : > { %6710 = vst [vmem:[#allocation32_spill] sm:$0xff] %v5776_v9  ;;  %v5795_v40 = vpop.f32.mrf.mxu1 }
 0x2d7   : > { %v2577_v43 = vrot.slane %v6715_v41, 1  ;;  %6716 = vst [vmem:[#allocation39_spill] sm:$0xff] %v5795_v40 }
 0x2d8   : > { %1878 = vmatmul.bf16.gmra.mxu3 %v1419_v23 }
 0x2d9   : > { %3046 = vmatmul.bf16.gmra.mxu1 %v2619_v56  ;;  %v2578_v23 = vor.u32 %v2577_v43, %v6717_v18  ;;  %v6718_v56 = vld [vmem:[#allocation50_spill] sm:$0xff] }
 0x2da   : > { %v6724_v18 = vld [vmem:[#allocation22_spill] sm:$0xff] }
 0x2db   : > { %v1839_v58 = vpop.f32.mrf.mxu3 }
 0x2dc   : > { %v5788_v24 = vadd.f32 %v1839_v58, %v5344_v13  ;;  %3002 = vmatmul.bf16.gmra.mxu0 %v6713_v48  ;;  %v1420_v13 = vsel %vm5294_vm6, %v6720_v0, 0  ;;  %v2620_v58 = vsel %vm5294_vm6, %v2578_v23, 0  ;;  %v6726_v0 = vshrl.u32 %v6724_v18, 16 }
 0x2de   : > { %6712 = vst [vmem:[#allocation35_spill] sm:$0xff] %v5788_v24  ;;  %v5807_v24 = vpop.f32.mrf.mxu0  ;;  %v5809_v40 = vpop.f32.mrf.mxu1 }
 0x2df   : > { %6721 = vst [vmem:[#allocation34_spill] sm:$0xff] %v5807_v24 }
 0x2e0   : > { %6722 = vst [vmem:[#allocation18_spill] sm:$0xff] %v5809_v40 }
 0x2e3   : > { %v1841_v9 = vpop.f32.mrf.mxu3 }
 0x2e4   : > { %v5800_v62 = vadd.f32 %v1841_v9, %v6718_v56  ;;  %v6725_v9 = vshll.u32 %v6724_v18, 16  ;;  %v4281_v56 = vld [vmem:[%s6482_s5 + $0x20] sm:$0xff]  ;;  %v6731_v18 = vld [vmem:[#allocation24_spill] sm:$0xff] }
 0x2e5   : > { %3326 = vmatpush.bf16.msra.mxu2 %v4281_v56 }
 0x2e6   : > { %6719 = vst [vmem:[#allocation40_spill] sm:$0xff] %v5800_v62  ;;  %v2579_v43 = vrot.slane %v6725_v9, 1  ;;  %v5825_v40 = vpop.f32.mrf.mxu1 }
 0x2e7   : > { %6729 = vst [vmem:[#allocation20_spill] sm:$0xff] %v5825_v40 }
 0x2e8   : > { %1883 = vmatmul.bf16.gmra.mxu3 %v1420_v13  ;;  %v2580_v13 = vor.u32 %v2579_v43, %v6726_v0  ;;  %v6732_v43 = vshll.u32 %v6731_v18, 16 }
 0x2e9   : > { %3051 = vmatmul.bf16.gmra.mxu1 %v2620_v58  ;;  %v6727_v58 = vld [vmem:[#allocation55_spill] sm:$0xff] }
 0x2ea   : > { %v2621_v9 = vsel %vm5294_vm6, %v2580_v13, 0  ;;  %v2581_v56 = vrot.slane %v6732_v43, 1 }
 0x2eb   : > { %v1844_v41 = vpop.f32.mrf.mxu3 }
 0x2ec   : > { %v5812_v3 = vadd.f32 %v1844_v41, %v5388_v61  ;;  %3007 = vmatmul.bf16.gmra.mxu0 %v5360_v49  ;;  %v6730_v61 = vld [vmem:[#allocation45_spill] sm:$0xff] }
 0x2ed   : > { %v1421_v41 = vsel %vm5294_vm6, %v6730_v61, 0 }
 0x2ee   : > { %6723 = vst [vmem:[#allocation44_spill] sm:$0xff] %v5812_v3 }
 0x2f3   : > { %v1846_v23 = vpop.f32.mrf.mxu3 }
 0x2f4   : > { %v5823_v62 = vadd.f32 %v1846_v23, %v6727_v58  ;;  %v5837_v23 = vpop.f32.mrf.mxu1  ;;  %v6734_v58 = vshrl.u32 %v6731_v18, 16  ;;  %v6737_v18 = vshll.u32 %v5136_v35, 16 }
 0x2f5   : > { %6733 = vst [vmem:[#allocation50_spill] sm:$0xff] %v5837_v23 }
 0x2f6   : > { %6728 = vst [vmem:[#allocation43_spill] sm:$0xff] %v5823_v62  ;;  %v2582_v40 = vor.u32 %v2581_v56, %v6734_v58  ;;  %v6735_v62 = vld [vmem:[#allocation51_spill] sm:$0xff]  ;;  %v2583_v43 = vrot.slane %v6737_v18, 1 }
 0x2f7   : > { %v1422_v13 = vsel %vm5294_vm6, %v6735_v62, 0  ;;  %v6738_v62 = vshrl.u32 %v5136_v35, 16 }
 0x2f8   : > { %1888 = vmatmul.bf16.gmra.mxu3 %v1421_v41 }
 0x2f9   : > { %3056 = vmatmul.bf16.gmra.mxu1 %v2621_v9 }
 0x2fb   : > { %v1849_v3 = vpop.f32.mrf.mxu3 }
 0x2fc   : > { %v5833_v24 = vadd.f32 %v1849_v3, %v5411_v59  ;;  %v2622_v59 = vsel %vm5294_vm6, %v2582_v40, 0  ;;  %v5849_v3 = vpop.f32.mrf.mxu1 }
 0x2fd   : > { %6736 = vst [vmem:[#allocation37_spill] sm:$0xff] %v5849_v3 }
 0x303   : > { %v1851_v0 = vpop.f32.mrf.mxu3 }
 0x304   : > { %v5842_v61 = vadd.f32 %v1851_v0, %v5421_v6  ;;  %v4280_v6 = vld [vmem:[%s6482_s5 + $0x18] sm:$0xff]  ;;  %v2584_v0 = vor.u32 %v2583_v43, %v6738_v62  ;;  %v5861_v40 = vpop.f32.mrf.mxu1  ;;  %v6742_v43 = vshll.u32 %v5174_v33, 16 }
 0x305   : > { %3327 = vmatpush.bf16.msra.mxu2 %v4280_v6  ;;  %6739 = vst [vmem:[#allocation22_spill] sm:$0xff] %v5861_v40  ;;  %v6744_v40 = vld [vmem:[#allocation13_spill] sm:$0xff] }
 0x306   : > { %v2585_v6 = vrot.slane %v6742_v43, 1 }
 0x308   : > { %1893 = vmatmul.bf16.gmra.mxu3 %v1422_v13  ;;  %v6740_v13 = vld [vmem:[#allocation12_spill] sm:$0xff] }
 0x309   : > { %3061 = vmatmul.bf16.gmra.mxu1 %v2622_v59  ;;  %v2623_v59 = vsel %vm5294_vm6, %v2584_v0, 0  ;;  %v2552_v0 = vsel %vm4845_vm3, 0, %v6744_v40 }
 0x30b   : > { %v1854_v41 = vpop.f32.mrf.mxu3 }
 0x30c   : > { %v5852_v9 = vadd.f32 %v1854_v41, %v5430_v17  ;;  %v2551_v17 = vsel %vm4845_vm3, 0, %v6740_v13  ;;  %v5874_v35 = vpop.f32.mrf.mxu1 }
 0x30d   : > { %6741 = vst [vmem:[#allocation55_spill] sm:$0xff] %v5874_v35 }
 0x313   : > { %v1856_v56 = vpop.f32.mrf.mxu3 }
 0x314   : > { %v5864_v58 = vadd.f32 %v1856_v56, %v5440_v20  ;;  %v6743_v56 = vshrl.u32 %v5174_v33, 16  ;;  %v6746_v33 = vshll.u32 %v6686_v22, 16 }
 0x316   : > { %v2586_v62 = vor.u32 %v2585_v6, %v6743_v56  ;;  %v2587_v43 = vrot.slane %v6746_v33, 1 }
 0x318   : > { %2848 = vmatmul.bf16.vlgmr.msra.gmra.mxu3 %v2551_v17  ;;  %v5888_v17 = vpop.f32.mrf.mxu1 }
 0x319   : > { %3066 = vmatmul.bf16.gmra.mxu1 %v2623_v59  ;;  %6745 = vst [vmem:[#allocation45_spill] sm:$0xff] %v5888_v17 }
 0x31b   : > { %v1859_v41 = vpop.f32.mrf.mxu3 }
 0x31c   : > { %v5872_v18 = vadd.f32 %v1859_v41, %v5449_v54  ;;  %v2624_v54 = vsel %vm5294_vm6, %v2586_v62, 0 }
 0x320   : > { %v5898_v6 = vpop.f32.mrf.mxu1 }
 0x321   : > { %6747 = vst [vmem:[#allocation24_spill] sm:$0xff] %v5898_v6 }
 0x323   : > { %v1861_v20 = vpop.f32.mrf.mxu3 }
 0x324   : > { %v5881_v13 = vadd.f32 %v1861_v20, %v5458_v52  ;;  %v4279_v52 = vld [vmem:[%s6482_s5 + $0x10] sm:$0xff]  ;;  %v6748_v20 = vshrl.u32 %v6686_v22, 16  ;;  %v6751_v22 = vshll.u32 %v5314_v11, 16 }
 0x325   : > { %3328 = vmatpush.bf16.msra.mxu2 %v4279_v52  ;;  %v6752_v52 = vshrl.u32 %v5314_v11, 16 }
 0x326   : > { %v2588_v56 = vor.u32 %v2587_v43, %v6748_v20  ;;  %v2589_v43 = vrot.slane %v6751_v22, 1 }
 0x328   : > { %2853 = vmatmul.bf16.gmra.mxu3 %v2552_v0  ;;  %v6749_v0 = vld [vmem:[#allocation15_spill] sm:$0xff]  ;;  %v5910_v33 = vpop.f32.mrf.mxu1 }
 0x329   : > { %3071 = vmatmul.bf16.gmra.mxu1 %v2624_v54  ;;  %v2625_v54 = vsel %vm5294_vm6, %v2588_v56, 0  ;;  %6750 = vst [vmem:[#allocation51_spill] sm:$0xff] %v5910_v33 }
 0x32b   : > { %v1864_v59 = vpop.f32.mrf.mxu3 }
 0x32c   : > { %v5891_v41 = vadd.f32 %v1864_v59, %v5465_v60  ;;  %v2553_v60 = vsel %vm4845_vm3, 0, %v6749_v0  ;;  %v5922_v0 = vpop.f32.mrf.mxu2 }
 0x330   : > { %v5924_v56 = vpop.f32.mrf.mxu1 }
 0x333   : > { %v1866_v40 = vpop.f32.mrf.mxu3 }
 0x334   : > { %v5903_v62 = vadd.f32 %v1866_v40, %v5474_v39  ;;  %v2590_v40 = vor.u32 %v2589_v43, %v6752_v52  ;;  %v5934_v22 = vpop.f32.mrf.mxu2  ;;  %v4278_v52 = vld [vmem:[%s6482_s5 + $0x8] sm:$0xff] }
 0x335   : > { %3329 = vmatpush.bf16.msra.mxu2 %v4278_v52 }
 0x338   : > { %2858 = vmatmul.bf16.gmra.mxu3 %v2553_v60  ;;  %v6753_v60 = vld [vmem:[#allocation17_spill] sm:$0xff] }
 0x339   : > { %3076 = vmatmul.bf16.gmra.mxu1 %v2625_v54  ;;  %v2554_v54 = vsel %vm4845_vm3, 0, %v6753_v60 }
 0x33b   : > { %v1869_v59 = vpop.f32.mrf.mxu3 }
 0x33c   : > { %v5913_v6 = vadd.f32 %v1869_v59, %v5483_v32  ;;  %v2626_v32 = vsel %vm5294_vm6, %v2590_v40, 0  ;;  %v6755_v40 = vshrl.u32 %v6704_v1, 16  ;;  %v5953_v33 = vpop.f32.mrf.mxu2 }
 0x343   : > { %v1871_v39 = vpop.f32.mrf.mxu3 }
 0x344   : > { %v5920_v20 = vadd.f32 %v1871_v39, %v5493_v19  ;;  %v6754_v19 = vshll.u32 %v6704_v1, 16  ;;  %v5938_v39 = vpop.f32.mrf.mxu1  ;;  %v5962_v52 = vpop.f32.mrf.mxu2 }
 0x346   : > { %v2591_v43 = vrot.slane %v6754_v19, 1 }
 0x348   : > { %2863 = vmatmul.bf16.gmra.mxu3 %v2554_v54  ;;  %v2592_v54 = vor.u32 %v2591_v43, %v6755_v40  ;;  %v6759_v40 = vshrl.u32 %v6713_v48, 16 }
 0x349   : > { %3081 = vmatmul.bf16.gmra.mxu1 %v2626_v32 }
 0x34a   : > { %v2627_v19 = vsel %vm5294_vm6, %v2592_v54, 0 }
 0x34b   : > { %v1874_v59 = vpop.f32.mrf.mxu3 }
 0x34c   : > { %v5932_v11 = vadd.f32 %v1874_v59, %v5500_v63  ;;  %v6756_v63 = vld [vmem:[#allocation19_spill] sm:$0xff]  ;;  %v5955_v17 = vpop.f32.mrf.mxu1 }
 0x34d   : > { %v2555_v59 = vsel %vm4845_vm3, 0, %v6756_v63 }
 0x353   : > { %v1876_v60 = vpop.f32.mrf.mxu3 }
 0x354   : > { %v5946_v32 = vadd.f32 %v1876_v60, %v5504_v28  ;;  %v6758_v28 = vshll.u32 %v6713_v48, 16  ;;  %v5966_v54 = vpop.f32.mrf.mxu1  ;;  %v5979_v48 = vpop.f32.mrf.mxu2 }
 0x356   : > { %v2593_v43 = vrot.slane %v6758_v28, 1 }
 0x358   : > { %2868 = vmatmul.bf16.gmra.mxu3 %v2555_v59  ;;  %v2594_v63 = vor.u32 %v2593_v43, %v6759_v40  ;;  %v4277_v40 = vld [vmem:[%s6482_s5] sm:$0xff] }
 0x359   : > { %3086 = vmatmul.bf16.gmra.mxu1 %v2627_v19  ;;  %v6761_v19 = vld [vmem:[#allocation21_spill] sm:$0xff]  ;;  %3330 = vmatpush.bf16.msra.mxu2 %v4277_v40 }
 0x35a   : > { %v2556_v3 = vsel %vm4845_vm3, 0, %v6761_v19 }
 0x35b   : > { %v1879_v35 = vpop.f32.mrf.mxu3 }
 0x35c   : > { %v5958_v1 = vadd.f32 %v1879_v35, %v5600_v47  ;;  %v2628_v47 = vsel %vm5294_vm6, %v2594_v63, 0  ;;  %v5981_v43 = vpop.f32.mrf.mxu1 }
 0x35e   : > { %6757 = vst [vmem:[#allocation12_spill] sm:$0xff] %v5958_v1 }
 0x363   : > { %v1881_v60 = vpop.f32.mrf.mxu3 }
 0x364   : > { %v5969_v59 = vadd.f32 %v1881_v60, %v5612_v14  ;;  %v6763_v14 = vshll.u32 %v5360_v49, 16  ;;  %v6000_v23 = vpop.f32.mrf.mxu1 }
 0x366   : > { %6760 = vst [vmem:[#allocation13_spill] sm:$0xff] %v5969_v59  ;;  %v2595_v60 = vrot.slane %v6763_v14, 1 }
 0x368   : > { %2873 = vmatmul.bf16.gmra.mxu3 %v2556_v3  ;;  %v6764_v3 = vshrl.u32 %v5360_v49, 16 }
 0x369   : > { %3091 = vmatmul.bf16.gmra.mxu1 %v2628_v47 }
 0x36a   : > { %v2596_v63 = vor.u32 %v2595_v60, %v6764_v3  ;;  %v6769_v3 = vld [vmem:[#allocation25_spill] sm:$0xff] }
 0x36b   : > { %v1884_v35 = vpop.f32.mrf.mxu3 }
 0x36c   : > { %v5977_v28 = vadd.f32 %v1884_v35, %v5623_v29  ;;  %v5993_v29 = vpop.f32.mrf.mxu2  ;;  %v6766_v35 = vld [vmem:[#allocation23_spill] sm:$0xff]  ;;  %v2629_v14 = vsel %vm5294_vm6, %v2596_v63, 0  ;;  %v6030_v59 = vpop.f32.mrf.mxu1 }
 0x36e   : > { %6762 = vst [vmem:[#allocation15_spill] sm:$0xff] %v5977_v28  ;;  %v2557_v28 = vsel %vm4845_vm3, 0, %v6766_v35  ;;  %v2558_v35 = vsel %vm4845_vm3, 0, %v6769_v3 }
 0x373   : > { %v1886_v19 = vpop.f32.mrf.mxu3 }
 0x374   : > { %v5991_v47 = vadd.f32 %v1886_v19, %v5635_v21  ;;  %v6005_v60 = vpop.f32.mrf.mxu2 }
 0x376   : > { %6765 = vst [vmem:[#allocation17_spill] sm:$0xff] %v5991_v47 }
 0x378   : > { %2878 = vmatmul.bf16.gmra.mxu3 %v2557_v28 }
 0x379   : > { %3096 = vmatmul.bf16.gmra.mxu1 %v2629_v14 }
 0x37b   : > { %v1889_v40 = vpop.f32.mrf.mxu3 }
 0x37c   : > { %v6003_v49 = vadd.f32 %v1889_v40, %v5644_v31  ;;  %v6013_v63 = vpop.f32.mrf.mxu2 }
 0x37e   : > { %6767 = vst [vmem:[#allocation19_spill] sm:$0xff] %v6003_v49  ;;  %v6772_v49 = vld [vmem:[#allocation29_spill] sm:$0xff] }
 0x383   : > { %v1891_v21 = vpop.f32.mrf.mxu3 }
 0x384   : > { %v6008_v19 = vadd.f32 %v1891_v21, %v5656_v37  ;;  %v6021_v40 = vpop.f32.mrf.mxu2  ;;  %v2559_v37 = vsel %vm4845_vm3, 0, %v6772_v49  ;;  %v6773_v21 = vld [vmem:[#allocation42_spill] sm:$0xff] }
 0x385   : > { %v2053_v3 = vadd.f32 %v6773_v21, %v5694_v16 }
 0x386   : > { %6768 = vst [vmem:[#allocation21_spill] sm:$0xff] %v6008_v19 }
 0x388   : > { %2883 = vmatmul.bf16.gmra.mxu3 %v2558_v35  ;;  %v6028_v35 = vpop.f32.mrf.mxu0 }
 0x38b   : > { %v1894_v47 = vpop.f32.mrf.mxu3 }
 0x38c   : > { %v6016_v28 = vadd.f32 %v1894_v47, %v5667_v25  ;;  %v6774_v47 = vld [vmem:[#allocation47_spill] sm:$0xff] }
 0x38e   : > { %6770 = vst [vmem:[#allocation23_spill] sm:$0xff] %v6016_v28 }
 0x390   : > { %v6041_v28 = vpop.f32.mrf.mxu0 }
 0x393   : > { %v1896_v14 = vpop.f32.mrf.mxu3 }
 0x394   : > { %v6019_v31 = vadd.f32 %v1896_v14, %v5682_v27  ;;  %v2142_v27 = vadd.f32 %v5511_v51, %v2053_v3  ;;  %v2055_v14 = vadd.f32 %v6774_v47, %v5702_v38  ;;  %v6049_v38 = vpop.f32.mrf.mxu1  ;;  %v6776_v47 = vld [vmem:[#allocation49_spill] sm:$0xff] }
 0x396   : > { %6771 = vst [vmem:[#allocation25_spill] sm:$0xff] %v6019_v31  ;;  %v6036_v31 = vpop.f32.mrf.mxu2  ;;  %v2231_v16 = vadd.f32 %v5555_v55, %v2142_v27 }
 0x398   : > { %2888 = vmatmul.bf16.gmra.mxu3 %v2559_v37  ;;  %v2144_v37 = vadd.f32 %v5521_v46, %v2055_v14  ;;  %v6775_v46 = vld [vmem:[#allocation33_spill] sm:$0xff]  ;;  %v2058_v14 = vadd.f32 %v6776_v47, %v5714_v12 }
 0x399   : > { %v2560_v55 = vsel %vm4845_vm3, 0, %v6775_v46 }
 0x39b   : > { %v2849_v19 = vpop.f32.mrf.mxu3 }
 0x39c   : > { %v2939_v25 = vadd.f32 %v5736_v44, %v2849_v19  ;;  %v6046_v44 = vld [vmem:[%s6481_s4] ss:$0 sm:$0xff]  ;;  %v2233_v19 = vadd.f32 %v5568_v7, %v2144_v37  ;;  %v2147_v37 = vadd.f32 %v5530_v34, %v2058_v14  ;;  %v6778_v14 = vld [vmem:[#allocation41_spill] sm:$0xff] }
 0x39e   : > { %v3028_v49 = vadd.f32 %v5924_v56, %v2939_v25  ;;  %v6057_v27 = vpop.f32.mrf.mxu2 }
 0x3a0   : > { %v3107_v1 = vadd.f32 %v3028_v49, %v2231_v16 }
 0x3a2   : > { %v3143_v3 = vadd.f32 %v6046_v44, %v3107_v1  ;;  %v6066_v1 = vpop.f32.mrf.mxu0 }
 0x3a3   : > { %v2851_v21 = vpop.f32.mrf.mxu3 }
 0x3a4   : > { %v2941_v51 = vadd.f32 %v5748_v53, %v2851_v21  ;;  %v3175_v16 = vmax.f32 %v3143_v3, 0.0  ;;  %v6777_v21 = vld [vmem:[#allocation53_spill] sm:$0xff] }
 0x3a6   : > { %v3030_v56 = vadd.f32 %v5938_v39, %v2941_v51  ;;  %v2060_v51 = vadd.f32 %v6777_v21, %v5729_v5  ;;  %v6073_v3 = vpop.f32.mrf.mxu2 }
 0x3a8   : > { %v3108_v25 = vadd.f32 %v3030_v56, %v2233_v19  ;;  %2893 = vmatmul.bf16.gmra.mxu3 %v2560_v55  ;;  %v6068_v56 = vpop.f32.mrf.mxu1  ;;  %v2149_v12 = vadd.f32 %v5538_v30, %v2060_v51  ;;  %v2236_v55 = vadd.f32 %v5582_v36, %v2147_v37  ;;  %v6779_v36 = vld [vmem:[#allocation54_spill] sm:$0xff] }
 0x3aa   : > { %v3144_v53 = vadd.f32 %v6046_v44, %v3108_v25  ;;  %v2238_v5 = vadd.f32 %v5597_v50, %v2149_v12 }
 0x3ab   : > { %v2854_v49 = vpop.f32.mrf.mxu3 }
 0x3ac   : > { %v3176_v7 = vmax.f32 %v3144_v53, 0.0  ;;  %v2944_v39 = vadd.f32 %v5764_v42, %v2854_v49  ;;  %v2561_v53 = vsel %vm4845_vm3, 0, %v6778_v14  ;;  %v6782_v14 = vld [vmem:[#allocation34_spill] sm:$0xff] }
 0x3ae   : > { %v3207_v19 = vpack.c.bf16 %v3176_v7, %v3175_v16  ;;  %v3033_v46 = vadd.f32 %v5955_v17, %v2944_v39  ;;  %v6081_v17 = vpop.f32.mrf.mxu0  ;;  %v2063_v16 = vadd.f32 %v6779_v36, %v5741_v2  ;;  %v6090_v21 = vpop.f32.mrf.mxu2 }
 0x3b0   : > { %3331 = vmatmul.bf16.vlgmr.msra.gmra.mxu2 %v3207_v19  ;;  %v3109_v25 = vadd.f32 %v3033_v46, %v2236_v55  ;;  %v6086_v7 = vpop.f32.mrf.mxu1  ;;  %v2152_v51 = vadd.f32 %v5547_v10, %v2063_v16  ;;  %v6780_v19 = vld [vmem:[#allocation56_spill] sm:$0xff]  ;;  %v6783_v10 = vld [vmem:[#allocation82_spill] sm:$0xff] }
 0x3b1   : > { %v2065_v46 = vadd.f32 %v6780_v19, %v5753_v45 }
 0x3b2   : > { %v3145_v30 = vadd.f32 %v6046_v44, %v3109_v25  ;;  %v6781_v25 = vld [vmem:[#allocation79_spill] sm:$0xff] }
 0x3b3   : > { %v2856_v42 = vpop.f32.mrf.mxu3  ;;  %v2154_v2 = vadd.f32 %v5559_v15, %v2065_v46 }
 0x3b4   : > { %v2946_v34 = vadd.f32 %v5783_v26, %v2856_v42  ;;  %v3177_v39 = vmax.f32 %v3145_v30, 0.0 }
 0x3b6   : > { %v3035_v47 = vadd.f32 %v5966_v54, %v2946_v34  ;;  %v6097_v42 = vpop.f32.mrf.mxu0  ;;  %v2241_v34 = vadd.f32 %v6781_v25, %v2152_v51  ;;  %v6105_v30 = vpop.f32.mrf.mxu2  ;;  %v6789_v25 = vld [vmem:[#allocation58_spill] sm:$0xff] }
 0x3b8   : > { %v3110_v49 = vadd.f32 %v3035_v47, %v2238_v5  ;;  %2898 = vmatmul.bf16.gmra.mxu3 %v2561_v53  ;;  %v6100_v5 = vpop.f32.mrf.mxu1 }
 0x3ba   : > { %v3146_v26 = vadd.f32 %v6046_v44, %v3110_v49  ;;  %v2243_v49 = vadd.f32 %v6783_v10, %v2154_v2  ;;  %v6788_v2 = vld [vmem:[#allocation32_spill] sm:$0xff]  ;;  %v6790_v10 = vld [vmem:[#allocation74_spill] sm:$0xff] }
 0x3bb   : > { %v2859_v50 = vpop.f32.mrf.mxu3 }
 0x3bc   : > { %v2949_v54 = vadd.f32 %v5793_v4, %v2859_v50  ;;  %v3178_v37 = vmax.f32 %v3146_v26, 0.0  ;;  %v6785_v26 = vld [vmem:[#allocation30_spill] sm:$0xff]  ;;  %v6786_v50 = vld [vmem:[#allocation57_spill] sm:$0xff] }
 0x3be   : > { %v3208_v12 = vpack.c.bf16 %v3178_v37, %v3177_v39  ;;  %v3038_v55 = vadd.f32 %v5981_v43, %v2949_v54  ;;  %v6784_v43 = vld [vmem:[#allocation48_spill] sm:$0xff]  ;;  %v2068_v54 = vadd.f32 %v6786_v50, %v6785_v26  ;;  %v6114_v51 = vpop.f32.mrf.mxu0 }
 0x3bf   : > { %v2562_v15 = vsel %vm4845_vm3, 0, %v6784_v43  ;;  %v6792_v26 = vld [vmem:[#allocation88_spill] sm:$0xff] }
 0x3c0   : > { %3336 = vmatmul.bf16.gmra.mxu2 %v3208_v12  ;;  %v3111_v47 = vadd.f32 %v3038_v55, %v2241_v34  ;;  %v6787_v12 = vld [vmem:[#allocation72_spill] sm:$0xff]  ;;  %v2070_v34 = vadd.f32 %v6789_v25, %v6788_v2 }
 0x3c1   : > { %v2157_v55 = vadd.f32 %v6787_v12, %v2068_v54  ;;  %v6795_v12 = vld [vmem:[#allocation59_spill] sm:$0xff] }
 0x3c2   : > { %v3147_v16 = vadd.f32 %v6046_v44, %v3111_v47 }
 0x3c3   : > { %v2861_v4 = vpop.f32.mrf.mxu3 }
 0x3c4   : > { %v2951_v53 = vadd.f32 %v6782_v14, %v2861_v4  ;;  %v3179_v19 = vmax.f32 %v3147_v16, 0.0  ;;  %v6120_v4 = vpop.f32.mrf.mxu1 }
 0x3c6   : > { %v3040_v45 = vadd.f32 %v6000_v23, %v2951_v53  ;;  %v6123_v53 = vpop.f32.mrf.mxu2  ;;  %v6128_v16 = vpop.f32.mrf.mxu0 }
 0x3c8   : > { %v3112_v36 = vadd.f32 %v3040_v45, %v2243_v49  ;;  %2903 = vmatmul.bf16.gmra.mxu3 %v2562_v15  ;;  %v2159_v49 = vadd.f32 %v6790_v10, %v2070_v34  ;;  %v6791_v45 = vld [vmem:[#allocation85_spill] sm:$0xff] }
 0x3c9   : > { %v2246_v43 = vadd.f32 %v6791_v45, %v2157_v55  ;;  %v6798_v45 = vld [vmem:[#allocation60_spill] sm:$0xff] }
 0x3ca   : > { %v3148_v39 = vadd.f32 %v6046_v44, %v3112_v36  ;;  %v2248_v50 = vadd.f32 %v6792_v26, %v2159_v49  ;;  %v6797_v49 = vld [vmem:[#allocation40_spill] sm:$0xff]  ;;  %v6799_v26 = vld [vmem:[#allocation78_spill] sm:$0xff] }
 0x3cb   : > { %v2864_v37 = vpop.f32.mrf.mxu3 }
 0x3cc   : > { %v2954_v23 = vadd.f32 %v6028_v35, %v2864_v37  ;;  %v3180_v46 = vmax.f32 %v3148_v39, 0.0  ;;  %v6793_v39 = vld [vmem:[#allocation38_spill] sm:$0xff]  ;;  %v6135_v37 = vpop.f32.mrf.mxu1 }
 0x3ce   : > { %v3209_v47 = vpack.c.bf16 %v3180_v46, %v3179_v19  ;;  %v3043_v14 = vadd.f32 %v6030_v59, %v2954_v23  ;;  %v2563_v59 = vsel %vm4845_vm3, 0, %v6793_v39  ;;  %v6794_v46 = vld [vmem:[#allocation35_spill] sm:$0xff]  ;;  %v6141_v2 = vpop.f32.mrf.mxu2 }
 0x3cf   : > { %v2073_v55 = vadd.f32 %v6795_v12, %v6794_v46 }
 0x3d0   : > { %3341 = vmatmul.bf16.gmra.mxu2 %v3209_v47  ;;  %v3113_v15 = vadd.f32 %v3043_v14, %v2246_v43  ;;  %v6796_v14 = vld [vmem:[#allocation76_spill] sm:$0xff]  ;;  %v2075_v43 = vadd.f32 %v6798_v45, %v6797_v49 }
 0x3d1   : > { %v2162_v10 = vadd.f32 %v6796_v14, %v2073_v55 }
 0x3d2   : > { %v3149_v19 = vadd.f32 %v6046_v44, %v3113_v15 }
 0x3d3   : > { %v2866_v35 = vpop.f32.mrf.mxu3  ;;  %v2251_v39 = vadd.f32 %v5922_v0, %v2162_v10  ;;  %v6802_v10 = vld [vmem:[#allocation61_spill] sm:$0xff] }
 0x3d4   : > { %v2956_v36 = vadd.f32 %v6041_v28, %v2866_v35  ;;  %v3181_v34 = vmax.f32 %v3149_v19, 0.0 }
 0x3d6   : > { %v3045_v54 = vadd.f32 %v6049_v38, %v2956_v36  ;;  %v6147_v36 = vpop.f32.mrf.mxu0  ;;  %v6155_v46 = vpop.f32.mrf.mxu2 }
 0x3d8   : > { %v3114_v23 = vadd.f32 %v3045_v54, %v2248_v50  ;;  %2908 = vmatmul.bf16.gmra.mxu3 %v2563_v59  ;;  %v2164_v50 = vadd.f32 %v6799_v26, %v2075_v43  ;;  %v6151_v54 = vpop.f32.mrf.mxu1  ;;  %v4252_v59 = vld [vmem:[#allocation2 + $0x88] sm:$0xff] }
 0x3d9   : > { %3012 = vmatmul.bf16.gmra.mxu0 %v4252_v59  ;;  %v2532_v12 = vshll.u32 %v4252_v59, 16 }
 0x3da   : > { %v3150_v28 = vadd.f32 %v6046_v44, %v3114_v23  ;;  %v2253_v55 = vadd.f32 %v5934_v22, %v2164_v50 }
 0x3db   : > { %v2869_v25 = vpop.f32.mrf.mxu3 }
 0x3dc   : > { %v2959_v38 = vadd.f32 %v6066_v1, %v2869_v25  ;;  %v3182_v47 = vmax.f32 %v3150_v28, 0.0  ;;  %v6800_v28 = vld [vmem:[#allocation46_spill] sm:$0xff] }
 0x3dd   : > { %v2564_v25 = vsel %vm4845_vm3, 0, %v6800_v28 }
 0x3de   : > { %v3210_v35 = vpack.c.bf16 %v3182_v47, %v3181_v34  ;;  %v3048_v15 = vadd.f32 %v6068_v56, %v2959_v38  ;;  %v2529_v38 = vshrl.u32 %v4252_v59, 16  ;;  %v2597_v34 = vrot.slane %v2532_v12, 1  ;;  %v2973_v45 = vpop.f32.mrf.mxu0  ;;  %v6804_v59 = vld [vmem:[#allocation43_spill] sm:$0xff] }
 0x3e0   : > { %3346 = vmatmul.bf16.gmra.mxu2 %v3210_v35  ;;  %v3115_v23 = vadd.f32 %v3048_v15, %v2251_v39  ;;  %v2598_v14 = vor.u32 %v2597_v34, %v2529_v38  ;;  %v6168_v35 = vpop.f32.mrf.mxu1  ;;  %v6803_v39 = vld [vmem:[#allocation81_spill] sm:$0xff] }
 0x3e2   : > { %v3151_v47 = vadd.f32 %v6046_v44, %v3115_v23  ;;  %v6805_v23 = vld [vmem:[#allocation62_spill] sm:$0xff] }
 0x3e3   : > { %v2871_v1 = vpop.f32.mrf.mxu3 }
 0x3e4   : > { %v2961_v19 = vadd.f32 %v6081_v17, %v2871_v1  ;;  %v6801_v17 = vld [vmem:[#allocation44_spill] sm:$0xff]  ;;  %v3183_v26 = vmax.f32 %v3151_v47, 0.0 }
 0x3e5   : > { %v2078_v49 = vadd.f32 %v6802_v10, %v6801_v17 }
 0x3e6   : > { %v3050_v56 = vadd.f32 %v6086_v7, %v2961_v19  ;;  %v2630_v7 = vsel %vm5294_vm6, %v2598_v14, 0  ;;  %v2080_v19 = vadd.f32 %v6805_v23, %v6804_v59  ;;  %v6809_v59 = vld [vmem:[#allocation87_spill] sm:$0xff] }
 0x3e7   : > { %3101 = vmatmul.bf16.gmra.mxu1 %v2630_v7  ;;  %v2167_v1 = vadd.f32 %v6803_v39, %v2078_v49 }
 0x3e8   : > { %v3116_v0 = vadd.f32 %v3050_v56, %v2253_v55  ;;  %2913 = vmatmul.bf16.gmra.mxu3 %v2564_v25  ;;  %v6174_v56 = vpop.f32.mrf.mxu2  ;;  %v2169_v25 = vadd.f32 %v6806_v8, %v2080_v19  ;;  %v3064_v17 = vpop.f32.mrf.mxu1  ;;  %v6810_v19 = vld [vmem:[#allocation64_spill] sm:$0xff] }
 0x3e9   : > { %v2256_v34 = vadd.f32 %v5953_v33, %v2167_v1  ;;  %v6808_v33 = vld [vmem:[#allocation63_spill] sm:$0xff]  ;;  %v2531_v1 = vrot.slane %v2529_v38, 7 }
 0x3ea   : > { %v3152_v43 = vadd.f32 %v6046_v44, %v3116_v0  ;;  %v2258_v10 = vadd.f32 %v5962_v52, %v2169_v25 }
 0x3eb   : > { %v2874_v22 = vpop.f32.mrf.mxu3 }
 0x3ec   : > { %v2964_v15 = vadd.f32 %v6097_v42, %v2874_v22  ;;  %v3184_v50 = vmax.f32 %v3152_v43, 0.0  ;;  %v2975_v42 = vpop.f32.mrf.mxu0  ;;  %v6807_v43 = vld [vmem:[#allocation52_spill] sm:$0xff] }
 0x3ed   : > { %v2565_v22 = vsel %vm4845_vm3, 0, %v6807_v43 }
 0x3ee   : > { %v3211_v55 = vpack.c.bf16 %v3184_v50, %v3183_v26  ;;  %v3053_v28 = vadd.f32 %v6100_v5, %v2964_v15  ;;  %v2083_v26 = vadd.f32 %v6808_v33, %v5833_v24  ;;  %v2534_v24 = vor.u32 %v2532_v12, %v2531_v1 }
 0x3f0   : > { %3351 = vmatmul.bf16.gmra.mxu2 %v3211_v55  ;;  %v3117_v47 = vadd.f32 %v3053_v28, %v2256_v34  ;;  %v6186_v15 = vpop.f32.mrf.mxu2  ;;  %v2172_v23 = vadd.f32 %v6809_v59, %v2083_v26  ;;  %v2085_v55 = vadd.f32 %v6810_v19, %v5842_v61  ;;  %v3067_v25 = vpop.f32.mrf.mxu1  ;;  %v2566_v61 = vsel %vm4845_vm3, 0, %v2534_v24 }
 0x3f2   : > { %v3153_v7 = vadd.f32 %v6046_v44, %v3117_v47 }
 0x3f3   : > { %v2876_v0 = vpop.f32.mrf.mxu3 }
 0x3f4   : > { %v2966_v14 = vadd.f32 %v6114_v51, %v2876_v0  ;;  %v3185_v39 = vmax.f32 %v3153_v7, 0.0  ;;  %v2978_v28 = vpop.f32.mrf.mxu0  ;;  %v6811_v0 = vld [vmem:[#allocation90_spill] sm:$0xff] }
 0x3f5   : > { %v2174_v47 = vadd.f32 %v6811_v0, %v2085_v55 }
 0x3f6   : > { %v3055_v49 = vadd.f32 %v6120_v4, %v2966_v14  ;;  %v2261_v14 = vadd.f32 %v5979_v48, %v2172_v23  ;;  %v6812_v48 = vld [vmem:[#allocation65_spill] sm:$0xff]  ;;  %v6815_v23 = vld [vmem:[#allocation94_spill] sm:$0xff] }
 0x3f7   : > { %v2263_v43 = vadd.f32 %v5993_v29, %v2174_v47  ;;  %v2088_v7 = vadd.f32 %v6812_v48, %v5852_v9  ;;  %v6813_v29 = vld [vmem:[#allocation92_spill] sm:$0xff] }
 0x3f8   : > { %v3118_v5 = vadd.f32 %v3055_v49, %v2258_v10  ;;  %2918 = vmatmul.bf16.gmra.mxu3 %v2565_v22  ;;  %v3069_v33 = vpop.f32.mrf.mxu1 }
 0x3fa   : > { %v3154_v51 = vadd.f32 %v6046_v44, %v3118_v5 }
 0x3fb   : > { %v2879_v50 = vpop.f32.mrf.mxu3 }
 0x3fc   : > { %v2969_v52 = vadd.f32 %v6128_v16, %v2879_v50  ;;  %v3186_v4 = vmax.f32 %v3154_v51, 0.0  ;;  %v6198_v16 = vpop.f32.mrf.mxu2 }
 0x3fe   : > { %v3212_v8 = vpack.c.bf16 %v3186_v4, %v3185_v39  ;;  %v3058_v34 = vadd.f32 %v6135_v37, %v2969_v52  ;;  %v2980_v37 = vpop.f32.mrf.mxu0  ;;  %v2177_v39 = vadd.f32 %v6813_v29, %v2088_v7 }
 0x400   : > { %3356 = vmatmul.bf16.gmra.mxu2 %v3212_v8  ;;  %v3119_v38 = vadd.f32 %v3058_v34, %v2261_v14  ;;  %v2266_v55 = vadd.f32 %v6005_v60, %v2177_v39 }
 0x402   : > { %v3155_v12 = vadd.f32 %v6046_v44, %v3119_v38 }
 0x403   : > { %v2881_v10 = vpop.f32.mrf.mxu3 }
 0x404   : > { %v2971_v49 = vadd.f32 %v6147_v36, %v2881_v10  ;;  %v3187_v50 = vmax.f32 %v3155_v12, 0.0  ;;  %v6209_v52 = vpop.f32.mrf.mxu2  ;;  %v6817_v12 = vld [vmem:[#allocation95_spill] sm:$0xff] }
 0x406   : > { %v3060_v22 = vadd.f32 %v6151_v54, %v2971_v49  ;;  %v6814_v54 = vld [vmem:[#allocation66_spill] sm:$0xff]  ;;  %v2983_v19 = vpop.f32.mrf.mxu0 }
 0x407   : > { %v2090_v4 = vadd.f32 %v6814_v54, %v5864_v58 }
 0x408   : > { %v3120_v5 = vadd.f32 %v3060_v22, %v2263_v43  ;;  %2923 = vmatmul.bf16.gmra.mxu3 %v2566_v61 }
 0x409   : > { %v2179_v9 = vadd.f32 %v6815_v23, %v2090_v4 }
 0x40a   : > { %v3156_v26 = vadd.f32 %v6046_v44, %v3120_v5 }
 0x40b   : > { %v2884_v51 = vpop.f32.mrf.mxu3  ;;  %v2268_v0 = vadd.f32 %v6013_v63, %v2179_v9  ;;  %v6818_v63 = vld [vmem:[#allocation68_spill] sm:$0xff] }
 0x40c   : > { %v2974_v36 = vadd.f32 %v2973_v45, %v2884_v51  ;;  %v3188_v57 = vmax.f32 %v3156_v26, 0.0  ;;  %v3072_v45 = vpop.f32.mrf.mxu1  ;;  %v6218_v14 = vpop.f32.mrf.mxu2 }
 0x40e   : > { %v3213_v1 = vpack.c.bf16 %v3188_v57, %v3187_v50  ;;  %v3063_v59 = vadd.f32 %v6168_v35, %v2974_v36  ;;  %v6816_v35 = vld [vmem:[#allocation67_spill] sm:$0xff]  ;;  %v2985_v43 = vpop.f32.mrf.mxu0  ;;  %v6819_v36 = vld [vmem:[#allocation28_spill] sm:$0xff] }
 0x40f   : > { %v2093_v38 = vadd.f32 %v6816_v35, %v5872_v18  ;;  %v6823_v35 = vld [vmem:[#allocation14_spill] sm:$0xff] }
 0x410   : > { %3361 = vmatmul.bf16.gmra.mxu2 %v3213_v1  ;;  %v3121_v34 = vadd.f32 %v3063_v59, %v2266_v55 }
 0x412   : > { %v3157_v58 = vadd.f32 %v6046_v44, %v3121_v34 }
 0x413   : > { %v2886_v8 = vpop.f32.mrf.mxu3 }
 0x414   : > { %v2976_v24 = vadd.f32 %v2975_v42, %v2886_v8  ;;  %v3189_v22 = vmax.f32 %v3157_v58, 0.0  ;;  %v2182_v42 = vadd.f32 %v6817_v12, %v2093_v38  ;;  %v3074_v48 = vpop.f32.mrf.mxu1  ;;  %v6227_v51 = vpop.f32.mrf.mxu2 }
 0x416   : > { %v3065_v47 = vadd.f32 %v3064_v17, %v2976_v24  ;;  %v2095_v17 = vadd.f32 %v6818_v63, %v5881_v13  ;;  %v2271_v50 = vadd.f32 %v6021_v40, %v2182_v42  ;;  %v2988_v39 = vpop.f32.mrf.mxu0  ;;  %v6821_v24 = vld [vmem:[#allocation36_spill] sm:$0xff] }
 0x418   : > { %v3122_v10 = vadd.f32 %v3065_v47, %v2268_v0  ;;  %v2184_v18 = vadd.f32 %v6819_v36, %v2095_v17 }
 0x41a   : > { %v3158_v49 = vadd.f32 %v6046_v44, %v3122_v10  ;;  %v2273_v54 = vadd.f32 %v6036_v31, %v2184_v18  ;;  %v6822_v31 = vld [vmem:[#allocation70_spill] sm:$0xff]  ;;  %v6824_v18 = vld [vmem:[#allocation71_spill] sm:$0xff] }
 0x41b   : > { %v2889_v61 = vpop.f32.mrf.mxu3 }
 0x41c   : > { %v2979_v60 = vadd.f32 %v2978_v28, %v2889_v61  ;;  %v3190_v5 = vmax.f32 %v3158_v49, 0.0  ;;  %v3077_v1 = vpop.f32.mrf.mxu1  ;;  %v6236_v55 = vpop.f32.mrf.mxu2 }
 0x41e   : > { %v3214_v7 = vpack.c.bf16 %v3190_v5, %v3189_v22  ;;  %v3068_v26 = vadd.f32 %v3067_v25, %v2979_v60  ;;  %v6820_v25 = vld [vmem:[#allocation69_spill] sm:$0xff]  ;;  %v2990_v10 = vpop.f32.mrf.mxu0  ;;  %v3239_v60 = vld [vmem:[%s4760_s29] sm:$0xff] }
 0x41f   : > { %v2098_v23 = vadd.f32 %v6820_v25, %v5891_v41  ;;  %v6244_v41 = vld [vmem:[%s6483_s6] ss:$0 sm:$0xff] }
 0x420   : > { %3366 = vmatmul.bf16.gmra.mxu2 %v3214_v7  ;;  %v3123_v29 = vadd.f32 %v3068_v26, %v2271_v50 }
 0x421   : > { %v2187_v0 = vadd.f32 %v6821_v24, %v2098_v23 }
 0x422   : > { %v3159_v13 = vadd.f32 %v6046_v44, %v3123_v29 }
 0x423   : > { %v2891_v57 = vpop.f32.mrf.mxu3 }
 0x424   : > { %v2981_v28 = vadd.f32 %v2980_v37, %v2891_v57  ;;  %v3191_v34 = vmax.f32 %v3159_v13, 0.0  ;;  %v3079_v49 = vpop.f32.mrf.mxu1  ;;  %v6826_v13 = vld [vmem:[#allocation73_spill] sm:$0xff] }
 0x425   : > { %v2105_v25 = vadd.f32 %v6826_v13, %v5920_v20 }
 0x426   : > { %v3070_v4 = vadd.f32 %v3069_v33, %v2981_v28  ;;  %v2100_v33 = vadd.f32 %v6822_v31, %v5903_v62  ;;  %v2993_v36 = vpop.f32.mrf.mxu0 }
 0x428   : > { %v3124_v59 = vadd.f32 %v3070_v4, %v2273_v54  ;;  %v2189_v38 = vadd.f32 %v6823_v35, %v2100_v33 }
 0x42a   : > { %v3160_v9 = vadd.f32 %v6046_v44, %v3124_v59  ;;  %v2278_v12 = vadd.f32 %v6073_v3, %v2189_v38  ;;  %v3240_v3 = vld [vmem:[%s4760_s29 + $0x8] sm:$0xff] }
 0x42b   : > { %v2894_v40 = vpop.f32.mrf.mxu3 }
 0x42c   : > { %v2984_v8 = vadd.f32 %v2983_v19, %v2894_v40  ;;  %v3192_v37 = vmax.f32 %v3160_v9, 0.0  ;;  %v2276_v19 = vadd.f32 %v6057_v27, %v2187_v0  ;;  %v2103_v27 = vadd.f32 %v6824_v18, %v5913_v6  ;;  %v3082_v57 = vpop.f32.mrf.mxu1  ;;  %v6825_v6 = vld [vmem:[#allocation31_spill] sm:$0xff]  ;;  %v3241_v0 = vld [vmem:[%s4760_s29 + $0x10] sm:$0xff]  ;;  %v6830_v18 = vld [vmem:[#allocation77_spill] sm:$0xff] }
 0x42e   : > { %v3215_v47 = vpack.c.bf16 %v3192_v37, %v3191_v34  ;;  %v3073_v58 = vadd.f32 %v3072_v45, %v2984_v8  ;;  %v2192_v59 = vadd.f32 %v6825_v6, %v2103_v27  ;;  %v6827_v34 = vld [vmem:[#allocation16_spill] sm:$0xff]  ;;  %v2995_v33 = vpop.f32.mrf.mxu0 }
 0x42f   : > { %v2194_v37 = vadd.f32 %v6827_v34, %v2105_v25  ;;  %v6832_v34 = vld [vmem:[#allocation12_spill] sm:$0xff] }
 0x430   : > { %3371 = vmatmul.bf16.gmra.mxu2 %v3215_v47  ;;  %v3125_v62 = vadd.f32 %v3073_v58, %v2276_v19  ;;  %v2281_v24 = vadd.f32 %v6090_v21, %v2192_v59 }
 0x432   : > { %v3161_v26 = vadd.f32 %v6046_v44, %v3125_v62 }
 0x433   : > { %v2896_v61 = vpop.f32.mrf.mxu3  ;;  %v3332_v22 = vpop.f32.mrf.mxu2 }
 0x434   : > { %v2986_v5 = vadd.f32 %v2985_v43, %v2896_v61  ;;  %v3333_v45 = vadd.f32 %v6244_v41, %v3332_v22  ;;  %v3193_v54 = vmax.f32 %v3161_v26, 0.0  ;;  %v3084_v35 = vpop.f32.mrf.mxu1  ;;  %v6828_v22 = vld [vmem:[#allocation75_spill] sm:$0xff] }
 0x435   : > { %v2108_v62 = vadd.f32 %v6828_v22, %v5932_v11  ;;  %v2110_v11 = vadd.f32 %v6830_v18, %v5946_v32 }
 0x436   : > { %v3075_v42 = vadd.f32 %v3074_v48, %v2986_v5  ;;  %v3412_v63 = vadd.f32 %v3333_v45, %v3239_v60 }
 0x438   : > { %v3126_v17 = vadd.f32 %v3075_v42, %v2278_v12  ;;  %v3444_v7 = vmax.f32 %v3412_v63, 0.0 }
 0x43a   : > { %3476 = vst.msk [vmem:[%s6256_s30] sm:$0xff] %vm478_vm0, %v3444_v7  ;;  %v3162_v43 = vadd.f32 %v6046_v44, %v3126_v17  ;;  %v2998_v17 = vpop.f32.mrf.mxu0  ;;  %v6829_v7 = vld [vmem:[#allocation39_spill] sm:$0xff] }
 0x43b   : > { %v2899_v50 = vpop.f32.mrf.mxu3  ;;  %v3334_v48 = vpop.f32.mrf.mxu2  ;;  %v2197_v26 = vadd.f32 %v6829_v7, %v2108_v62 }
 0x43c   : > { %v2989_v29 = vadd.f32 %v2988_v39, %v2899_v50  ;;  %v3335_v28 = vadd.f32 %v6244_v41, %v3334_v48  ;;  %v3194_v4 = vmax.f32 %v3162_v43, 0.0  ;;  %v3087_v50 = vpop.f32.mrf.mxu1 }
 0x43e   : > { %v3413_v23 = vadd.f32 %v3335_v28, %v3240_v3  ;;  %v3216_v9 = vpack.c.bf16 %v3194_v4, %v3193_v54  ;;  %v3078_v40 = vadd.f32 %v3077_v1, %v2989_v29  ;;  %v2283_v1 = vadd.f32 %v6105_v30, %v2194_v37  ;;  %v6831_v29 = vld [vmem:[#allocation18_spill] sm:$0xff]  ;;  %v3243_v4 = vld [vmem:[%s4760_s29 + $0x20] sm:$0xff] }
 0x43f   : > { %v2199_v28 = vadd.f32 %v6831_v29, %v2110_v11  ;;  %v6833_v37 = vld [vmem:[#allocation80_spill] sm:$0xff]  ;;  %v6839_v29 = vld [vmem:[#allocation86_spill] sm:$0xff] }
 0x440   : > { %v3445_v8 = vmax.f32 %v3413_v23, 0.0  ;;  %3376 = vmatmul.bf16.gmra.mxu2 %v3216_v9  ;;  %v3127_v47 = vadd.f32 %v3078_v40, %v2281_v24  ;;  %v2113_v24 = vadd.f32 %v6833_v37, %v6832_v34 }
 0x441   : > { %v2288_v25 = vadd.f32 %v6141_v2, %v2199_v28 }
 0x442   : > { %3477 = vst.msk [vmem:[%s6256_s30 + $0x8] sm:$0xff] %vm478_vm0, %v3445_v8  ;;  %v3163_v21 = vadd.f32 %v6046_v44, %v3127_v47  ;;  %v3000_v9 = vpop.f32.mrf.mxu0 }
 0x443   : > { %v2901_v39 = vpop.f32.mrf.mxu3  ;;  %v3337_v31 = vpop.f32.mrf.mxu2 }
 0x444   : > { %v2991_v58 = vadd.f32 %v2990_v10, %v2901_v39  ;;  %v3338_v20 = vadd.f32 %v6244_v41, %v3337_v31  ;;  %v3242_v10 = vld [vmem:[%s4760_s29 + $0x18] sm:$0xff]  ;;  %v3089_v39 = vpop.f32.mrf.mxu1 }
 0x446   : > { %v3080_v38 = vadd.f32 %v3079_v49, %v2991_v58  ;;  %v3414_v19 = vadd.f32 %v3338_v20, %v3241_v0  ;;  %v3195_v49 = vmax.f32 %v3163_v21, 0.0 }
 0x448   : > { %v3128_v61 = vadd.f32 %v3080_v38, %v2283_v1  ;;  %v3446_v60 = vmax.f32 %v3414_v19, 0.0  ;;  %v6834_v1 = vld [vmem:[#allocation20_spill] sm:$0xff]  ;;  %v6835_v19 = vld [vmem:[#allocation13_spill] sm:$0xff] }
 0x449   : > { %v2202_v38 = vadd.f32 %v6834_v1, %v2113_v24 }
 0x44a   : > { %3478 = vst.msk [vmem:[%s6256_s30 + $0x10] sm:$0xff] %vm478_vm0, %v3446_v60  ;;  %v3164_v5 = vadd.f32 %v6046_v44, %v3128_v61  ;;  %v6836_v61 = vld [vmem:[#allocation83_spill] sm:$0xff] }
 0x44b   : > { %v2904_v45 = vpop.f32.mrf.mxu3  ;;  %v3339_v12 = vpop.f32.mrf.mxu2  ;;  %v2115_v60 = vadd.f32 %v6836_v61, %v6835_v19 }
 0x44c   : > { %v2994_v42 = vadd.f32 %v2993_v36, %v2904_v45  ;;  %v3340_v30 = vadd.f32 %v6244_v41, %v3339_v12  ;;  %v3196_v63 = vmax.f32 %v3164_v5, 0.0  ;;  %v2286_v36 = vadd.f32 %v6123_v53, %v2197_v26  ;;  %v3003_v45 = vpop.f32.mrf.mxu0 }
 0x44e   : > { %v3415_v27 = vadd.f32 %v3340_v30, %v3242_v10  ;;  %v3217_v43 = vpack.c.bf16 %v3196_v63, %v3195_v49  ;;  %v3083_v3 = vadd.f32 %v3082_v57, %v2994_v42  ;;  %v6837_v10 = vld [vmem:[#allocation50_spill] sm:$0xff]  ;;  %v2291_v42 = vadd.f32 %v6155_v46, %v2202_v38 }
 0x44f   : > { %v2204_v12 = vadd.f32 %v6837_v10, %v2115_v60  ;;  %v3245_v49 = vld [vmem:[%s4760_s29 + $0x30] sm:$0xff] }
 0x450   : > { %v3447_v48 = vmax.f32 %v3415_v27, 0.0  ;;  %3381 = vmatmul.bf16.gmra.mxu2 %v3217_v43  ;;  %v3129_v59 = vadd.f32 %v3083_v3, %v2286_v36 }
 0x451   : > { %v2293_v11 = vadd.f32 %v6174_v56, %v2204_v12 }
 0x452   : > { %3479 = vst.msk [vmem:[%s6256_s30 + $0x18] sm:$0xff] %vm478_vm0, %v3447_v48  ;;  %v3165_v53 = vadd.f32 %v6046_v44, %v3129_v59  ;;  %v6838_v48 = vld [vmem:[#allocation15_spill] sm:$0xff] }
 0x453   : > { %v2906_v54 = vpop.f32.mrf.mxu3  ;;  %v3342_v6 = vpop.f32.mrf.mxu2  ;;  %v2118_v28 = vadd.f32 %v6839_v29, %v6838_v48 }
 0x454   : > { %v2996_v13 = vadd.f32 %v2995_v33, %v2906_v54  ;;  %v3343_v32 = vadd.f32 %v6244_v41, %v3342_v6  ;;  %v3244_v33 = vld [vmem:[%s4760_s29 + $0x28] sm:$0xff]  ;;  %v3197_v20 = vmax.f32 %v3165_v53, 0.0  ;;  %v3005_v59 = vpop.f32.mrf.mxu0 }
 0x456   : > { %v3085_v57 = vadd.f32 %v3084_v35, %v2996_v13  ;;  %v3416_v23 = vadd.f32 %v3343_v32, %v3243_v4  ;;  %v3246_v4 = vld [vmem:[%s4760_s29 + $0x38] sm:$0xff] }
 0x458   : > { %v3130_v40 = vadd.f32 %v3085_v57, %v2288_v25  ;;  %v3448_v8 = vmax.f32 %v3416_v23, 0.0  ;;  %v6840_v57 = vld [vmem:[#allocation37_spill] sm:$0xff] }
 0x459   : > { %v2207_v23 = vadd.f32 %v6840_v57, %v2118_v28  ;;  %v6849_v28 = vld [vmem:[#allocation45_spill] sm:$0xff] }
 0x45a   : > { %3480 = vst.msk [vmem:[%s6256_s30 + $0x20] sm:$0xff] %vm478_vm0, %v3448_v8  ;;  %v3166_v0 = vadd.f32 %v6046_v44, %v3130_v40  ;;  %v6842_v40 = vld [vmem:[#allocation89_spill] sm:$0xff] }
 0x45b   : > { %v2909_v31 = vpop.f32.mrf.mxu3  ;;  %v3344_v47 = vpop.f32.mrf.mxu2 }
 0x45c   : > { %v2999_v2 = vadd.f32 %v2998_v17, %v2909_v31  ;;  %v3345_v58 = vadd.f32 %v6244_v41, %v3344_v47  ;;  %v3198_v35 = vmax.f32 %v3166_v0, 0.0  ;;  %v3092_v17 = vpop.f32.mrf.mxu1  ;;  %v6843_v0 = vld [vmem:[#allocation22_spill] sm:$0xff]  ;;  %v3008_v38 = vpop.f32.mrf.mxu0 }
 0x45e   : > { %v3417_v21 = vadd.f32 %v3345_v58, %v3244_v33  ;;  %v3218_v22 = vpack.c.bf16 %v3198_v35, %v3197_v20  ;;  %v3088_v62 = vadd.f32 %v3087_v50, %v2999_v2  ;;  %v2296_v33 = vadd.f32 %v6186_v15, %v2207_v23  ;;  %v3247_v2 = vld [vmem:[%s4760_s29 + $0x40] sm:$0xff] }
 0x460   : > { %v3449_v5 = vmax.f32 %v3417_v21, 0.0  ;;  %3386 = vmatmul.bf16.gmra.mxu2 %v3218_v22  ;;  %v3131_v7 = vadd.f32 %v3088_v62, %v2291_v42 }
 0x462   : > { %3481 = vst.msk [vmem:[%s6256_s30 + $0x28] sm:$0xff] %vm478_vm0, %v3449_v5  ;;  %v3167_v46 = vadd.f32 %v6046_v44, %v3131_v7  ;;  %v6844_v5 = vld [vmem:[#allocation19_spill] sm:$0xff] }
 0x463   : > { %v2911_v30 = vpop.f32.mrf.mxu3  ;;  %v3347_v63 = vpop.f32.mrf.mxu2 }
 0x464   : > { %v3001_v26 = vadd.f32 %v3000_v9, %v2911_v30  ;;  %v3348_v18 = vadd.f32 %v6244_v41, %v3347_v63  ;;  %v3199_v32 = vmax.f32 %v3167_v46, 0.0  ;;  %v6841_v9 = vld [vmem:[#allocation17_spill] sm:$0xff]  ;;  %v3094_v53 = vpop.f32.mrf.mxu1  ;;  %v3010_v46 = vpop.f32.mrf.mxu0 }
 0x465   : > { %v2120_v8 = vadd.f32 %v6842_v40, %v6841_v9  ;;  %v3248_v30 = vld [vmem:[%s4760_s29 + $0x48] sm:$0xff] }
 0x466   : > { %v3090_v27 = vadd.f32 %v3089_v39, %v3001_v26  ;;  %v3418_v43 = vadd.f32 %v3348_v18, %v3245_v49  ;;  %v6846_v26 = vld [vmem:[#allocation55_spill] sm:$0xff] }
 0x467   : > { %v2209_v31 = vadd.f32 %v6843_v0, %v2120_v8 }
 0x468   : > { %v3132_v50 = vadd.f32 %v3090_v27, %v2293_v11  ;;  %v3450_v3 = vmax.f32 %v3418_v43, 0.0  ;;  %v6847_v11 = vld [vmem:[#allocation21_spill] sm:$0xff] }
 0x469   : > { %v2298_v19 = vadd.f32 %v6198_v16, %v2209_v31  ;;  %v6848_v27 = vld [vmem:[#allocation93_spill] sm:$0xff] }
 0x46a   : > { %3482 = vst.msk [vmem:[%s6256_s30 + $0x30] sm:$0xff] %vm478_vm0, %v3450_v3  ;;  %v3168_v36 = vadd.f32 %v6046_v44, %v3132_v50  ;;  %v2125_v43 = vadd.f32 %v6848_v27, %v6847_v11 }
 0x46b   : > { %v2914_v54 = vpop.f32.mrf.mxu3  ;;  %v3349_v6 = vpop.f32.mrf.mxu2 }
 0x46c   : > { %v3004_v13 = vadd.f32 %v3003_v45, %v2914_v54  ;;  %v3350_v56 = vadd.f32 %v6244_v41, %v3349_v6  ;;  %v3200_v25 = vmax.f32 %v3168_v36, 0.0  ;;  %v3097_v21 = vpop.f32.mrf.mxu1  ;;  %v6845_v45 = vld [vmem:[#allocation91_spill] sm:$0xff]  ;;  %v2214_v36 = vadd.f32 %v6849_v28, %v2125_v43  ;;  %v3013_v8 = vpop.f32.mrf.mxu0 }
 0x46d   : > { %v2123_v10 = vadd.f32 %v6845_v45, %v6844_v5 }
 0x46e   : > { %v3419_v34 = vadd.f32 %v3350_v56, %v3246_v4  ;;  %v3219_v37 = vpack.c.bf16 %v3200_v25, %v3199_v32  ;;  %v3093_v24 = vadd.f32 %v3092_v17, %v3004_v13  ;;  %v2303_v57 = vadd.f32 %v6218_v14, %v2214_v36 }
 0x46f   : > { %v2212_v18 = vadd.f32 %v6846_v26, %v2123_v10 }
 0x470   : > { %v3451_v39 = vmax.f32 %v3419_v34, 0.0  ;;  %3391 = vmatmul.bf16.gmra.mxu2 %v3219_v37  ;;  %v3133_v20 = vadd.f32 %v3093_v24, %v2296_v33  ;;  %v6850_v34 = vld [vmem:[#allocation23_spill] sm:$0xff]  ;;  %v6851_v37 = vld [vmem:[#allocation26_spill] sm:$0xff] }
 0x471   : > { %v2301_v4 = vadd.f32 %v6209_v52, %v2212_v18  ;;  %v2128_v24 = vadd.f32 %v6851_v37, %v6850_v34  ;;  %v3250_v33 = vld [vmem:[%s4760_s29 + $0x58] sm:$0xff] }
 0x472   : > { %3483 = vst.msk [vmem:[%s6256_s30 + $0x38] sm:$0xff] %vm478_vm0, %v3451_v39  ;;  %v3169_v15 = vadd.f32 %v6046_v44, %v3133_v20 }
 0x473   : > { %v2916_v47 = vpop.f32.mrf.mxu3  ;;  %v3352_v58 = vpop.f32.mrf.mxu2 }
 0x474   : > { %v3006_v35 = vadd.f32 %v3005_v59, %v2916_v47  ;;  %v3353_v1 = vadd.f32 %v6244_v41, %v3352_v58  ;;  %v3201_v17 = vmax.f32 %v3169_v15, 0.0  ;;  %v3099_v54 = vpop.f32.mrf.mxu1  ;;  %v3249_v59 = vld [vmem:[%s4760_s29 + $0x50] sm:$0xff]  ;;  %v6855_v15 = vld [vmem:[#allocation51_spill] sm:$0xff]  ;;  %v3015_v10 = vpop.f32.mrf.mxu0 }
 0x476   : > { %v3095_v61 = vadd.f32 %v3094_v53, %v3006_v35  ;;  %v3420_v60 = vadd.f32 %v3353_v1, %v3247_v2  ;;  %v6852_v35 = vld [vmem:[#allocation24_spill] sm:$0xff] }
 0x477   : > { %v2217_v1 = vadd.f32 %v6852_v35, %v2128_v24 }
 0x478   : > { %v3134_v22 = vadd.f32 %v3095_v61, %v2298_v19  ;;  %v3452_v62 = vmax.f32 %v3420_v60, 0.0  ;;  %v6854_v19 = vld [vmem:[#allocation27_spill] sm:$0xff] }
 0x479   : > { %v2306_v45 = vadd.f32 %v6227_v51, %v2217_v1 }
 0x47a   : > { %3484 = vst.msk [vmem:[%s6256_s30 + $0x40] sm:$0xff] %vm478_vm0, %v3452_v62  ;;  %v3170_v12 = vadd.f32 %v6046_v44, %v3134_v22 }
 0x47b   : > { %v2919_v42 = vpop.f32.mrf.mxu3  ;;  %v3354_v49 = vpop.f32.mrf.mxu2 }
 0x47c   : > { %v3009_v63 = vadd.f32 %v3008_v38, %v2919_v42  ;;  %v3355_v16 = vadd.f32 %v6244_v41, %v3354_v49  ;;  %v3202_v7 = vmax.f32 %v3170_v12, 0.0  ;;  %v3102_v39 = vpop.f32.mrf.mxu1  ;;  %v6853_v38 = vld [vmem:[#allocation25_spill] sm:$0xff]  ;;  %v3251_v42 = vld [vmem:[%s4760_s29 + $0x60] sm:$0xff] }
 0x47d   : > { %v2130_v61 = vadd.f32 %v6854_v19, %v6853_v38  ;;  %v3259_v38 = vld [vmem:[%s4760_s29 + $0xa0] sm:$0xff] }
 0x47e   : > { %v3421_v50 = vadd.f32 %v3355_v16, %v3248_v30  ;;  %v3220_v3 = vpack.c.bf16 %v3202_v7, %v3201_v17  ;;  %v3098_v48 = vadd.f32 %v3097_v21, %v3009_v63 }
 0x47f   : > { %v2219_v5 = vadd.f32 %v6855_v15, %v2130_v61 }
 0x480   : > { %v3453_v29 = vmax.f32 %v3421_v50, 0.0  ;;  %3396 = vmatmul.bf16.gmra.mxu2 %v3220_v3  ;;  %v3135_v56 = vadd.f32 %v3098_v48, %v2301_v4  ;;  %v3252_v50 = vld [vmem:[%s4760_s29 + $0x68] sm:$0xff] }
 0x481   : > { %v2308_v7 = vadd.f32 %v6236_v55, %v2219_v5 }
 0x482   : > { %3485 = vst.msk [vmem:[%s6256_s30 + $0x48] sm:$0xff] %vm478_vm0, %v3453_v29  ;;  %v3171_v52 = vadd.f32 %v6046_v44, %v3135_v56 }
 0x483   : > { %v2921_v6 = vpop.f32.mrf.mxu3  ;;  %v3357_v13 = vpop.f32.mrf.mxu2 }
 0x484   : > { %v3011_v32 = vadd.f32 %v3010_v46, %v2921_v6  ;;  %v3358_v25 = vadd.f32 %v6244_v41, %v3357_v13  ;;  %v3203_v58 = vmax.f32 %v3171_v52, 0.0  ;;  %v3104_v17 = vpop.f32.mrf.mxu1  ;;  %v3254_v13 = vld [vmem:[%s4760_s29 + $0x78] sm:$0xff]  ;;  %v3256_v52 = vld [vmem:[%s4760_s29 + $0x88] sm:$0xff] }
 0x486   : > { %v3100_v23 = vadd.f32 %v3099_v54, %v3011_v32  ;;  %v3422_v9 = vadd.f32 %v3358_v25, %v3249_v59  ;;  %v3253_v54 = vld [vmem:[%s4760_s29 + $0x70] sm:$0xff] }
 0x488   : > { %v3136_v40 = vadd.f32 %v3100_v23, %v2303_v57  ;;  %v3454_v53 = vmax.f32 %v3422_v9, 0.0  ;;  %v3255_v23 = vld [vmem:[%s4760_s29 + $0x80] sm:$0xff] }
 0x48a   : > { %3486 = vst.msk [vmem:[%s6256_s30 + $0x50] sm:$0xff] %vm478_vm0, %v3454_v53  ;;  %v3172_v0 = vadd.f32 %v6046_v44, %v3136_v40 }
 0x48b   : > { %v2924_v31 = vpop.f32.mrf.mxu3  ;;  %v3359_v47 = vpop.f32.mrf.mxu2 }
 0x48c   : > { %v3014_v14 = vadd.f32 %v3013_v8, %v2924_v31  ;;  %v3360_v2 = vadd.f32 %v6244_v41, %v3359_v47  ;;  %v3204_v20 = vmax.f32 %v3172_v0, 0.0  ;;  %v3257_v0 = vld [vmem:[%s4760_s29 + $0x90] sm:$0xff] }
 0x48e   : > { %v3423_v60 = vadd.f32 %v3360_v2, %v3250_v33  ;;  %v3221_v21 = vpack.c.bf16 %v3204_v20, %v3203_v58  ;;  %v3103_v22 = vadd.f32 %v3102_v39, %v3014_v14  ;;  %v3258_v2 = vld [vmem:[%s4760_s29 + $0x98] sm:$0xff] }
 0x490   : > { %v3455_v62 = vmax.f32 %v3423_v60, 0.0  ;;  %3401 = vmatmul.bf16.gmra.mxu2 %v3221_v21  ;;  %v3137_v49 = vadd.f32 %v3103_v22, %v2306_v45  ;;  %v3260_v22 = vld [vmem:[%s4760_s29 + $0xa8] sm:$0xff] }
 0x492   : > { %3487 = vst.msk [vmem:[%s6256_s30 + $0x58] sm:$0xff] %vm478_vm0, %v3455_v62  ;;  %v3173_v27 = vadd.f32 %v6046_v44, %v3137_v49 }
 0x493   : > { %v2926_v12 = vpop.f32.mrf.mxu3  ;;  %v3362_v30 = vpop.f32.mrf.mxu2 }
 0x494   : > { %v3016_v63 = vadd.f32 %v3015_v10, %v2926_v12  ;;  %v3363_v16 = vadd.f32 %v6244_v41, %v3362_v30  ;;  %v3205_v48 = vmax.f32 %v3173_v27, 0.0  ;;  %v3261_v10 = vld [vmem:[%s4760_s29 + $0xb0] sm:$0xff] }
 0x496   : > { %v3105_v26 = vadd.f32 %v3104_v17, %v3016_v63  ;;  %v3424_v18 = vadd.f32 %v3363_v16, %v3251_v42  ;;  %v3262_v63 = vld [vmem:[%s4760_s29 + $0xb8] sm:$0xff] }
 0x498   : > { %v3138_v51 = vadd.f32 %v3105_v26, %v2308_v7  ;;  %v3456_v11 = vmax.f32 %v3424_v18, 0.0  ;;  %v3263_v18 = vld [vmem:[%s4760_s29 + $0xc0] sm:$0xff] }
 0x49a   : > { %3488 = vst.msk [vmem:[%s6256_s30 + $0x60] sm:$0xff] %vm478_vm0, %v3456_v11  ;;  %v3174_v43 = vadd.f32 %v6046_v44, %v3138_v51 }
 0x49b   : > { %v3364_v3 = vpop.f32.mrf.mxu2 }
 0x49c   : > { %v3365_v46 = vadd.f32 %v6244_v41, %v3364_v3  ;;  %v3206_v55 = vmax.f32 %v3174_v43, 0.0 }
 0x49e   : > { %v3425_v29 = vadd.f32 %v3365_v46, %v3252_v50  ;;  %v3222_v28 = vpack.c.bf16 %v3206_v55, %v3205_v48  ;;  %v3264_v50 = vld [vmem:[%s4760_s29 + $0xc8] sm:$0xff] }
 0x4a0   : > { %v3457_v36 = vmax.f32 %v3425_v29, 0.0  ;;  %3406 = vmatmul.bf16.gmra.mxu2 %v3222_v28  ;;  %v3265_v29 = vld [vmem:[%s4760_s29 + $0xd0] sm:$0xff] }
 0x4a2   : > { %3489 = vst.msk [vmem:[%s6256_s30 + $0x68] sm:$0xff] %vm478_vm0, %v3457_v36 }
 0x4a3   : > { %v3367_v4 = vpop.f32.mrf.mxu2 }
 0x4a4   : > { %v3368_v44 = vadd.f32 %v6244_v41, %v3367_v4 }
 0x4a6   : > { %v3426_v6 = vadd.f32 %v3368_v44, %v3253_v54  ;;  %v3266_v44 = vld [vmem:[%s4760_s29 + $0xd8] sm:$0xff] }
 0x4a8   : > { %v3458_v59 = vmax.f32 %v3426_v6, 0.0 }
 0x4aa   : > { %3490 = vst.msk [vmem:[%s6256_s30 + $0x70] sm:$0xff] %vm478_vm0, %v3458_v59 }
 0x4ab   : > { %v3369_v56 = vpop.f32.mrf.mxu2 }
 0x4ac   : > { %v3370_v32 = vadd.f32 %v6244_v41, %v3369_v56 }
 0x4ae   : > { %v3427_v25 = vadd.f32 %v3370_v32, %v3254_v13  ;;  %v3267_v32 = vld [vmem:[%s4760_s29 + $0xe0] sm:$0xff] }
 0x4b0   : > { %v3459_v57 = vmax.f32 %v3427_v25, 0.0 }
 0x4b2   : > { %3491 = vst.msk [vmem:[%s6256_s30 + $0x78] sm:$0xff] %vm478_vm0, %v3459_v57 }
 0x4b3   : > { %v3372_v9 = vpop.f32.mrf.mxu2 }
 0x4b4   : > { %v3373_v40 = vadd.f32 %v6244_v41, %v3372_v9 }
 0x4b6   : > { %v3428_v8 = vadd.f32 %v3373_v40, %v3255_v23  ;;  %v3268_v40 = vld [vmem:[%s4760_s29 + $0xe8] sm:$0xff] }
 0x4b8   : > { %v3460_v53 = vmax.f32 %v3428_v8, 0.0 }
 0x4ba   : > { %3492 = vst.msk [vmem:[%s6256_s30 + $0x80] sm:$0xff] %vm478_vm0, %v3460_v53 }
 0x4bb   : > { %v3374_v34 = vpop.f32.mrf.mxu2 }
 0x4bc   : > { %v3375_v37 = vadd.f32 %v6244_v41, %v3374_v34 }
 0x4be   : > { %v3429_v24 = vadd.f32 %v3375_v37, %v3256_v52  ;;  %v3269_v37 = vld [vmem:[%s4760_s29 + $0xf0] sm:$0xff] }
 0x4c0   : > { %v3461_v39 = vmax.f32 %v3429_v24, 0.0 }
 0x4c2   : > { %3493 = vst.msk [vmem:[%s6256_s30 + $0x88] sm:$0xff] %vm478_vm0, %v3461_v39 }
 0x4c3   : > { %v3377_v31 = vpop.f32.mrf.mxu2 }
 0x4c4   : > { %v3378_v33 = vadd.f32 %v6244_v41, %v3377_v31 }
 0x4c6   : > { %v3430_v47 = vadd.f32 %v3378_v33, %v3257_v0  ;;  %v3270_v33 = vld [vmem:[%s4760_s29 + $0xf8] sm:$0xff] }
 0x4c8   : > { %v3462_v14 = vmax.f32 %v3430_v47, 0.0 }
 0x4ca   : > { %3494 = vst.msk [vmem:[%s6256_s30 + $0x90] sm:$0xff] %vm478_vm0, %v3462_v14 }
 0x4cb   : > { %v3379_v58 = vpop.f32.mrf.mxu2 }
 0x4cc   : > { %v3380_v20 = vadd.f32 %v6244_v41, %v3379_v58 }
 0x4ce   : > { %v3431_v35 = vadd.f32 %v3380_v20, %v3258_v2 }
 0x4d0   : > { %v3463_v1 = vmax.f32 %v3431_v35, 0.0 }
 0x4d2   : > { %3495 = vst.msk [vmem:[%s6256_s30 + $0x98] sm:$0xff] %vm478_vm0, %v3463_v1 }
 0x4d3   : > { %v3382_v19 = vpop.f32.mrf.mxu2 }
 0x4d4   : > { %v3383_v61 = vadd.f32 %v6244_v41, %v3382_v19 }
 0x4d6   : > { %v3432_v60 = vadd.f32 %v3383_v61, %v3259_v38 }
 0x4d8   : > { %v3464_v21 = vmax.f32 %v3432_v60, 0.0 }
 0x4da   : > { %3496 = vst.msk [vmem:[%s6256_s30 + $0xa0] sm:$0xff] %vm478_vm0, %v3464_v21 }
 0x4db   : > { %v3384_v62 = vpop.f32.mrf.mxu2 }
 0x4dc   : > { %v3385_v15 = vadd.f32 %v6244_v41, %v3384_v62 }
 0x4de   : > { %v3433_v5 = vadd.f32 %v3385_v15, %v3260_v22 }
 0x4e0   : > { %v3465_v45 = vmax.f32 %v3433_v5, 0.0 }
 0x4e2   : > { %3497 = vst.msk [vmem:[%s6256_s30 + $0xa8] sm:$0xff] %vm478_vm0, %v3465_v45 }
 0x4e3   : > { %v3387_v12 = vpop.f32.mrf.mxu2 }
 0x4e4   : > { %v3388_v42 = vadd.f32 %v6244_v41, %v3387_v12 }
 0x4e6   : > { %v3434_v30 = vadd.f32 %v3388_v42, %v3261_v10 }
 0x4e8   : > { %v3466_v49 = vmax.f32 %v3434_v30, 0.0 }
 0x4ea   : > { %3498 = vst.msk [vmem:[%s6256_s30 + $0xb0] sm:$0xff] %vm478_vm0, %v3466_v49 }
 0x4eb   : > { %v3389_v16 = vpop.f32.mrf.mxu2 }
 0x4ec   : > { %v3390_v17 = vadd.f32 %v6244_v41, %v3389_v16 }
 0x4ee   : > { %v3435_v7 = vadd.f32 %v3390_v17, %v3262_v63 }
 0x4f0   : > { %v3467_v26 = vmax.f32 %v3435_v7, 0.0 }
 0x4f2   : > { %3499 = vst.msk [vmem:[%s6256_s30 + $0xb8] sm:$0xff] %vm478_vm0, %v3467_v26 }
 0x4f3   : > { %v3392_v51 = vpop.f32.mrf.mxu2 }
 0x4f4   : > { %v3393_v11 = vadd.f32 %v6244_v41, %v3392_v51 }
 0x4f6   : > { %v3436_v27 = vadd.f32 %v3393_v11, %v3263_v18 }
 0x4f8   : > { %v3468_v43 = vmax.f32 %v3436_v27, 0.0 }
 0x4fa   : > { %3500 = vst.msk [vmem:[%s6256_s30 + $0xc0] sm:$0xff] %vm478_vm0, %v3468_v43 }
 0x4fb   : > { %v3394_v3 = vpop.f32.mrf.mxu2 }
 0x4fc   : > { %v3395_v46 = vadd.f32 %v6244_v41, %v3394_v3 }
 0x4fe   : > { %v3437_v48 = vadd.f32 %v3395_v46, %v3264_v50 }
 0x500   : > { %v3469_v55 = vmax.f32 %v3437_v48, 0.0 }
 0x502   : > { %3501 = vst.msk [vmem:[%s6256_s30 + $0xc8] sm:$0xff] %vm478_vm0, %v3469_v55 }
 0x503   : > { %v3397_v28 = vpop.f32.mrf.mxu2 }
 0x504   : > { %v3398_v36 = vadd.f32 %v6244_v41, %v3397_v28 }
 0x506   : > { %v3438_v54 = vadd.f32 %v3398_v36, %v3265_v29 }
 0x508   : > { %v3470_v4 = vmax.f32 %v3438_v54, 0.0 }
 0x50a   : > { %3502 = vst.msk [vmem:[%s6256_s30 + $0xd0] sm:$0xff] %vm478_vm0, %v3470_v4 }
 0x50b   : > { %v3399_v6 = vpop.f32.mrf.mxu2 }
 0x50c   : > { %v3400_v59 = vadd.f32 %v6244_v41, %v3399_v6 }
 0x50e   : > { %v3439_v13 = vadd.f32 %v3400_v59, %v3266_v44 }
 0x510   : > { %v3471_v56 = vmax.f32 %v3439_v13, 0.0 }
 0x512   : > { %3503 = vst.msk [vmem:[%s6256_s30 + $0xd8] sm:$0xff] %vm478_vm0, %v3471_v56 }
 0x513   : > { %v3402_v25 = vpop.f32.mrf.mxu2 }
 0x514   : > { %v3403_v57 = vadd.f32 %v6244_v41, %v3402_v25 }
 0x516   : > { %v3440_v23 = vadd.f32 %v3403_v57, %v3267_v32 }
 0x518   : > { %v3472_v9 = vmax.f32 %v3440_v23, 0.0 }
 0x51a   : > { %3504 = vst.msk [vmem:[%s6256_s30 + $0xe0] sm:$0xff] %vm478_vm0, %v3472_v9 }
 0x51b   : > { %v3404_v8 = vpop.f32.mrf.mxu2 }
 0x51c   : > { %v3405_v53 = vadd.f32 %v6244_v41, %v3404_v8 }
 0x51e   : > { %v3441_v52 = vadd.f32 %v3405_v53, %v3268_v40 }
 0x520   : > { %v3473_v34 = vmax.f32 %v3441_v52, 0.0 }
 0x522   : > { %3505 = vst.msk [vmem:[%s6256_s30 + $0xe8] sm:$0xff] %vm478_vm0, %v3473_v34 }
 0x523   : > { %v3407_v24 = vpop.f32.mrf.mxu2 }
 0x524   : > { %v3408_v39 = vadd.f32 %v6244_v41, %v3407_v24 }
 0x526   : > { %v3442_v0 = vadd.f32 %v3408_v39, %v3269_v37 }
 0x528   : > { %v3474_v31 = vmax.f32 %v3442_v0, 0.0 }
 0x52a   : > { %3506 = vst.msk [vmem:[%s6256_s30 + $0xf0] sm:$0xff] %vm478_vm0, %v3474_v31 }
 0x52b   : > { %v3409_v47 = vpop.f32.mrf.mxu2 }
 0x52c   : > { %v3410_v14 = vadd.f32 %v6244_v41, %v3409_v47 }
 0x52e   : > { %v3443_v2 = vadd.f32 %v3410_v14, %v3270_v33 }
 0x530   : > { %v3475_v58 = vmax.f32 %v3443_v2, 0.0 }
 0x532   : > { %3507 = vst.msk [vmem:[%s6256_s30 + $0xf8] sm:$0xff] %vm478_vm0, %v3475_v58 }
 0x533   : > { %4566 = shalt.err (!%p4563_p10)
}
 0x534   : > { %s4617_s23 = smov 128   ;;  %s4618_s30 = smov 8  }
 0x535   : > { %4404 = dma.vmem_to_hbm [thread:$0]  (%p4726_p7), %s3522_s9, 4096, %s3524_s10, %s3509_s28, %s4617_s23, %s4617_s23, %s4618_s30  }
 0x536 PF: > { %s3538_s19 = sand.u32 1, %s4597_s24   ;;  %p6856_p12 = scmp.ge.s32.totalorder %s4609_s27, 2 }
 0x537   : > { %s3539_s16 = scalar_lea.sflag [#allocation5], %s3538_s19 }
 0x538   : > { %p4415_p13 = pnand %p6856_p12, %p4694_p6 }
 0x53a   : > { %p4416_p0 = pneg %p4415_p13 }
 0x53c   : > { %4592 = dma.done.wait (%p4416_p0), %s3539_s16, 4096  }
 0x53d   : > { %4594 = vsyncadd (%p4416_p0), %s3539_s16, 4294963200  ;;  %p21_p3 = scmp.ge.s32.totalorder %s4712_s15, 4   ;;  %s6857_s24 = smov %s4601_s25 }
 0x53e   : > { %s6858_s25 = smov %s4605_s26  ;;  %s6859_s26 = smov %s4722_s20 }
 0x53f   : > { %s6860_s27 = smov %s4712_s15  ;;  %23 = sbr.rel (!%p21_p3) target bundleno = 8 (0x8), region = 102 }
 0x544   :  { %3545 = vsyncpa [#allocation4], 1 }
 0x545   :  { %3547 = vsyncpa [#allocation4 + $0x1], 1 }
 0x546   :  { %3548 = vsyncpa [#allocation7], 1 }
 0x547   :  { %3549 = vsyncpa [#allocation5], 1 }
 0x548   :  { %3551 = vsyncpa [#allocation5 + $0x1], 1 }

</bundles_post_ra>
